<compile_context>
chip_gen: v7x
topology: tpu7x:2x2x1
jax: 0.10.0
libtpu: 0.0.40
codegen_flags: <defaults>
</compile_context>

<pallas_src>
import jax
import jax.numpy as jnp
from jax.experimental import pallas as pl
from jax.experimental.pallas import tpu as pltpu

GN_C = 8        # number of GroupNorm groups (module-level `gn_c`)
GN_EPS = 1e-5   # torch.nn.GroupNorm default eps


def _geometry(H, W):
    """Padded-flat geometry for the shift-and-matmul conv."""
    Hp, Wp = H + 2, W + 2
    top = (-Wp) % 8
    if top == 0:
        top = 8                      # need >=1 margin row above the padded image
    L = H * Wp                       # rows of one conv band (valid rows x padded width)
    start0 = top + Wp                # multiple of 8 -> aligned interior stores
    Rtot = top + Hp * Wp + top       # total rows of the padded-flat buffers
    return Hp, Wp, L, Rtot, start0


def _group_mat(C):
    """(C, C) block-diagonal ones: 1 where two channels share a GN group."""
    cpg = C // GN_C
    g = jnp.arange(C) // cpg
    return (g[:, None] == g[None, :]).astype(jnp.float32)


def _make_kernel(H, W, Cin, Cmid, Cout):
    if Cmid % GN_C or Cout % GN_C:
        raise ValueError("middle/out channels must be divisible by gn_c")
    Hp, Wp, L, Rtot, start0 = _geometry(H, W)
    cnt1 = float(H * W * (Cmid // GN_C))
    cnt2 = float(H * W * (Cout // GN_C))

    def kernel(x_ref, w1_ref, b1_ref, g1_ref, be1_ref, gm1_ref,
               w2_ref, b2_ref, g2_ref, be2_ref, gm2_ref, mask_ref,
               o_ref, f2_ref):
        # Materialize the (L,1)->(L,C) mask broadcast once and reuse it.
        mask1 = mask_ref[...]                               # (L, 1)
        mask_mid = jnp.broadcast_to(mask1, (L, Cmid))       # (L, Cmid)

        def conv3x3(read, w_ref, b_ref, co):
            # 9 shift-and-matmul taps over the zero-padded flattened image.
            # bf16 MXU operands, f32 accumulation.
            acc = jnp.zeros((L, co), jnp.float32)
            for t in range(9):
                dy, dx = t // 3, t % 3
                s = start0 + (dy - 1) * Wp + (dx - 1)       # static row offset
                acc = acc + jnp.dot(read(s).astype(jnp.bfloat16), w_ref[t],
                                    preferred_element_type=jnp.float32)
            return acc + b_ref[...]

        def gn_relu(ym, gm_ref, gamma_ref, beta_ref, count):
            # Single-pass GroupNorm on the already-masked activation `ym`:
            # one sweep gives sum(y) and sum(y^2); var = E[y^2] - mean^2.
            csum = jnp.sum(ym, axis=0, keepdims=True)       # (1, C)
            sqsum = jnp.sum(ym * ym, axis=0, keepdims=True)  # (1, C)
            inv_cnt = 1.0 / count
            mean_c = jnp.dot(csum, gm_ref[...],
                             preferred_element_type=jnp.float32) * inv_cnt
            ex2_c = jnp.dot(sqsum, gm_ref[...],
                            preferred_element_type=jnp.float32) * inv_cnt
            inv = jax.lax.rsqrt(ex2_c - mean_c * mean_c + GN_EPS)
            return jnp.maximum((ym - mean_c) * (inv * gamma_ref[...])
                               + beta_ref[...], 0.0)

        # Zero the margin / vertical-pad rows of the staging buffer every step
        # (scratch is not zero-initialized; step 0 may not run on every core
        # when the batch axis is sharded across TensorCores).
        f2_ref[0:start0, :] = jnp.zeros((start0, Cmid), jnp.float32)
        f2_ref[start0 + L:Rtot, :] = jnp.zeros((Rtot - start0 - L, Cmid),
                                               jnp.float32)

        # ---- layer 1: conv3x3 -> GroupNorm -> ReLU ----
        y1 = conv3x3(lambda s: x_ref[s:s + L, :], w1_ref, b1_ref, Cmid)
        y1 = y1 * mask_mid                                  # pad columns -> 0
        a1 = gn_relu(y1, gm1_ref, g1_ref, be1_ref, cnt1) * mask_mid
        # stage as the zero-padded flat input of conv2 (8-row-aligned store)
        f2_ref[start0:start0 + L, :] = a1

        # ---- layer 2: conv3x3 -> GroupNorm -> ReLU ----
        y2 = conv3x3(lambda s: f2_ref[s:s + L, :], w2_ref, b2_ref, Cout)
        y2 = y2 * jnp.broadcast_to(mask1, (L, Cout))
        # No trailing mask: the wrapper strips the pad columns of the output.
        o_ref[...] = gn_relu(y2, gm2_ref, g2_ref, be2_ref, cnt2)

    return kernel, (Hp, Wp, L, Rtot, start0)


@jax.jit
def vgg_block_forward(x, params):
    """JAX/Pallas equivalent of VGGBlock.forward.  x: (N, Cin, H, W) float32."""
    N, Cin, H, W = x.shape
    w1, b1, g1, be1 = params["w1"], params["b1"], params["g1"], params["be1"]
    w2, b2, g2, be2 = params["w2"], params["b2"], params["g2"], params["be2"]
    Cmid, Cout = w1.shape[0], w2.shape[0]

    kernel, (Hp, Wp, L, Rtot, start0) = _make_kernel(H, W, Cin, Cmid, Cout)
    top = start0 - Wp

    # ---- wrapper-side layout plumbing only (no compute hoisted) ----
    xh = jnp.transpose(x, (0, 2, 3, 1)).astype(jnp.float32)            # (N, H, W, Cin)
    xp = jnp.pad(xh, ((0, 0), (1, 1), (1, 1), (0, 0)))                 # (N, Hp, Wp, Cin)
    xf = jnp.pad(xp.reshape(N, Hp * Wp, Cin),
                 ((0, 0), (top, Rtot - top - Hp * Wp), (0, 0)))        # (N, Rtot, Cin)

    # Per-tap weight matrices (bf16 MXU operands): tap t = dy*3+dx,
    # W_t[ci, co] = w_torch[co, ci, dy, dx]
    w1t = jnp.transpose(w1, (2, 3, 1, 0)).reshape(9, Cin, Cmid).astype(jnp.bfloat16)
    w2t = jnp.transpose(w2, (2, 3, 1, 0)).reshape(9, Cmid, Cout).astype(jnp.bfloat16)

    col = jnp.arange(L) % Wp
    mask = ((col >= 1) & (col <= W)).astype(jnp.float32)[:, None]      # (L, 1)

    args = (xf,
            w1t, b1.reshape(1, Cmid).astype(jnp.float32),
            g1.reshape(1, Cmid).astype(jnp.float32),
            be1.reshape(1, Cmid).astype(jnp.float32),
            _group_mat(Cmid),
            w2t, b2.reshape(1, Cout).astype(jnp.float32),
            g2.reshape(1, Cout).astype(jnp.float32),
            be2.reshape(1, Cout).astype(jnp.float32),
            _group_mat(Cout),
            mask)

    rep2 = lambda n: (0, 0)        # broadcast (same block every batch step)
    rep3 = lambda n: (0, 0, 0)
    in_specs = [
        pl.BlockSpec((None, Rtot, Cin), lambda n: (n, 0, 0)),   # x: one image per step
        pl.BlockSpec((9, Cin, Cmid), rep3),                     # w1 taps
        pl.BlockSpec((1, Cmid), rep2), pl.BlockSpec((1, Cmid), rep2),
        pl.BlockSpec((1, Cmid), rep2), pl.BlockSpec((Cmid, Cmid), rep2),
        pl.BlockSpec((9, Cmid, Cout), rep3),                    # w2 taps
        pl.BlockSpec((1, Cout), rep2), pl.BlockSpec((1, Cout), rep2),
        pl.BlockSpec((1, Cout), rep2), pl.BlockSpec((Cout, Cout), rep2),
        pl.BlockSpec((L, 1), rep2),                             # column mask
    ]
    out_spec = pl.BlockSpec((None, L, Cout), lambda n: (n, 0, 0))

    flops = 2 * N * L * 9 * (Cin * Cmid + Cmid * Cout)
    bytes_accessed = (4 * xf.size + 2 * (w1t.size + w2t.size)
                      + 4 * N * L * Cout + 4 * (L + 8 * (Cmid + Cout)))

    band = pl.pallas_call(
        kernel,
        out_shape=jax.ShapeDtypeStruct((N, L, Cout), jnp.float32),
        grid_spec=pltpu.PrefetchScalarGridSpec(
            num_scalar_prefetch=0,
            grid=(N,),
            in_specs=in_specs,
            out_specs=out_spec,
            scratch_shapes=[pltpu.VMEM((Rtot, Cmid), jnp.float32)]),
        compiler_params=pltpu.CompilerParams(
            dimension_semantics=("parallel",),          # v7x: shard batch over 2 TCs
            vmem_limit_bytes=32 * 1024 * 1024),         # explicit (v5e default is 16 MiB)
        cost_estimate=pl.CostEstimate(flops=int(flops),
                                      transcendentals=int(N * (Cmid + Cout)),
                                      bytes_accessed=int(bytes_accessed)),
    )(*args)

    # Strip the padding columns and return NCHW like the PyTorch module.
    out = band.reshape(N, H, Wp, Cout)[:, :, 1:W + 1, :]
    return jnp.transpose(out, (0, 3, 1, 2))


# ---------------- pure-JAX reference (for validation only) ----------------
def _reference(x, params):
    def conv(z, w, b):
        y = jax.lax.conv_general_dilated(
            z, w, window_strides=(1, 1), padding=((1, 1), (1, 1)),
            dimension_numbers=("NCHW", "OIHW", "NCHW"),
            precision=jax.lax.Precision.HIGHEST)
        return y + b[None, :, None, None]

    def gn(z, gamma, beta):
        N, C, H, W = z.shape
        zg = z.reshape(N, GN_C, C // GN_C, H, W)
        mu = jnp.mean(zg, axis=(2, 3, 4), keepdims=True)
        var = jnp.mean((zg - mu) ** 2, axis=(2, 3, 4), keepdims=True)
        zn = ((zg - mu) / jnp.sqrt(var + GN_EPS)).reshape(N, C, H, W)
        return zn * gamma[None, :, None, None] + beta[None, :, None, None]

    y = jax.nn.relu(gn(conv(x, params["w1"], params["b1"]), params["g1"], params["be1"]))
    y = jax.nn.relu(gn(conv(y, params["w2"], params["b2"]), params["g2"], params["be2"]))
    return y


if __name__ == "__main__":
    N, Cin, Cmid, Cout, H, W = 2, 8, 16, 16, 16, 16   # small, gn_c-compatible shapes

    key = jax.random.PRNGKey(0)
    ks = jax.random.split(key, 9)
    params = {
        "w1": 0.2 * jax.random.normal(ks[0], (Cmid, Cin, 3, 3), jnp.float32),
        "b1": 0.1 * jax.random.normal(ks[1], (Cmid,), jnp.float32),
        "g1": 1.0 + 0.1 * jax.random.normal(ks[2], (Cmid,), jnp.float32),
        "be1": 0.1 * jax.random.normal(ks[3], (Cmid,), jnp.float32),
        "w2": 0.2 * jax.random.normal(ks[4], (Cout, Cmid, 3, 3), jnp.float32),
        "b2": 0.1 * jax.random.normal(ks[5], (Cout,), jnp.float32),
        "g2": 1.0 + 0.1 * jax.random.normal(ks[6], (Cout,), jnp.float32),
        "be2": 0.1 * jax.random.normal(ks[7], (Cout,), jnp.float32),
    }
    x = jax.random.normal(ks[8], (N, Cin, H, W), jnp.float32)

    out = jax.block_until_ready(vgg_block_forward(x, params))
    ref = jax.block_until_ready(_reference(x, params))

    assert out.shape == (N, Cout, H, W), out.shape
    assert out.dtype == jnp.float32
    assert bool(jnp.all(jnp.isfinite(out)))
    max_err = float(jnp.max(jnp.abs(out - ref)))
    mean_err = float(jnp.mean(jnp.abs(out - ref)))
    # generous tolerances: bf16 MXU operands vs HIGHEST-precision f32 reference
    assert max_err < 1e-1, f"max abs error {max_err}"
    assert mean_err < 2e-2, f"mean abs error {mean_err}"

    print("KERNEL_OK")
</pallas_src>

<mosaic_0001>
module attributes {stable_mosaic.version = 11 : i64} {
  func.func @kernel(%arg0: i32, %arg1: memref<1x336x8xf32, #tpu.memory_space<vmem>>, %arg2: memref<9x8x16xbf16, #tpu.memory_space<vmem>>, %arg3: memref<1x16xf32, #tpu.memory_space<vmem>>, %arg4: memref<1x16xf32, #tpu.memory_space<vmem>>, %arg5: memref<1x16xf32, #tpu.memory_space<vmem>>, %arg6: memref<16x16xf32, #tpu.memory_space<vmem>>, %arg7: memref<9x16x16xbf16, #tpu.memory_space<vmem>>, %arg8: memref<1x16xf32, #tpu.memory_space<vmem>>, %arg9: memref<1x16xf32, #tpu.memory_space<vmem>>, %arg10: memref<1x16xf32, #tpu.memory_space<vmem>>, %arg11: memref<16x16xf32, #tpu.memory_space<vmem>>, %arg12: memref<288x1xf32, #tpu.memory_space<vmem>>, %arg13: memref<1x288x16xf32, #tpu.memory_space<vmem>>, %arg14: memref<336x16xf32, #tpu.memory_space<vmem>>) attributes {dimension_semantics = [#tpu.dimension_semantics<parallel>], iteration_bounds = array<i64: 2>, scalar_prefetch = 0 : i64, scratch_operands = 1 : i64, tpu.core_type = #tpu.core_type<tc>, window_params = [{transform_indices = @transform_0, window_bounds = array<i64: 1, 336, 8>}, {pipeline_mode = #tpu.pipeline_mode<synchronous>, transform_indices = @transform_1, window_bounds = array<i64: 9, 8, 16>}, {pipeline_mode = #tpu.pipeline_mode<synchronous>, transform_indices = @transform_2, window_bounds = array<i64: 1, 16>}, {pipeline_mode = #tpu.pipeline_mode<synchronous>, transform_indices = @transform_3, window_bounds = array<i64: 1, 16>}, {pipeline_mode = #tpu.pipeline_mode<synchronous>, transform_indices = @transform_4, window_bounds = array<i64: 1, 16>}, {pipeline_mode = #tpu.pipeline_mode<synchronous>, transform_indices = @transform_5, window_bounds = array<i64: 16, 16>}, {pipeline_mode = #tpu.pipeline_mode<synchronous>, transform_indices = @transform_6, window_bounds = array<i64: 9, 16, 16>}, {pipeline_mode = #tpu.pipeline_mode<synchronous>, transform_indices = @transform_7, window_bounds = array<i64: 1, 16>}, {pipeline_mode = #tpu.pipeline_mode<synchronous>, transform_indices = @transform_8, window_bounds = array<i64: 1, 16>}, {pipeline_mode = #tpu.pipeline_mode<synchronous>, transform_indices = @transform_9, window_bounds = array<i64: 1, 16>}, {pipeline_mode = #tpu.pipeline_mode<synchronous>, transform_indices = @transform_10, window_bounds = array<i64: 16, 16>}, {pipeline_mode = #tpu.pipeline_mode<synchronous>, transform_indices = @transform_11, window_bounds = array<i64: 288, 1>}, {transform_indices = @transform_12, window_bounds = array<i64: 1, 288, 16>}]} {
    %c0 = arith.constant 0 : index
    %c0_0 = arith.constant 0 : index
    %0 = vector.load %arg12[%c0, %c0_0] : memref<288x1xf32, #tpu.memory_space<vmem>>, vector<288x1xf32>
    %1 = vector.shape_cast %0 : vector<288x1xf32> to vector<288x1xf32>
    %2 = vector.broadcast %1 : vector<288x1xf32> to vector<288x16xf32>
    %cst = arith.constant 0.000000e+00 : f32
    %3 = vector.broadcast %cst : f32 to vector<24x16xf32>
    %c0_1 = arith.constant 0 : index
    %c0_2 = arith.constant 0 : index
    %4 = vector.load %arg14[%c0_1, %c0_2] : memref<336x16xf32, #tpu.memory_space<vmem>>, vector<24x16xf32>
    tpu.vector_store %arg14[%c0_1, %c0_2], %3 {strides = array<i32>} : memref<336x16xf32, #tpu.memory_space<vmem>>, vector<24x16xf32>,
    %cst_3 = arith.constant 0.000000e+00 : f32
    %5 = vector.broadcast %cst_3 : f32 to vector<24x16xf32>
    %c312 = arith.constant 312 : index
    %c0_4 = arith.constant 0 : index
    %6 = vector.load %arg14[%c312, %c0_4] : memref<336x16xf32, #tpu.memory_space<vmem>>, vector<24x16xf32>
    tpu.vector_store %arg14[%c312, %c0_4], %5 {strides = array<i32>} : memref<336x16xf32, #tpu.memory_space<vmem>>, vector<24x16xf32>,
    %cst_5 = arith.constant 0.000000e+00 : f32
    %7 = vector.broadcast %cst_5 : f32 to vector<288x16xf32>
    %c0_6 = arith.constant 0 : index
    %c5 = arith.constant 5 : index
    %c0_7 = arith.constant 0 : index
    %8 = vector.load %arg1[%c0_6, %c5, %c0_7] : memref<1x336x8xf32, #tpu.memory_space<vmem>>, vector<1x288x8xf32>
    %9 = vector.shape_cast %8 : vector<1x288x8xf32> to vector<288x8xf32>
    %10 = arith.truncf %9 : vector<288x8xf32> to vector<288x8xbf16>
    %c0_8 = arith.constant 0 : index
    %c0_9 = arith.constant 0 : index
    %c0_10 = arith.constant 0 : index
    %11 = vector.load %arg2[%c0_8, %c0_9, %c0_10] : memref<9x8x16xbf16, #tpu.memory_space<vmem>>, vector<1x8x16xbf16>
    %12 = vector.shape_cast %11 : vector<1x8x16xbf16> to vector<8x16xbf16>
    %cst_11 = arith.constant dense<0.000000e+00> : vector<288x16xf32>
    %13 = tpu.matmul %10, %12, %cst_11 {dimension_numbers = #tpu.dot_dimension_numbers<[1], [0], [0], [1], [0, 0, 1, 1], [], []>} : vector<288x8xbf16>, vector<8x16xbf16>, vector<288x16xf32> -> vector<288x16xf32>
    %14 = arith.addf %7, %13 : vector<288x16xf32>
    %c0_12 = arith.constant 0 : index
    %c6 = arith.constant 6 : index
    %c0_13 = arith.constant 0 : index
    %15 = vector.load %arg1[%c0_12, %c6, %c0_13] : memref<1x336x8xf32, #tpu.memory_space<vmem>>, vector<1x288x8xf32>
    %16 = vector.shape_cast %15 : vector<1x288x8xf32> to vector<288x8xf32>
    %17 = arith.truncf %16 : vector<288x8xf32> to vector<288x8xbf16>
    %c1 = arith.constant 1 : index
    %c0_14 = arith.constant 0 : index
    %c0_15 = arith.constant 0 : index
    %18 = vector.load %arg2[%c1, %c0_14, %c0_15] : memref<9x8x16xbf16, #tpu.memory_space<vmem>>, vector<1x8x16xbf16>
    %19 = vector.shape_cast %18 : vector<1x8x16xbf16> to vector<8x16xbf16>
    %cst_16 = arith.constant dense<0.000000e+00> : vector<288x16xf32>
    %20 = tpu.matmul %17, %19, %cst_16 {dimension_numbers = #tpu.dot_dimension_numbers<[1], [0], [0], [1], [0, 0, 1, 1], [], []>} : vector<288x8xbf16>, vector<8x16xbf16>, vector<288x16xf32> -> vector<288x16xf32>
    %21 = arith.addf %14, %20 : vector<288x16xf32>
    %c0_17 = arith.constant 0 : index
    %c7 = arith.constant 7 : index
    %c0_18 = arith.constant 0 : index
    %22 = vector.load %arg1[%c0_17, %c7, %c0_18] : memref<1x336x8xf32, #tpu.memory_space<vmem>>, vector<1x288x8xf32>
    %23 = vector.shape_cast %22 : vector<1x288x8xf32> to vector<288x8xf32>
    %24 = arith.truncf %23 : vector<288x8xf32> to vector<288x8xbf16>
    %c2 = arith.constant 2 : index
    %c0_19 = arith.constant 0 : index
    %c0_20 = arith.constant 0 : index
    %25 = vector.load %arg2[%c2, %c0_19, %c0_20] : memref<9x8x16xbf16, #tpu.memory_space<vmem>>, vector<1x8x16xbf16>
    %26 = vector.shape_cast %25 : vector<1x8x16xbf16> to vector<8x16xbf16>
    %cst_21 = arith.constant dense<0.000000e+00> : vector<288x16xf32>
    %27 = tpu.matmul %24, %26, %cst_21 {dimension_numbers = #tpu.dot_dimension_numbers<[1], [0], [0], [1], [0, 0, 1, 1], [], []>} : vector<288x8xbf16>, vector<8x16xbf16>, vector<288x16xf32> -> vector<288x16xf32>
    %28 = arith.addf %21, %27 : vector<288x16xf32>
    %c0_22 = arith.constant 0 : index
    %c23 = arith.constant 23 : index
    %c0_23 = arith.constant 0 : index
    %29 = vector.load %arg1[%c0_22, %c23, %c0_23] : memref<1x336x8xf32, #tpu.memory_space<vmem>>, vector<1x288x8xf32>
    %30 = vector.shape_cast %29 : vector<1x288x8xf32> to vector<288x8xf32>
    %31 = arith.truncf %30 : vector<288x8xf32> to vector<288x8xbf16>
    %c3 = arith.constant 3 : index
    %c0_24 = arith.constant 0 : index
    %c0_25 = arith.constant 0 : index
    %32 = vector.load %arg2[%c3, %c0_24, %c0_25] : memref<9x8x16xbf16, #tpu.memory_space<vmem>>, vector<1x8x16xbf16>
    %33 = vector.shape_cast %32 : vector<1x8x16xbf16> to vector<8x16xbf16>
    %cst_26 = arith.constant dense<0.000000e+00> : vector<288x16xf32>
    %34 = tpu.matmul %31, %33, %cst_26 {dimension_numbers = #tpu.dot_dimension_numbers<[1], [0], [0], [1], [0, 0, 1, 1], [], []>} : vector<288x8xbf16>, vector<8x16xbf16>, vector<288x16xf32> -> vector<288x16xf32>
    %35 = arith.addf %28, %34 : vector<288x16xf32>
    %c0_27 = arith.constant 0 : index
    %c24 = arith.constant 24 : index
    %c0_28 = arith.constant 0 : index
    %36 = vector.load %arg1[%c0_27, %c24, %c0_28] : memref<1x336x8xf32, #tpu.memory_space<vmem>>, vector<1x288x8xf32>
    %37 = vector.shape_cast %36 : vector<1x288x8xf32> to vector<288x8xf32>
    %38 = arith.truncf %37 : vector<288x8xf32> to vector<288x8xbf16>
    %c4 = arith.constant 4 : index
    %c0_29 = arith.constant 0 : index
    %c0_30 = arith.constant 0 : index
    %39 = vector.load %arg2[%c4, %c0_29, %c0_30] : memref<9x8x16xbf16, #tpu.memory_space<vmem>>, vector<1x8x16xbf16>
    %40 = vector.shape_cast %39 : vector<1x8x16xbf16> to vector<8x16xbf16>
    %cst_31 = arith.constant dense<0.000000e+00> : vector<288x16xf32>
    %41 = tpu.matmul %38, %40, %cst_31 {dimension_numbers = #tpu.dot_dimension_numbers<[1], [0], [0], [1], [0, 0, 1, 1], [], []>} : vector<288x8xbf16>, vector<8x16xbf16>, vector<288x16xf32> -> vector<288x16xf32>
    %42 = arith.addf %35, %41 : vector<288x16xf32>
    %c0_32 = arith.constant 0 : index
    %c25 = arith.constant 25 : index
    %c0_33 = arith.constant 0 : index
    %43 = vector.load %arg1[%c0_32, %c25, %c0_33] : memref<1x336x8xf32, #tpu.memory_space<vmem>>, vector<1x288x8xf32>
    %44 = vector.shape_cast %43 : vector<1x288x8xf32> to vector<288x8xf32>
    %45 = arith.truncf %44 : vector<288x8xf32> to vector<288x8xbf16>
    %c5_34 = arith.constant 5 : index
    %c0_35 = arith.constant 0 : index
    %c0_36 = arith.constant 0 : index
    %46 = vector.load %arg2[%c5_34, %c0_35, %c0_36] : memref<9x8x16xbf16, #tpu.memory_space<vmem>>, vector<1x8x16xbf16>
    %47 = vector.shape_cast %46 : vector<1x8x16xbf16> to vector<8x16xbf16>
    %cst_37 = arith.constant dense<0.000000e+00> : vector<288x16xf32>
    %48 = tpu.matmul %45, %47, %cst_37 {dimension_numbers = #tpu.dot_dimension_numbers<[1], [0], [0], [1], [0, 0, 1, 1], [], []>} : vector<288x8xbf16>, vector<8x16xbf16>, vector<288x16xf32> -> vector<288x16xf32>
    %49 = arith.addf %42, %48 : vector<288x16xf32>
    %c0_38 = arith.constant 0 : index
    %c41 = arith.constant 41 : index
    %c0_39 = arith.constant 0 : index
    %50 = vector.load %arg1[%c0_38, %c41, %c0_39] : memref<1x336x8xf32, #tpu.memory_space<vmem>>, vector<1x288x8xf32>
    %51 = vector.shape_cast %50 : vector<1x288x8xf32> to vector<288x8xf32>
    %52 = arith.truncf %51 : vector<288x8xf32> to vector<288x8xbf16>
    %c6_40 = arith.constant 6 : index
    %c0_41 = arith.constant 0 : index
    %c0_42 = arith.constant 0 : index
    %53 = vector.load %arg2[%c6_40, %c0_41, %c0_42] : memref<9x8x16xbf16, #tpu.memory_space<vmem>>, vector<1x8x16xbf16>
    %54 = vector.shape_cast %53 : vector<1x8x16xbf16> to vector<8x16xbf16>
    %cst_43 = arith.constant dense<0.000000e+00> : vector<288x16xf32>
    %55 = tpu.matmul %52, %54, %cst_43 {dimension_numbers = #tpu.dot_dimension_numbers<[1], [0], [0], [1], [0, 0, 1, 1], [], []>} : vector<288x8xbf16>, vector<8x16xbf16>, vector<288x16xf32> -> vector<288x16xf32>
    %56 = arith.addf %49, %55 : vector<288x16xf32>
    %c0_44 = arith.constant 0 : index
    %c42 = arith.constant 42 : index
    %c0_45 = arith.constant 0 : index
    %57 = vector.load %arg1[%c0_44, %c42, %c0_45] : memref<1x336x8xf32, #tpu.memory_space<vmem>>, vector<1x288x8xf32>
    %58 = vector.shape_cast %57 : vector<1x288x8xf32> to vector<288x8xf32>
    %59 = arith.truncf %58 : vector<288x8xf32> to vector<288x8xbf16>
    %c7_46 = arith.constant 7 : index
    %c0_47 = arith.constant 0 : index
    %c0_48 = arith.constant 0 : index
    %60 = vector.load %arg2[%c7_46, %c0_47, %c0_48] : memref<9x8x16xbf16, #tpu.memory_space<vmem>>, vector<1x8x16xbf16>
    %61 = vector.shape_cast %60 : vector<1x8x16xbf16> to vector<8x16xbf16>
    %cst_49 = arith.constant dense<0.000000e+00> : vector<288x16xf32>
    %62 = tpu.matmul %59, %61, %cst_49 {dimension_numbers = #tpu.dot_dimension_numbers<[1], [0], [0], [1], [0, 0, 1, 1], [], []>} : vector<288x8xbf16>, vector<8x16xbf16>, vector<288x16xf32> -> vector<288x16xf32>
    %63 = arith.addf %56, %62 : vector<288x16xf32>
    %c0_50 = arith.constant 0 : index
    %c43 = arith.constant 43 : index
    %c0_51 = arith.constant 0 : index
    %64 = vector.load %arg1[%c0_50, %c43, %c0_51] : memref<1x336x8xf32, #tpu.memory_space<vmem>>, vector<1x288x8xf32>
    %65 = vector.shape_cast %64 : vector<1x288x8xf32> to vector<288x8xf32>
    %66 = arith.truncf %65 : vector<288x8xf32> to vector<288x8xbf16>
    %c8 = arith.constant 8 : index
    %c0_52 = arith.constant 0 : index
    %c0_53 = arith.constant 0 : index
    %67 = vector.load %arg2[%c8, %c0_52, %c0_53] : memref<9x8x16xbf16, #tpu.memory_space<vmem>>, vector<1x8x16xbf16>
    %68 = vector.shape_cast %67 : vector<1x8x16xbf16> to vector<8x16xbf16>
    %cst_54 = arith.constant dense<0.000000e+00> : vector<288x16xf32>
    %69 = tpu.matmul %66, %68, %cst_54 {dimension_numbers = #tpu.dot_dimension_numbers<[1], [0], [0], [1], [0, 0, 1, 1], [], []>} : vector<288x8xbf16>, vector<8x16xbf16>, vector<288x16xf32> -> vector<288x16xf32>
    %70 = arith.addf %63, %69 : vector<288x16xf32>
    %c0_55 = arith.constant 0 : index
    %c0_56 = arith.constant 0 : index
    %71 = vector.load %arg3[%c0_55, %c0_56] : memref<1x16xf32, #tpu.memory_space<vmem>>, vector<1x16xf32>
    %72 = vector.broadcast %71 : vector<1x16xf32> to vector<288x16xf32>
    %73 = arith.addf %70, %72 : vector<288x16xf32>
    %74 = arith.mulf %73, %2 : vector<288x16xf32>
    %cst_57 = arith.constant dense<0.000000e+00> : vector<16xf32>
    %75 = vector.multi_reduction <add>, %74, %cst_57 [0] : vector<288x16xf32> to vector<16xf32>
    %76 = vector.shape_cast %75 : vector<16xf32> to vector<1x16xf32>
    %77 = arith.mulf %74, %74 : vector<288x16xf32>
    %cst_58 = arith.constant dense<0.000000e+00> : vector<16xf32>
    %78 = vector.multi_reduction <add>, %77, %cst_58 [0] : vector<288x16xf32> to vector<16xf32>
    %79 = vector.shape_cast %78 : vector<16xf32> to vector<1x16xf32>
    %c0_59 = arith.constant 0 : index
    %c0_60 = arith.constant 0 : index
    %80 = vector.load %arg6[%c0_59, %c0_60] : memref<16x16xf32, #tpu.memory_space<vmem>>, vector<16x16xf32>
    %cst_61 = arith.constant dense<0.000000e+00> : vector<1x16xf32>
    %81 = tpu.matmul %76, %80, %cst_61 {dimension_numbers = #tpu.dot_dimension_numbers<[1], [0], [0], [1], [0, 0, 1, 1], [], []>} : vector<1x16xf32>, vector<16x16xf32>, vector<1x16xf32> -> vector<1x16xf32>
    %cst_62 = arith.constant 0.001953125 : f32
    %82 = vector.broadcast %cst_62 : f32 to vector<1x16xf32>
    %83 = arith.mulf %81, %82 : vector<1x16xf32>
    %c0_63 = arith.constant 0 : index
    %c0_64 = arith.constant 0 : index
    %84 = vector.load %arg6[%c0_63, %c0_64] : memref<16x16xf32, #tpu.memory_space<vmem>>, vector<16x16xf32>
    %cst_65 = arith.constant dense<0.000000e+00> : vector<1x16xf32>
    %85 = tpu.matmul %79, %84, %cst_65 {dimension_numbers = #tpu.dot_dimension_numbers<[1], [0], [0], [1], [0, 0, 1, 1], [], []>} : vector<1x16xf32>, vector<16x16xf32>, vector<1x16xf32> -> vector<1x16xf32>
    %cst_66 = arith.constant 0.001953125 : f32
    %86 = vector.broadcast %cst_66 : f32 to vector<1x16xf32>
    %87 = arith.mulf %85, %86 : vector<1x16xf32>
    %88 = arith.mulf %83, %83 : vector<1x16xf32>
    %89 = arith.subf %87, %88 : vector<1x16xf32>
    %cst_67 = arith.constant 9.99999974E-6 : f32
    %90 = vector.broadcast %cst_67 : f32 to vector<1x16xf32>
    %91 = arith.addf %89, %90 : vector<1x16xf32>
    %92 = math.rsqrt %91 : vector<1x16xf32>
    %93 = vector.broadcast %83 : vector<1x16xf32> to vector<288x16xf32>
    %94 = arith.subf %74, %93 : vector<288x16xf32>
    %c0_68 = arith.constant 0 : index
    %c0_69 = arith.constant 0 : index
    %95 = vector.load %arg4[%c0_68, %c0_69] : memref<1x16xf32, #tpu.memory_space<vmem>>, vector<1x16xf32>
    %96 = arith.mulf %92, %95 : vector<1x16xf32>
    %97 = vector.broadcast %96 : vector<1x16xf32> to vector<288x16xf32>
    %98 = arith.mulf %94, %97 : vector<288x16xf32>
    %c0_70 = arith.constant 0 : index
    %c0_71 = arith.constant 0 : index
    %99 = vector.load %arg5[%c0_70, %c0_71] : memref<1x16xf32, #tpu.memory_space<vmem>>, vector<1x16xf32>
    %100 = vector.broadcast %99 : vector<1x16xf32> to vector<288x16xf32>
    %101 = arith.addf %98, %100 : vector<288x16xf32>
    %cst_72 = arith.constant 0.000000e+00 : f32
    %102 = vector.broadcast %cst_72 : f32 to vector<288x16xf32>
    %103 = arith.maximumf %101, %102 : vector<288x16xf32>
    %104 = arith.mulf %103, %2 : vector<288x16xf32>
    %c24_73 = arith.constant 24 : index
    %c0_74 = arith.constant 0 : index
    %105 = vector.load %arg14[%c24_73, %c0_74] : memref<336x16xf32, #tpu.memory_space<vmem>>, vector<288x16xf32>
    tpu.vector_store %arg14[%c24_73, %c0_74], %104 {strides = array<i32>} : memref<336x16xf32, #tpu.memory_space<vmem>>, vector<288x16xf32>,
    %cst_75 = arith.constant 0.000000e+00 : f32
    %106 = vector.broadcast %cst_75 : f32 to vector<288x16xf32>
    %c5_76 = arith.constant 5 : index
    %c0_77 = arith.constant 0 : index
    %107 = vector.load %arg14[%c5_76, %c0_77] : memref<336x16xf32, #tpu.memory_space<vmem>>, vector<288x16xf32>
    %108 = arith.truncf %107 : vector<288x16xf32> to vector<288x16xbf16>
    %c0_78 = arith.constant 0 : index
    %c0_79 = arith.constant 0 : index
    %c0_80 = arith.constant 0 : index
    %109 = vector.load %arg7[%c0_78, %c0_79, %c0_80] : memref<9x16x16xbf16, #tpu.memory_space<vmem>>, vector<1x16x16xbf16>
    %110 = vector.shape_cast %109 : vector<1x16x16xbf16> to vector<16x16xbf16>
    %cst_81 = arith.constant dense<0.000000e+00> : vector<288x16xf32>
    %111 = tpu.matmul %108, %110, %cst_81 {dimension_numbers = #tpu.dot_dimension_numbers<[1], [0], [0], [1], [0, 0, 1, 1], [], []>} : vector<288x16xbf16>, vector<16x16xbf16>, vector<288x16xf32> -> vector<288x16xf32>
    %112 = arith.addf %106, %111 : vector<288x16xf32>
    %c6_82 = arith.constant 6 : index
    %c0_83 = arith.constant 0 : index
    %113 = vector.load %arg14[%c6_82, %c0_83] : memref<336x16xf32, #tpu.memory_space<vmem>>, vector<288x16xf32>
    %114 = arith.truncf %113 : vector<288x16xf32> to vector<288x16xbf16>
    %c1_84 = arith.constant 1 : index
    %c0_85 = arith.constant 0 : index
    %c0_86 = arith.constant 0 : index
    %115 = vector.load %arg7[%c1_84, %c0_85, %c0_86] : memref<9x16x16xbf16, #tpu.memory_space<vmem>>, vector<1x16x16xbf16>
    %116 = vector.shape_cast %115 : vector<1x16x16xbf16> to vector<16x16xbf16>
    %cst_87 = arith.constant dense<0.000000e+00> : vector<288x16xf32>
    %117 = tpu.matmul %114, %116, %cst_87 {dimension_numbers = #tpu.dot_dimension_numbers<[1], [0], [0], [1], [0, 0, 1, 1], [], []>} : vector<288x16xbf16>, vector<16x16xbf16>, vector<288x16xf32> -> vector<288x16xf32>
    %118 = arith.addf %112, %117 : vector<288x16xf32>
    %c7_88 = arith.constant 7 : index
    %c0_89 = arith.constant 0 : index
    %119 = vector.load %arg14[%c7_88, %c0_89] : memref<336x16xf32, #tpu.memory_space<vmem>>, vector<288x16xf32>
    %120 = arith.truncf %119 : vector<288x16xf32> to vector<288x16xbf16>
    %c2_90 = arith.constant 2 : index
    %c0_91 = arith.constant 0 : index
    %c0_92 = arith.constant 0 : index
    %121 = vector.load %arg7[%c2_90, %c0_91, %c0_92] : memref<9x16x16xbf16, #tpu.memory_space<vmem>>, vector<1x16x16xbf16>
    %122 = vector.shape_cast %121 : vector<1x16x16xbf16> to vector<16x16xbf16>
    %cst_93 = arith.constant dense<0.000000e+00> : vector<288x16xf32>
    %123 = tpu.matmul %120, %122, %cst_93 {dimension_numbers = #tpu.dot_dimension_numbers<[1], [0], [0], [1], [0, 0, 1, 1], [], []>} : vector<288x16xbf16>, vector<16x16xbf16>, vector<288x16xf32> -> vector<288x16xf32>
    %124 = arith.addf %118, %123 : vector<288x16xf32>
    %c23_94 = arith.constant 23 : index
    %c0_95 = arith.constant 0 : index
    %125 = vector.load %arg14[%c23_94, %c0_95] : memref<336x16xf32, #tpu.memory_space<vmem>>, vector<288x16xf32>
    %126 = arith.truncf %125 : vector<288x16xf32> to vector<288x16xbf16>
    %c3_96 = arith.constant 3 : index
    %c0_97 = arith.constant 0 : index
    %c0_98 = arith.constant 0 : index
    %127 = vector.load %arg7[%c3_96, %c0_97, %c0_98] : memref<9x16x16xbf16, #tpu.memory_space<vmem>>, vector<1x16x16xbf16>
    %128 = vector.shape_cast %127 : vector<1x16x16xbf16> to vector<16x16xbf16>
    %cst_99 = arith.constant dense<0.000000e+00> : vector<288x16xf32>
    %129 = tpu.matmul %126, %128, %cst_99 {dimension_numbers = #tpu.dot_dimension_numbers<[1], [0], [0], [1], [0, 0, 1, 1], [], []>} : vector<288x16xbf16>, vector<16x16xbf16>, vector<288x16xf32> -> vector<288x16xf32>
    %130 = arith.addf %124, %129 : vector<288x16xf32>
    %c24_100 = arith.constant 24 : index
    %c0_101 = arith.constant 0 : index
    %131 = vector.load %arg14[%c24_100, %c0_101] : memref<336x16xf32, #tpu.memory_space<vmem>>, vector<288x16xf32>
    %132 = arith.truncf %131 : vector<288x16xf32> to vector<288x16xbf16>
    %c4_102 = arith.constant 4 : index
    %c0_103 = arith.constant 0 : index
    %c0_104 = arith.constant 0 : index
    %133 = vector.load %arg7[%c4_102, %c0_103, %c0_104] : memref<9x16x16xbf16, #tpu.memory_space<vmem>>, vector<1x16x16xbf16>
    %134 = vector.shape_cast %133 : vector<1x16x16xbf16> to vector<16x16xbf16>
    %cst_105 = arith.constant dense<0.000000e+00> : vector<288x16xf32>
    %135 = tpu.matmul %132, %134, %cst_105 {dimension_numbers = #tpu.dot_dimension_numbers<[1], [0], [0], [1], [0, 0, 1, 1], [], []>} : vector<288x16xbf16>, vector<16x16xbf16>, vector<288x16xf32> -> vector<288x16xf32>
    %136 = arith.addf %130, %135 : vector<288x16xf32>
    %c25_106 = arith.constant 25 : index
    %c0_107 = arith.constant 0 : index
    %137 = vector.load %arg14[%c25_106, %c0_107] : memref<336x16xf32, #tpu.memory_space<vmem>>, vector<288x16xf32>
    %138 = arith.truncf %137 : vector<288x16xf32> to vector<288x16xbf16>
    %c5_108 = arith.constant 5 : index
    %c0_109 = arith.constant 0 : index
    %c0_110 = arith.constant 0 : index
    %139 = vector.load %arg7[%c5_108, %c0_109, %c0_110] : memref<9x16x16xbf16, #tpu.memory_space<vmem>>, vector<1x16x16xbf16>
    %140 = vector.shape_cast %139 : vector<1x16x16xbf16> to vector<16x16xbf16>
    %cst_111 = arith.constant dense<0.000000e+00> : vector<288x16xf32>
    %141 = tpu.matmul %138, %140, %cst_111 {dimension_numbers = #tpu.dot_dimension_numbers<[1], [0], [0], [1], [0, 0, 1, 1], [], []>} : vector<288x16xbf16>, vector<16x16xbf16>, vector<288x16xf32> -> vector<288x16xf32>
    %142 = arith.addf %136, %141 : vector<288x16xf32>
    %c41_112 = arith.constant 41 : index
    %c0_113 = arith.constant 0 : index
    %143 = vector.load %arg14[%c41_112, %c0_113] : memref<336x16xf32, #tpu.memory_space<vmem>>, vector<288x16xf32>
    %144 = arith.truncf %143 : vector<288x16xf32> to vector<288x16xbf16>
    %c6_114 = arith.constant 6 : index
    %c0_115 = arith.constant 0 : index
    %c0_116 = arith.constant 0 : index
    %145 = vector.load %arg7[%c6_114, %c0_115, %c0_116] : memref<9x16x16xbf16, #tpu.memory_space<vmem>>, vector<1x16x16xbf16>
    %146 = vector.shape_cast %145 : vector<1x16x16xbf16> to vector<16x16xbf16>
    %cst_117 = arith.constant dense<0.000000e+00> : vector<288x16xf32>
    %147 = tpu.matmul %144, %146, %cst_117 {dimension_numbers = #tpu.dot_dimension_numbers<[1], [0], [0], [1], [0, 0, 1, 1], [], []>} : vector<288x16xbf16>, vector<16x16xbf16>, vector<288x16xf32> -> vector<288x16xf32>
    %148 = arith.addf %142, %147 : vector<288x16xf32>
    %c42_118 = arith.constant 42 : index
    %c0_119 = arith.constant 0 : index
    %149 = vector.load %arg14[%c42_118, %c0_119] : memref<336x16xf32, #tpu.memory_space<vmem>>, vector<288x16xf32>
    %150 = arith.truncf %149 : vector<288x16xf32> to vector<288x16xbf16>
    %c7_120 = arith.constant 7 : index
    %c0_121 = arith.constant 0 : index
    %c0_122 = arith.constant 0 : index
    %151 = vector.load %arg7[%c7_120, %c0_121, %c0_122] : memref<9x16x16xbf16, #tpu.memory_space<vmem>>, vector<1x16x16xbf16>
    %152 = vector.shape_cast %151 : vector<1x16x16xbf16> to vector<16x16xbf16>
    %cst_123 = arith.constant dense<0.000000e+00> : vector<288x16xf32>
    %153 = tpu.matmul %150, %152, %cst_123 {dimension_numbers = #tpu.dot_dimension_numbers<[1], [0], [0], [1], [0, 0, 1, 1], [], []>} : vector<288x16xbf16>, vector<16x16xbf16>, vector<288x16xf32> -> vector<288x16xf32>
    %154 = arith.addf %148, %153 : vector<288x16xf32>
    %c43_124 = arith.constant 43 : index
    %c0_125 = arith.constant 0 : index
    %155 = vector.load %arg14[%c43_124, %c0_125] : memref<336x16xf32, #tpu.memory_space<vmem>>, vector<288x16xf32>
    %156 = arith.truncf %155 : vector<288x16xf32> to vector<288x16xbf16>
    %c8_126 = arith.constant 8 : index
    %c0_127 = arith.constant 0 : index
    %c0_128 = arith.constant 0 : index
    %157 = vector.load %arg7[%c8_126, %c0_127, %c0_128] : memref<9x16x16xbf16, #tpu.memory_space<vmem>>, vector<1x16x16xbf16>
    %158 = vector.shape_cast %157 : vector<1x16x16xbf16> to vector<16x16xbf16>
    %cst_129 = arith.constant dense<0.000000e+00> : vector<288x16xf32>
    %159 = tpu.matmul %156, %158, %cst_129 {dimension_numbers = #tpu.dot_dimension_numbers<[1], [0], [0], [1], [0, 0, 1, 1], [], []>} : vector<288x16xbf16>, vector<16x16xbf16>, vector<288x16xf32> -> vector<288x16xf32>
    %160 = arith.addf %154, %159 : vector<288x16xf32>
    %c0_130 = arith.constant 0 : index
    %c0_131 = arith.constant 0 : index
    %161 = vector.load %arg8[%c0_130, %c0_131] : memref<1x16xf32, #tpu.memory_space<vmem>>, vector<1x16xf32>
    %162 = vector.broadcast %161 : vector<1x16xf32> to vector<288x16xf32>
    %163 = arith.addf %160, %162 : vector<288x16xf32>
    %164 = vector.shape_cast %0 : vector<288x1xf32> to vector<288x1xf32>
    %165 = vector.broadcast %164 : vector<288x1xf32> to vector<288x16xf32>
    %166 = arith.mulf %163, %165 : vector<288x16xf32>
    %cst_132 = arith.constant dense<0.000000e+00> : vector<16xf32>
    %167 = vector.multi_reduction <add>, %166, %cst_132 [0] : vector<288x16xf32> to vector<16xf32>
    %168 = vector.shape_cast %167 : vector<16xf32> to vector<1x16xf32>
    %169 = arith.mulf %166, %166 : vector<288x16xf32>
    %cst_133 = arith.constant dense<0.000000e+00> : vector<16xf32>
    %170 = vector.multi_reduction <add>, %169, %cst_133 [0] : vector<288x16xf32> to vector<16xf32>
    %171 = vector.shape_cast %170 : vector<16xf32> to vector<1x16xf32>
    %c0_134 = arith.constant 0 : index
    %c0_135 = arith.constant 0 : index
    %172 = vector.load %arg11[%c0_134, %c0_135] : memref<16x16xf32, #tpu.memory_space<vmem>>, vector<16x16xf32>
    %cst_136 = arith.constant dense<0.000000e+00> : vector<1x16xf32>
    %173 = tpu.matmul %168, %172, %cst_136 {dimension_numbers = #tpu.dot_dimension_numbers<[1], [0], [0], [1], [0, 0, 1, 1], [], []>} : vector<1x16xf32>, vector<16x16xf32>, vector<1x16xf32> -> vector<1x16xf32>
    %cst_137 = arith.constant 0.001953125 : f32
    %174 = vector.broadcast %cst_137 : f32 to vector<1x16xf32>
    %175 = arith.mulf %173, %174 : vector<1x16xf32>
    %c0_138 = arith.constant 0 : index
    %c0_139 = arith.constant 0 : index
    %176 = vector.load %arg11[%c0_138, %c0_139] : memref<16x16xf32, #tpu.memory_space<vmem>>, vector<16x16xf32>
    %cst_140 = arith.constant dense<0.000000e+00> : vector<1x16xf32>
    %177 = tpu.matmul %171, %176, %cst_140 {dimension_numbers = #tpu.dot_dimension_numbers<[1], [0], [0], [1], [0, 0, 1, 1], [], []>} : vector<1x16xf32>, vector<16x16xf32>, vector<1x16xf32> -> vector<1x16xf32>
    %cst_141 = arith.constant 0.001953125 : f32
    %178 = vector.broadcast %cst_141 : f32 to vector<1x16xf32>
    %179 = arith.mulf %177, %178 : vector<1x16xf32>
    %180 = arith.mulf %175, %175 : vector<1x16xf32>
    %181 = arith.subf %179, %180 : vector<1x16xf32>
    %cst_142 = arith.constant 9.99999974E-6 : f32
    %182 = vector.broadcast %cst_142 : f32 to vector<1x16xf32>
    %183 = arith.addf %181, %182 : vector<1x16xf32>
    %184 = math.rsqrt %183 : vector<1x16xf32>
    %185 = vector.broadcast %175 : vector<1x16xf32> to vector<288x16xf32>
    %186 = arith.subf %166, %185 : vector<288x16xf32>
    %c0_143 = arith.constant 0 : index
    %c0_144 = arith.constant 0 : index
    %187 = vector.load %arg9[%c0_143, %c0_144] : memref<1x16xf32, #tpu.memory_space<vmem>>, vector<1x16xf32>
    %188 = arith.mulf %184, %187 : vector<1x16xf32>
    %189 = vector.broadcast %188 : vector<1x16xf32> to vector<288x16xf32>
    %190 = arith.mulf %186, %189 : vector<288x16xf32>
    %c0_145 = arith.constant 0 : index
    %c0_146 = arith.constant 0 : index
    %191 = vector.load %arg10[%c0_145, %c0_146] : memref<1x16xf32, #tpu.memory_space<vmem>>, vector<1x16xf32>
    %192 = vector.broadcast %191 : vector<1x16xf32> to vector<288x16xf32>
    %193 = arith.addf %190, %192 : vector<288x16xf32>
    %cst_147 = arith.constant 0.000000e+00 : f32
    %194 = vector.broadcast %cst_147 : f32 to vector<288x16xf32>
    %195 = arith.maximumf %193, %194 : vector<288x16xf32>
    %c0_148 = arith.constant 0 : index
    %c0_149 = arith.constant 0 : index
    %c0_150 = arith.constant 0 : index
    %196 = vector.load %arg13[%c0_148, %c0_149, %c0_150] : memref<1x288x16xf32, #tpu.memory_space<vmem>>, vector<1x288x16xf32>
    %197 = vector.shape_cast %196 : vector<1x288x16xf32> to vector<288x16xf32>
    %198 = vector.shape_cast %195 : vector<288x16xf32> to vector<1x288x16xf32>
    tpu.vector_store %arg13[%c0_148, %c0_149, %c0_150], %198 {strides = array<i32>} : memref<1x288x16xf32, #tpu.memory_space<vmem>>, vector<1x288x16xf32>,
    return
  }
  func.func @transform_0(%arg0: i32) -> (i32, i32, i32) {
    %c0_i32 = arith.constant 0 : i32
    %c0_i32_0 = arith.constant 0 : i32
    %c0_i32_1 = arith.constant 0 : i32
    return %arg0, %c0_i32, %c0_i32_0 : i32, i32, i32
  }
  func.func @transform_1(%arg0: i32) -> (i32, i32, i32) {
    %c0_i32 = arith.constant 0 : i32
    %c0_i32_0 = arith.constant 0 : i32
    %c0_i32_1 = arith.constant 0 : i32
    %c0_i32_2 = arith.constant 0 : i32
    return %c0_i32, %c0_i32_0, %c0_i32_1 : i32, i32, i32
  }
  func.func @transform_2(%arg0: i32) -> (i32, i32) {
    %c0_i32 = arith.constant 0 : i32
    %c0_i32_0 = arith.constant 0 : i32
    %c0_i32_1 = arith.constant 0 : i32
    return %c0_i32, %c0_i32_0 : i32, i32
  }
  func.func @transform_3(%arg0: i32) -> (i32, i32) {
    %c0_i32 = arith.constant 0 : i32
    %c0_i32_0 = arith.constant 0 : i32
    %c0_i32_1 = arith.constant 0 : i32
    return %c0_i32, %c0_i32_0 : i32, i32
  }
  func.func @transform_4(%arg0: i32) -> (i32, i32) {
    %c0_i32 = arith.constant 0 : i32
    %c0_i32_0 = arith.constant 0 : i32
    %c0_i32_1 = arith.constant 0 : i32
    return %c0_i32, %c0_i32_0 : i32, i32
  }
  func.func @transform_5(%arg0: i32) -> (i32, i32) {
    %c0_i32 = arith.constant 0 : i32
    %c0_i32_0 = arith.constant 0 : i32
    %c0_i32_1 = arith.constant 0 : i32
    return %c0_i32, %c0_i32_0 : i32, i32
  }
  func.func @transform_6(%arg0: i32) -> (i32, i32, i32) {
    %c0_i32 = arith.constant 0 : i32
    %c0_i32_0 = arith.constant 0 : i32
    %c0_i32_1 = arith.constant 0 : i32
    %c0_i32_2 = arith.constant 0 : i32
    return %c0_i32, %c0_i32_0, %c0_i32_1 : i32, i32, i32
  }
  func.func @transform_7(%arg0: i32) -> (i32, i32) {
    %c0_i32 = arith.constant 0 : i32
    %c0_i32_0 = arith.constant 0 : i32
    %c0_i32_1 = arith.constant 0 : i32
    return %c0_i32, %c0_i32_0 : i32, i32
  }
  func.func @transform_8(%arg0: i32) -> (i32, i32) {
    %c0_i32 = arith.constant 0 : i32
    %c0_i32_0 = arith.constant 0 : i32
    %c0_i32_1 = arith.constant 0 : i32
    return %c0_i32, %c0_i32_0 : i32, i32
  }
  func.func @transform_9(%arg0: i32) -> (i32, i32) {
    %c0_i32 = arith.constant 0 : i32
    %c0_i32_0 = arith.constant 0 : i32
    %c0_i32_1 = arith.constant 0 : i32
    return %c0_i32, %c0_i32_0 : i32, i32
  }
  func.func @transform_10(%arg0: i32) -> (i32, i32) {
    %c0_i32 = arith.constant 0 : i32
    %c0_i32_0 = arith.constant 0 : i32
    %c0_i32_1 = arith.constant 0 : i32
    return %c0_i32, %c0_i32_0 : i32, i32
  }
  func.func @transform_11(%arg0: i32) -> (i32, i32) {
    %c0_i32 = arith.constant 0 : i32
    %c0_i32_0 = arith.constant 0 : i32
    %c0_i32_1 = arith.constant 0 : i32
    return %c0_i32, %c0_i32_0 : i32, i32
  }
  func.func @transform_12(%arg0: i32) -> (i32, i32, i32) {
    %c0_i32 = arith.constant 0 : i32
    %c0_i32_0 = arith.constant 0 : i32
    %c0_i32_1 = arith.constant 0 : i32
    return %arg0, %c0_i32, %c0_i32_0 : i32, i32, i32
  }
}

</mosaic_0001>

<bundles_post_ra>
// kernel: vgg_block_forward.1
= control target key start
LH: loop header
LB: loop body
LE: loop exit
PB: predicated region body
PF: predicated region fallthrough
CT: control target
= control target key end

     0   :  { %s9872_s21 = smov 0   ;;  %s12005_s0 = inlined_call_operand.vmem [shape: f32[2,336,8], index: 0, kind: input, shape index: {}]   ;;  %s12006_s1 = inlined_call_operand.vmem [shape: bf16[9,8,16], index: 1, kind: input, shape index: {}]   ;;  %s12007_s2 = inlined_call_operand.vmem [shape: f32[1,16], index: 2, kind: input, shape index: {}]   ;;  %s12008_s3 = inlined_call_operand.vmem [shape: f32[1,16], index: 3, kind: input, shape index: {}]   ;;  %s12009_s4 = inlined_call_operand.vmem [shape: f32[1,16], index: 4, kind: input, shape index: {}]   ;;  %s12010_s5 = inlined_call_operand.vmem [shape: f32[16,16], index: 5, kind: input, shape index: {}, may-alias: {5,10}]   ;;  %s12011_s6 = inlined_call_operand.vmem [shape: bf16[9,16,16], index: 6, kind: input, shape index: {}]   ;;  %s12012_s7 = inlined_call_operand.vmem [shape: f32[1,16], index: 7, kind: input, shape index: {}]   ;;  %s12013_s8 = inlined_call_operand.vmem [shape: f32[1,16], index: 8, kind: input, shape index: {}]   ;;  %s12014_s9 = inlined_call_operand.vmem [shape: f32[1,16], index: 9, kind: input, shape index: {}]   ;;  %s12015_s10 = inlined_call_operand.vmem [shape: f32[16,16], index: 10, kind: input, shape index: {}, may-alias: {5,10}]   ;;  %s12016_s11 = inlined_call_operand.vmem [shape: f32[288,1], index: 11, kind: input, shape index: {}]   ;;  %s12017_s12 = inlined_call_operand.vmem [shape: f32[2,288,16], index: 12, kind: output, shape index: {}]  }
   0x1 LB: > { %s7729_s22 = sadd.s32 4294967295, %s9801_s21   ;;  %p7733_p0 = scmp.ge.s32.totalorder %s9801_s21, 1  ;;  %s9801_s21 = sphi %s9872_s21, %s22_s21  }
   0x2   : > { %p362_p1 = scmp.lt.s32.totalorder %s9801_s21, 3 }
   0x4   : > { %p363_p2 = pnand %p7733_p0, %p362_p1 }
   0x6   : > { %366 = sbr.rel (%p363_p2) target bundleno = 2333 (0x91d), region = 68 }
   0xd   : > { %v7736_v0 = vld [vmem:[%s12006_s1 + $0x4] sm:$0xf]  ;;  %vm804_vm0 = vcmask 1043456   ;;  %p404_p3 = scmp.lt.s32.totalorder %s7729_s22, 1  ;;  %v692_v2 = vld [vmem:[%s12006_s1] sm:$0xf] }
   0xe   : > { %9757 = vmatprep.subr.msk.bf16.mxu0 %vm804_vm0, %v7736_v0  ;;  %v806_v1 = vsel %vm804_vm0, %v7736_v0, 0  ;;  %vm749_vm1 = vcmask 64512   ;;  %v1040_v11 = vsel %vm804_vm0, %v692_v2, 0  ;;  %v9908_v13 = vld [vmem:[%s12006_s1 + $0x8] sm:$0xf]  ;;  %vm631_vm2 = vcmask 130048  }
   0xf   : > { %8458 = vmatpush3.bf16.msra.mxu0 %v806_v1  ;;  %s12157_s22 = smov (!%p404_p3, %s7729_s22), 1  ;;  %vm9805_vm3 = vmmov 0  }
  0x10   : > { %9758 = vmatprep.subr.msk.bf16.mxu0 %vm804_vm0, %v692_v2  ;;  %s9766_s27 = smul.u32 336, %s12157_s22 }
  0x11   : > { %s9767_s14 = smul.u32 288, %s12157_s22 }
  0x12   : > { %s9895_s30 = scalar_lea.vmem %s12005_s0, %s9766_s27 }
  0x13   : > { %v693_v3 = vld [vmem:[%s9895_s30 + $0x6] sm:$0xff]  ;;  %v694_v4 = vld [vmem:[%s9895_s30 + $0xe] sm:$0xff]  ;;  %v695_v5 = vld [vmem:[%s9895_s30 + $0x16] sm:$0xff]  ;;  %s11896_s16 = scalar_lea.vmem %s12017_s12, %s9767_s14 }
  0x14   : > { %v729_v6 = vpack.c.bf16 %v694_v4, %v693_v3  ;;  %v696_v7 = vld [vmem:[%s9895_s30 + $0x1e] sm:$0xff]  ;;  %v697_v8 = vld [vmem:[%s9895_s30 + $0x26] sm:$0xff]  ;;  %v698_v9 = vld [vmem:[%s9895_s30 + $0x2e] sm:$0xff]  ;;  %v1330_v4 = vsel %vm804_vm0, %v9908_v13, 0 }
  0x15   : > { %v730_v10 = vpack.c.bf16 %v696_v7, %v695_v5  ;;  %v731_v12 = vpack.c.bf16 %v698_v9, %v697_v8  ;;  %v699_v14 = vld [vmem:[%s9895_s30 + $0x36] sm:$0xff]  ;;  %v700_v15 = vld [vmem:[%s9895_s30 + $0x3e] sm:$0xff]  ;;  %v701_v16 = vld [vmem:[%s9895_s30 + $0x46] sm:$0xff] }
  0x16   : > { %8459 = vmatprep.mubr.msk.bf16.mxu0 %vm749_vm1, %v729_v6  ;;  %v702_v17 = vld [vmem:[%s9895_s30 + $0x4e] sm:$0xff]  ;;  %v732_v18 = vpack.c.bf16 %v700_v15, %v699_v14  ;;  %v703_v20 = vld [vmem:[%s9895_s30 + $0x56] sm:$0xff]  ;;  %v704_v21 = vld [vmem:[%s9895_s30 + $0x5e] sm:$0xff] }
  0x17   : > { %8460 = vmatmul.mubr.msk.bf16.vlgmr.msra.gmra.mrb[0].mxu0 %vm749_vm1, %v730_v10  ;;  %v733_v19 = vpack.c.bf16 %v702_v17, %v701_v16  ;;  %v705_v22 = vld [vmem:[%s9895_s30 + $0x66] sm:$0xff]  ;;  %v706_v23 = vld [vmem:[%s9895_s30 + $0x6e] sm:$0xff]  ;;  %v734_v24 = vpack.c.bf16 %v704_v21, %v703_v20  ;;  %v707_v26 = vld [vmem:[%s9895_s30 + $0x76] sm:$0xff] }
  0x18   : > { %8496 = vmatpush3.bf16.msra.mxu0 %v1040_v11  ;;  %8463 = vmatprep.mubr.msk.bf16.mxu0 %vm749_vm1, %v731_v12  ;;  %v735_v25 = vpack.c.bf16 %v706_v23, %v705_v22  ;;  %v708_v27 = vld [vmem:[%s9895_s30 + $0x7e] sm:$0xff]  ;;  %v709_v28 = vld [vmem:[%s9895_s30 + $0x86] sm:$0xff]  ;;  %v710_v29 = vld [vmem:[%s9895_s30 + $0x8e] sm:$0xff] }
  0x19   : > { %9759 = vmatprep.subr.msk.bf16.mxu0 %vm804_vm0, %v9908_v13  ;;  %v736_v30 = vpack.c.bf16 %v708_v27, %v707_v26  ;;  %v737_v31 = vpack.c.bf16 %v710_v29, %v709_v28  ;;  %v711_v32 = vld [vmem:[%s9895_s30 + $0x96] sm:$0xff]  ;;  %v712_v33 = vld [vmem:[%s9895_s30 + $0x9e] sm:$0xff]  ;;  %v713_v34 = vld [vmem:[%s9895_s30 + $0xa6] sm:$0xff] }
  0x1a   : > { %v714_v35 = vld [vmem:[%s9895_s30 + $0xae] sm:$0xff]  ;;  %v738_v36 = vpack.c.bf16 %v712_v33, %v711_v32  ;;  %v715_v38 = vld [vmem:[%s9895_s30 + $0xb6] sm:$0xff]  ;;  %v716_v39 = vld [vmem:[%s9895_s30 + $0xbe] sm:$0xff] }
  0x1b   : > { %v739_v37 = vpack.c.bf16 %v714_v35, %v713_v34  ;;  %v717_v40 = vld [vmem:[%s9895_s30 + $0xc6] sm:$0xff]  ;;  %v718_v41 = vld [vmem:[%s9895_s30 + $0xce] sm:$0xff]  ;;  %v740_v42 = vpack.c.bf16 %v716_v39, %v715_v38  ;;  %v719_v44 = vld [vmem:[%s9895_s30 + $0xd6] sm:$0xff] }
  0x1c   : > { %v741_v43 = vpack.c.bf16 %v718_v41, %v717_v40  ;;  %v720_v45 = vld [vmem:[%s9895_s30 + $0xde] sm:$0xff]  ;;  %v721_v46 = vld [vmem:[%s9895_s30 + $0xe6] sm:$0xff]  ;;  %v722_v47 = vld [vmem:[%s9895_s30 + $0xee] sm:$0xff] }
  0x1d   : > { %v742_v48 = vpack.c.bf16 %v720_v45, %v719_v44  ;;  %v743_v49 = vpack.c.bf16 %v722_v47, %v721_v46  ;;  %v723_v50 = vld [vmem:[%s9895_s30 + $0xf6] sm:$0xff]  ;;  %v724_v51 = vld [vmem:[%s9895_s30 + $0xfe] sm:$0xff]  ;;  %v725_v52 = vld [vmem:[%s9895_s30 + $0x106] sm:$0xff] }
  0x1e   : > { %v726_v53 = vld [vmem:[%s9895_s30 + $0x10e] sm:$0xff]  ;;  %v744_v54 = vpack.c.bf16 %v724_v51, %v723_v50  ;;  %v727_v56 = vld [vmem:[%s9895_s30 + $0x116] sm:$0xff]  ;;  %v728_v57 = vld [vmem:[%s9895_s30 + $0x11e] sm:$0xff] }
  0x1f   : > { %8464 = vmatmul.mubr.msk.bf16.gmra.mrb[4].mxu0 %vm749_vm1, %v732_v18  ;;  %v745_v55 = vpack.c.bf16 %v726_v53, %v725_v52  ;;  %v638_v58 = vld [vmem:[%s9895_s30 + $0x5] sm:$0xff]  ;;  %v639_v59 = vld [vmem:[%s9895_s30 + $0xd] sm:$0xff]  ;;  %v746_v60 = vpack.c.bf16 %v728_v57, %v727_v56  ;;  %v640_v62 = vld [vmem:[%s9895_s30 + $0x15] sm:$0xff] }
  0x20   : > { %8467 = vmatprep.mubr.msk.bf16.mxu0 %vm749_vm1, %v733_v19  ;;  %v674_v61 = vpack.c.bf16 %v639_v59, %v638_v58  ;;  %v641_v63 = vld [vmem:[%s9895_s30 + $0x1d] sm:$0xff]  ;;  %v642_v0 = vld [vmem:[%s9895_s30 + $0x25] sm:$0xff]  ;;  %v643_v1 = vld [vmem:[%s9895_s30 + $0x2d] sm:$0xff] }
  0x21   : > { %v675_v2 = vpack.c.bf16 %v641_v63, %v640_v62  ;;  %v676_v3 = vpack.c.bf16 %v643_v1, %v642_v0  ;;  %v9971_v5 = vld [vmem:[%s12006_s1 + $0xc] sm:$0xf]  ;;  %v644_v6 = vld [vmem:[%s9895_s30 + $0x35] sm:$0xff]  ;;  %v645_v7 = vld [vmem:[%s9895_s30 + $0x3d] sm:$0xff] }
  0x22   : > { %v646_v8 = vld [vmem:[%s9895_s30 + $0x45] sm:$0xff]  ;;  %v647_v9 = vld [vmem:[%s9895_s30 + $0x4d] sm:$0xff]  ;;  %v677_v10 = vpack.c.bf16 %v645_v7, %v644_v6  ;;  %v648_v12 = vld [vmem:[%s9895_s30 + $0x55] sm:$0xff] }
  0x23   : > { %v678_v11 = vpack.c.bf16 %v647_v9, %v646_v8  ;;  %v649_v13 = vld [vmem:[%s9895_s30 + $0x5d] sm:$0xff]  ;;  %v650_v14 = vld [vmem:[%s9895_s30 + $0x65] sm:$0xff]  ;;  %v651_v15 = vld [vmem:[%s9895_s30 + $0x6d] sm:$0xff] }
  0x24   : > { %v679_v16 = vpack.c.bf16 %v649_v13, %v648_v12  ;;  %v680_v17 = vpack.c.bf16 %v651_v15, %v650_v14  ;;  %v652_v18 = vld [vmem:[%s9895_s30 + $0x75] sm:$0xff]  ;;  %v653_v19 = vld [vmem:[%s9895_s30 + $0x7d] sm:$0xff]  ;;  %v654_v20 = vld [vmem:[%s9895_s30 + $0x85] sm:$0xff] }
  0x25   : > { %v655_v21 = vld [vmem:[%s9895_s30 + $0x8d] sm:$0xff]  ;;  %v681_v22 = vpack.c.bf16 %v653_v19, %v652_v18  ;;  %v658_v26 = vld [vmem:[%s9895_s30 + $0xa5] sm:$0xff]  ;;  %v1225_v62 = vld [vmem:[%s9895_s30 + $0x37] sm:$0xff] }
  0x26   : > { %v682_v23 = vpack.c.bf16 %v655_v21, %v654_v20  ;;  %v659_v27 = vld [vmem:[%s9895_s30 + $0xad] sm:$0xff]  ;;  %v662_v32 = vld [vmem:[%s9895_s30 + $0xc5] sm:$0xff] }
  0x27   : > { %8468 = vmatmul.mubr.msk.bf16.gmra.mrb[8].mxu0 %vm749_vm1, %v734_v24  ;;  %v656_v24 = vld [vmem:[%s9895_s30 + $0x95] sm:$0xff]  ;;  %v684_v29 = vpack.c.bf16 %v659_v27, %v658_v26  ;;  %v663_v33 = vld [vmem:[%s9895_s30 + $0xcd] sm:$0xff]  ;;  %v666_v38 = vld [vmem:[%s9895_s30 + $0xe5] sm:$0xff] }
  0x28   : > { %8471 = vmatprep.mubr.msk.bf16.mxu0 %vm749_vm1, %v735_v25  ;;  %v657_v25 = vld [vmem:[%s9895_s30 + $0x9d] sm:$0xff]  ;;  %v686_v35 = vpack.c.bf16 %v663_v33, %v662_v32  ;;  %v667_v39 = vld [vmem:[%s9895_s30 + $0xed] sm:$0xff]  ;;  %v670_v44 = vld [vmem:[%s9895_s30 + $0x105] sm:$0xff] }
  0x29   : > { %v683_v28 = vpack.c.bf16 %v657_v25, %v656_v24  ;;  %v688_v41 = vpack.c.bf16 %v667_v39, %v666_v38  ;;  %v671_v45 = vld [vmem:[%s9895_s30 + $0x10d] sm:$0xff]  ;;  %v1226_v63 = vld [vmem:[%s9895_s30 + $0x3f] sm:$0xff] }
  0x2a   : > { %v690_v47 = vpack.c.bf16 %v671_v45, %v670_v44  ;;  %v1219_v50 = vld [vmem:[%s9895_s30 + $0x7] sm:$0xff]  ;;  %v1220_v51 = vld [vmem:[%s9895_s30 + $0xf] sm:$0xff] }
  0x2b   : > { %v1255_v53 = vpack.c.bf16 %v1220_v51, %v1219_v50  ;;  %v1223_v56 = vld [vmem:[%s9895_s30 + $0x27] sm:$0xff]  ;;  %v1224_v57 = vld [vmem:[%s9895_s30 + $0x2f] sm:$0xff] }
  0x2c   : > { %v10031_v59 = vpack.c.bf16 %v1224_v57, %v1223_v56  ;;  %v1227_v0 = vld [vmem:[%s9895_s30 + $0x47] sm:$0xff]  ;;  %v1228_v1 = vld [vmem:[%s9895_s30 + $0x4f] sm:$0xff] }
  0x2d   : > { %v1231_v6 = vld [vmem:[%s9895_s30 + $0x67] sm:$0xff]  ;;  %v1232_v7 = vld [vmem:[%s9895_s30 + $0x6f] sm:$0xff] }
  0x2e   : > { %v1261_v9 = vpack.c.bf16 %v1232_v7, %v1231_v6  ;;  %v1235_v12 = vld [vmem:[%s9895_s30 + $0x87] sm:$0xff]  ;;  %v1236_v13 = vld [vmem:[%s9895_s30 + $0x8f] sm:$0xff] }
  0x2f   : > { %8472 = vmatmul.mubr.msk.bf16.gmra.mrb[12].mxu0 %vm749_vm1, %v736_v30  ;;  %v660_v30 = vld [vmem:[%s9895_s30 + $0xb5] sm:$0xff]  ;;  %v1263_v15 = vpack.c.bf16 %v1236_v13, %v1235_v12  ;;  %v1239_v18 = vld [vmem:[%s9895_s30 + $0xa7] sm:$0xff] }
  0x30   : > { %8475 = vmatprep.mubr.msk.bf16.mxu0 %vm749_vm1, %v737_v31  ;;  %v661_v31 = vld [vmem:[%s9895_s30 + $0xbd] sm:$0xff]  ;;  %v1240_v19 = vld [vmem:[%s9895_s30 + $0xaf] sm:$0xff]  ;;  %v1243_v24 = vld [vmem:[%s9895_s30 + $0xc7] sm:$0xff] }
  0x31   : > { %v685_v34 = vpack.c.bf16 %v661_v31, %v660_v30  ;;  %v1265_v21 = vpack.c.bf16 %v1240_v19, %v1239_v18  ;;  %v1244_v25 = vld [vmem:[%s9895_s30 + $0xcf] sm:$0xff]  ;;  %v1247_v30 = vld [vmem:[%s9895_s30 + $0xe7] sm:$0xff] }
  0x32   : > { %v1267_v27 = vpack.c.bf16 %v1244_v25, %v1243_v24  ;;  %v1248_v31 = vld [vmem:[%s9895_s30 + $0xef] sm:$0xff]  ;;  %v1579_v45 = vld [vmem:[%s9895_s30 + $0x127] sm:$0xff] }
  0x33   : > { %v1269_v33 = vpack.c.bf16 %v1248_v31, %v1247_v30  ;;  %v7830_v44 = vld [vmem:[%s12006_s1 + $0x14] sm:$0xf]  ;;  %v1873_v51 = vld [vmem:[%s9895_s30 + $0x28] sm:$0xff] }
  0x34   : > { %v2308_v57 = vsel %vm804_vm0, %v7830_v44, 0  ;;  %v1885_v7 = vld [vmem:[%s9895_s30 + $0x88] sm:$0xff] }
  0x35   : > { %v1889_v13 = vld [vmem:[%s9895_s30 + $0xa8] sm:$0xff] }
  0x36   : > { %v1893_v19 = vld [vmem:[%s9895_s30 + $0xc8] sm:$0xff] }
  0x37   : > { %8476 = vmatmul.mubr.msk.bf16.gmra.mrb[16].mxu0 %vm749_vm1, %v738_v36  ;;  %v664_v36 = vld [vmem:[%s9895_s30 + $0xd5] sm:$0xff]  ;;  %v1897_v25 = vld [vmem:[%s9895_s30 + $0xe8] sm:$0xff] }
  0x38   : > { %8479 = vmatprep.mubr.msk.bf16.mxu0 %vm749_vm1, %v739_v37  ;;  %v665_v37 = vld [vmem:[%s9895_s30 + $0xdd] sm:$0xff]  ;;  %v1901_v31 = vld [vmem:[%s9895_s30 + $0x108] sm:$0xff] }
  0x39   : > { %v687_v40 = vpack.c.bf16 %v665_v37, %v664_v36  ;;  %v1251_v36 = vld [vmem:[%s9895_s30 + $0x107] sm:$0xff]  ;;  %v1252_v37 = vld [vmem:[%s9895_s30 + $0x10f] sm:$0xff] }
  0x3a   : > { %v1271_v39 = vpack.c.bf16 %v1252_v37, %v1251_v36  ;;  %v1905_v37 = vld [vmem:[%s9895_s30 + $0x128] sm:$0xff] }
  0x3f   : > { %8480 = vmatmul.mubr.msk.bf16.gmra.mrb[20].mxu0 %vm749_vm1, %v740_v42  ;;  %v668_v42 = vld [vmem:[%s9895_s30 + $0xf5] sm:$0xff] }
  0x40   : > { %8483 = vmatprep.mubr.msk.bf16.mxu0 %vm749_vm1, %v741_v43  ;;  %v669_v43 = vld [vmem:[%s9895_s30 + $0xfd] sm:$0xff] }
  0x41   : > { %v689_v46 = vpack.c.bf16 %v669_v43, %v668_v42 }
  0x47   : > { %8484 = vmatmul.mubr.msk.bf16.gmra.mrb[24].mxu0 %vm749_vm1, %v742_v48  ;;  %v672_v48 = vld [vmem:[%s9895_s30 + $0x115] sm:$0xff] }
  0x48   : > { %8487 = vmatprep.mubr.msk.bf16.mxu0 %vm749_vm1, %v743_v49  ;;  %v673_v49 = vld [vmem:[%s9895_s30 + $0x11d] sm:$0xff] }
  0x49   : > { %v691_v52 = vpack.c.bf16 %v673_v49, %v672_v48  ;;  %v1872_v48 = vld [vmem:[%s9895_s30 + $0x20] sm:$0xff] }
  0x4f   : > { %8488 = vmatmul.mubr.msk.bf16.gmra.mrb[28].mxu0 %vm749_vm1, %v744_v54  ;;  %v1221_v54 = vld [vmem:[%s9895_s30 + $0x17] sm:$0xff] }
  0x50   : > { %8491 = vmatprep.mubr.msk.bf16.mxu0 %vm749_vm1, %v745_v55  ;;  %v1222_v55 = vld [vmem:[%s9895_s30 + $0x1f] sm:$0xff] }
  0x51   : > { %v10029_v58 = vpack.c.bf16 %v1222_v55, %v1221_v54  ;;  %v1876_v54 = vld [vmem:[%s9895_s30 + $0x40] sm:$0xff] }
  0x57   : > { %8492 = vmatmul.mubr.msk.bf16.gmra.mrb[32].mxu0 %vm749_vm1, %v746_v60  ;;  %v1656_v60 = vsel %vm804_vm0, %v9971_v5, 0 }
  0x58   : > { %8497 = vmatprep.mubr.msk.bf16.mxu0 %vm749_vm1, %v674_v61  ;;  %v10038_v61 = vld [vmem:[%s12006_s1 + $0x10] sm:$0xf] }
  0x59   : > { %v1982_v43 = vsel %vm804_vm0, %v10038_v61, 0 }
  0x5f   : > { %8498 = vmatmul.mubr.msk.bf16.vlgmr.msra.gmra.mrb[0].mxu0 %vm749_vm1, %v675_v2  ;;  %v1258_v2 = vpack.c.bf16 %v1226_v63, %v1225_v62  ;;  %v1880_v62 = vld [vmem:[%s9895_s30 + $0x60] sm:$0xff] }
  0x60   : > { %8534 = vmatpush3.bf16.msra.mxu0 %v1330_v4  ;;  %8501 = vmatprep.mubr.msk.bf16.mxu0 %vm749_vm1, %v676_v3  ;;  %v1259_v3 = vpack.c.bf16 %v1228_v1, %v1227_v0  ;;  %v1229_v4 = vld [vmem:[%s9895_s30 + $0x57] sm:$0xff]  ;;  %v1881_v1 = vld [vmem:[%s9895_s30 + $0x68] sm:$0xff] }
  0x61   : > { %9760 = vmatprep.subr.msk.bf16.mxu0 %vm804_vm0, %v9971_v5  ;;  %v1230_v5 = vld [vmem:[%s9895_s30 + $0x5f] sm:$0xff] }
  0x62   : > { %v1260_v8 = vpack.c.bf16 %v1230_v5, %v1229_v4  ;;  %v1884_v4 = vld [vmem:[%s9895_s30 + $0x80] sm:$0xff] }
  0x67   : > { %8502 = vmatmul.mubr.msk.bf16.gmra.mrb[4].mxu0 %vm749_vm1, %v677_v10  ;;  %v1233_v10 = vld [vmem:[%s9895_s30 + $0x77] sm:$0xff] }
  0x68   : > { %8505 = vmatprep.mubr.msk.bf16.mxu0 %vm749_vm1, %v678_v11  ;;  %v1234_v11 = vld [vmem:[%s9895_s30 + $0x7f] sm:$0xff] }
  0x69   : > { %v1262_v14 = vpack.c.bf16 %v1234_v11, %v1233_v10  ;;  %v1888_v10 = vld [vmem:[%s9895_s30 + $0xa0] sm:$0xff] }
  0x6f   : > { %8506 = vmatmul.mubr.msk.bf16.gmra.mrb[8].mxu0 %vm749_vm1, %v679_v16  ;;  %v1237_v16 = vld [vmem:[%s9895_s30 + $0x97] sm:$0xff] }
  0x70   : > { %8509 = vmatprep.mubr.msk.bf16.mxu0 %vm749_vm1, %v680_v17  ;;  %v1238_v17 = vld [vmem:[%s9895_s30 + $0x9f] sm:$0xff] }
  0x71   : > { %v1264_v20 = vpack.c.bf16 %v1238_v17, %v1237_v16  ;;  %v1892_v16 = vld [vmem:[%s9895_s30 + $0xc0] sm:$0xff] }
  0x77   : > { %8510 = vmatmul.mubr.msk.bf16.gmra.mrb[12].mxu0 %vm749_vm1, %v681_v22  ;;  %v1241_v22 = vld [vmem:[%s9895_s30 + $0xb7] sm:$0xff] }
  0x78   : > { %8513 = vmatprep.mubr.msk.bf16.mxu0 %vm749_vm1, %v682_v23  ;;  %v1242_v23 = vld [vmem:[%s9895_s30 + $0xbf] sm:$0xff] }
  0x79   : > { %v1266_v26 = vpack.c.bf16 %v1242_v23, %v1241_v22  ;;  %v1896_v22 = vld [vmem:[%s9895_s30 + $0xe0] sm:$0xff] }
  0x7f   : > { %8514 = vmatmul.mubr.msk.bf16.gmra.mrb[16].mxu0 %vm749_vm1, %v683_v28  ;;  %v1245_v28 = vld [vmem:[%s9895_s30 + $0xd7] sm:$0xff] }
  0x80   : > { %8517 = vmatprep.mubr.msk.bf16.mxu0 %vm749_vm1, %v684_v29  ;;  %v1246_v29 = vld [vmem:[%s9895_s30 + $0xdf] sm:$0xff] }
  0x81   : > { %v1268_v32 = vpack.c.bf16 %v1246_v29, %v1245_v28  ;;  %v1900_v28 = vld [vmem:[%s9895_s30 + $0x100] sm:$0xff] }
  0x87   : > { %8518 = vmatmul.mubr.msk.bf16.gmra.mrb[20].mxu0 %vm749_vm1, %v685_v34  ;;  %v1249_v34 = vld [vmem:[%s9895_s30 + $0xf7] sm:$0xff] }
  0x88   : > { %8521 = vmatprep.mubr.msk.bf16.mxu0 %vm749_vm1, %v686_v35  ;;  %v1250_v35 = vld [vmem:[%s9895_s30 + $0xff] sm:$0xff] }
  0x89   : > { %v1270_v38 = vpack.c.bf16 %v1250_v35, %v1249_v34  ;;  %v1904_v34 = vld [vmem:[%s9895_s30 + $0x120] sm:$0xff] }
  0x8f   : > { %8522 = vmatmul.mubr.msk.bf16.gmra.mrb[24].mxu0 %vm749_vm1, %v687_v40  ;;  %v1253_v40 = vld [vmem:[%s9895_s30 + $0x117] sm:$0xff] }
  0x90   : > { %8525 = vmatprep.mubr.msk.bf16.mxu0 %vm749_vm1, %v688_v41  ;;  %v1254_v41 = vld [vmem:[%s9895_s30 + $0x11f] sm:$0xff] }
  0x91   : > { %v1272_v42 = vpack.c.bf16 %v1254_v41, %v1253_v40  ;;  %v2198_v40 = vld [vmem:[%s9895_s30 + $0x21] sm:$0xff] }
  0x97   : > { %8526 = vmatmul.mubr.msk.bf16.gmra.mrb[28].mxu0 %vm749_vm1, %v689_v46  ;;  %v1580_v46 = vld [vmem:[%s9895_s30 + $0x12f] sm:$0xff] }
  0x98   : > { %8529 = vmatprep.mubr.msk.bf16.mxu0 %vm749_vm1, %v690_v47  ;;  %v1871_v47 = vld [vmem:[%s9895_s30 + $0x18] sm:$0xff]  ;;  %v1598_v49 = vpack.c.bf16 %v1580_v46, %v1579_v45  ;;  %v2202_v46 = vld [vmem:[%s9895_s30 + $0x41] sm:$0xff] }
  0x99   : > { %v1907_v50 = vpack.c.bf16 %v1872_v48, %v1871_v47  ;;  %v2201_v45 = vld [vmem:[%s9895_s30 + $0x39] sm:$0xff] }
  0x9a   : > { %v10190_v48 = vpack.c.bf16 %v2202_v46, %v2201_v45  ;;  %v425_v45 = vld [vmem:[%s12016_s11 + $0x50] sm:$0xff]  ;;  %v426_v46 = vld [vmem:[%s12016_s11 + $0x58] sm:$0xff] }
  0x9f   : > { %8530 = vmatmul.mubr.msk.bf16.gmra.mrb[32].mxu0 %vm749_vm1, %v691_v52  ;;  %v1874_v52 = vld [vmem:[%s9895_s30 + $0x30] sm:$0xff] }
  0xa0   : > { %8535 = vmatprep.mubr.msk.bf16.mxu0 %vm749_vm1, %v1255_v53  ;;  %v1875_v53 = vld [vmem:[%s9895_s30 + $0x38] sm:$0xff]  ;;  %v1908_v55 = vpack.c.bf16 %v1874_v52, %v1873_v51  ;;  %v2203_v51 = vld [vmem:[%s9895_s30 + $0x49] sm:$0xff] }
  0xa1   : > { %v1909_v56 = vpack.c.bf16 %v1876_v54, %v1875_v53  ;;  %v2204_v52 = vld [vmem:[%s9895_s30 + $0x51] sm:$0xff]  ;;  %v2205_v53 = vld [vmem:[%s9895_s30 + $0x59] sm:$0xff]  ;;  %v2206_v54 = vld [vmem:[%s9895_s30 + $0x61] sm:$0xff] }
  0xa7   : > { %8536 = vmatmul.mubr.msk.bf16.vlgmr.msra.gmra.mrb[0].mxu0 %vm749_vm1, %v10029_v58 }
  0xa8   : > { %8572 = vmatpush3.bf16.msra.mxu0 %v1656_v60  ;;  %8539 = vmatprep.mubr.msk.bf16.mxu0 %vm749_vm1, %v10031_v59  ;;  %v1878_v60 = vld [vmem:[%s9895_s30 + $0x50] sm:$0xff] }
  0xa9   : > { %9761 = vmatprep.subr.msk.bf16.mxu0 %vm804_vm0, %v10038_v61  ;;  %v1879_v61 = vld [vmem:[%s9895_s30 + $0x58] sm:$0xff] }
  0xaa   : > { %v1911_v0 = vpack.c.bf16 %v1880_v62, %v1879_v61 }
  0xaf   : > { %8540 = vmatmul.mubr.msk.bf16.gmra.mrb[4].mxu0 %vm749_vm1, %v1258_v2 }
  0xb0   : > { %8543 = vmatprep.mubr.msk.bf16.mxu0 %vm749_vm1, %v1259_v3 }
  0xb7   : > { %8544 = vmatmul.mubr.msk.bf16.gmra.mrb[8].mxu0 %vm749_vm1, %v1260_v8 }
  0xb8   : > { %8547 = vmatprep.mubr.msk.bf16.mxu0 %vm749_vm1, %v1261_v9 }
  0xbf   : > { %8548 = vmatmul.mubr.msk.bf16.gmra.mrb[12].mxu0 %vm749_vm1, %v1262_v14 }
  0xc0   : > { %8551 = vmatprep.mubr.msk.bf16.mxu0 %vm749_vm1, %v1263_v15 }
  0xc7   : > { %8552 = vmatmul.mubr.msk.bf16.gmra.mrb[16].mxu0 %vm749_vm1, %v1264_v20 }
  0xc8   : > { %8555 = vmatprep.mubr.msk.bf16.mxu0 %vm749_vm1, %v1265_v21 }
  0xcf   : > { %8556 = vmatmul.mubr.msk.bf16.gmra.mrb[20].mxu0 %vm749_vm1, %v1266_v26 }
  0xd0   : > { %8559 = vmatprep.mubr.msk.bf16.mxu0 %vm749_vm1, %v1267_v27 }
  0xd7   : > { %8560 = vmatmul.mubr.msk.bf16.gmra.mrb[24].mxu0 %vm749_vm1, %v1268_v32 }
  0xd8   : > { %8563 = vmatprep.mubr.msk.bf16.mxu0 %vm749_vm1, %v1269_v33 }
  0xdf   : > { %8564 = vmatmul.mubr.msk.bf16.gmra.mrb[28].mxu0 %vm749_vm1, %v1270_v38 }
  0xe0   : > { %8567 = vmatprep.mubr.msk.bf16.mxu0 %vm749_vm1, %v1271_v39 }
  0xe7   : > { %8568 = vmatmul.mubr.msk.bf16.gmra.mrb[32].mxu0 %vm749_vm1, %v1272_v42 }
  0xe8   : > { %8573 = vmatprep.mubr.msk.bf16.mxu0 %vm749_vm1, %v10029_v58  ;;  %v10130_v58 = vld [vmem:[%s12006_s1 + $0x18] sm:$0xf] }
  0xef   : > { %8574 = vmatmul.mubr.msk.bf16.vlgmr.msra.gmra.mrb[0].mxu0 %vm749_vm1, %v10031_v59  ;;  %v1877_v59 = vld [vmem:[%s9895_s30 + $0x48] sm:$0xff] }
  0xf0   : > { %8610 = vmatpush3.bf16.msra.mxu0 %v1982_v43  ;;  %8577 = vmatprep.mubr.msk.bf16.mxu0 %vm749_vm1, %v1258_v2  ;;  %v1910_v63 = vpack.c.bf16 %v1878_v60, %v1877_v59  ;;  %v1882_v2 = vld [vmem:[%s9895_s30 + $0x70] sm:$0xff]  ;;  %v2209_v59 = vld [vmem:[%s9895_s30 + $0x79] sm:$0xff]  ;;  %v2210_v60 = vld [vmem:[%s9895_s30 + $0x81] sm:$0xff] }
  0xf1   : > { %9762 = vmatprep.subr.msk.bf16.mxu0 %vm804_vm0, %v7830_v44  ;;  %v1912_v5 = vpack.c.bf16 %v1882_v2, %v1881_v1  ;;  %v2199_v43 = vld [vmem:[%s9895_s30 + $0x29] sm:$0xff]  ;;  %v2200_v44 = vld [vmem:[%s9895_s30 + $0x31] sm:$0xff]  ;;  %v2239_v62 = vpack.c.bf16 %v2210_v60, %v2209_v59  ;;  %v2213_v1 = vld [vmem:[%s9895_s30 + $0x99] sm:$0xff] }
  0xf2   : > { %v10188_v47 = vpack.c.bf16 %v2200_v44, %v2199_v43  ;;  %v2214_v2 = vld [vmem:[%s9895_s30 + $0xa1] sm:$0xff]  ;;  %v2853_v60 = vld [vmem:[%s9895_s30 + $0x4a] sm:$0xff] }
  0xf3   : > { %v423_v43 = vld [vmem:[%s12016_s11 + $0x40] sm:$0xff]  ;;  %v424_v44 = vld [vmem:[%s12016_s11 + $0x48] sm:$0xff] }
  0xf4   : > { %v2852_v59 = vld [vmem:[%s9895_s30 + $0x42] sm:$0xff] }
  0xf7   : > { %8578 = vmatmul.mubr.msk.bf16.gmra.mrb[4].mxu0 %vm749_vm1, %v1259_v3  ;;  %v1883_v3 = vld [vmem:[%s9895_s30 + $0x78] sm:$0xff] }
  0xf8   : > { %8581 = vmatprep.mubr.msk.bf16.mxu0 %vm749_vm1, %v1260_v8  ;;  %v1913_v6 = vpack.c.bf16 %v1884_v4, %v1883_v3  ;;  %v1886_v8 = vld [vmem:[%s9895_s30 + $0x90] sm:$0xff]  ;;  %v2241_v4 = vpack.c.bf16 %v2214_v2, %v2213_v1 }
  0xf9   : > { %v1914_v11 = vpack.c.bf16 %v1886_v8, %v1885_v7  ;;  %v2217_v7 = vld [vmem:[%s9895_s30 + $0xb9] sm:$0xff]  ;;  %v2218_v8 = vld [vmem:[%s9895_s30 + $0xc1] sm:$0xff] }
  0xff   : > { %8582 = vmatmul.mubr.msk.bf16.gmra.mrb[8].mxu0 %vm749_vm1, %v1261_v9  ;;  %v1887_v9 = vld [vmem:[%s9895_s30 + $0x98] sm:$0xff] }
 0x100   : > { %8585 = vmatprep.mubr.msk.bf16.mxu0 %vm749_vm1, %v1262_v14  ;;  %v1915_v12 = vpack.c.bf16 %v1888_v10, %v1887_v9  ;;  %v1890_v14 = vld [vmem:[%s9895_s30 + $0xb0] sm:$0xff]  ;;  %v2243_v10 = vpack.c.bf16 %v2218_v8, %v2217_v7 }
 0x101   : > { %v1916_v17 = vpack.c.bf16 %v1890_v14, %v1889_v13  ;;  %v2221_v13 = vld [vmem:[%s9895_s30 + $0xd9] sm:$0xff]  ;;  %v2222_v14 = vld [vmem:[%s9895_s30 + $0xe1] sm:$0xff]  ;;  %v2857_v7 = vld [vmem:[%s9895_s30 + $0x6a] sm:$0xff] }
 0x102   : > { %v2858_v8 = vld [vmem:[%s9895_s30 + $0x72] sm:$0xff] }
 0x107   : > { %8586 = vmatmul.mubr.msk.bf16.gmra.mrb[12].mxu0 %vm749_vm1, %v1263_v15  ;;  %v1891_v15 = vld [vmem:[%s9895_s30 + $0xb8] sm:$0xff] }
 0x108   : > { %8589 = vmatprep.mubr.msk.bf16.mxu0 %vm749_vm1, %v1264_v20  ;;  %v1917_v18 = vpack.c.bf16 %v1892_v16, %v1891_v15  ;;  %v1894_v20 = vld [vmem:[%s9895_s30 + $0xd0] sm:$0xff]  ;;  %v2245_v16 = vpack.c.bf16 %v2222_v14, %v2221_v13  ;;  %v438_v13 = vld [vmem:[%s12016_s11 + $0xb8] sm:$0xff]  ;;  %v439_v14 = vld [vmem:[%s12016_s11 + $0xc0] sm:$0xff] }
 0x109   : > { %v1918_v23 = vpack.c.bf16 %v1894_v20, %v1893_v19  ;;  %v2225_v19 = vld [vmem:[%s9895_s30 + $0xf9] sm:$0xff]  ;;  %v2226_v20 = vld [vmem:[%s9895_s30 + $0x101] sm:$0xff] }
 0x10f   : > { %8590 = vmatmul.mubr.msk.bf16.gmra.mrb[16].mxu0 %vm749_vm1, %v1265_v21  ;;  %v1895_v21 = vld [vmem:[%s9895_s30 + $0xd8] sm:$0xff] }
 0x110   : > { %8593 = vmatprep.mubr.msk.bf16.mxu0 %vm749_vm1, %v1266_v26  ;;  %v1919_v24 = vpack.c.bf16 %v1896_v22, %v1895_v21  ;;  %v1898_v26 = vld [vmem:[%s9895_s30 + $0xf0] sm:$0xff]  ;;  %v2247_v22 = vpack.c.bf16 %v2226_v20, %v2225_v19  ;;  %v440_v19 = vld [vmem:[%s12016_s11 + $0xc8] sm:$0xff] }
 0x111   : > { %v1920_v29 = vpack.c.bf16 %v1898_v26, %v1897_v25  ;;  %v2229_v25 = vld [vmem:[%s9895_s30 + $0x119] sm:$0xff]  ;;  %v2230_v26 = vld [vmem:[%s9895_s30 + $0x121] sm:$0xff]  ;;  %v441_v20 = vld [vmem:[%s12016_s11 + $0xd0] sm:$0xff] }
 0x117   : > { %8594 = vmatmul.mubr.msk.bf16.gmra.mrb[20].mxu0 %vm749_vm1, %v1267_v27  ;;  %v1899_v27 = vld [vmem:[%s9895_s30 + $0xf8] sm:$0xff] }
 0x118   : > { %8597 = vmatprep.mubr.msk.bf16.mxu0 %vm749_vm1, %v1268_v32  ;;  %v1921_v30 = vpack.c.bf16 %v1900_v28, %v1899_v27  ;;  %v1902_v32 = vld [vmem:[%s9895_s30 + $0x110] sm:$0xff]  ;;  %v2249_v28 = vpack.c.bf16 %v2230_v26, %v2229_v25  ;;  %v2863_v25 = vld [vmem:[%s9895_s30 + $0x9a] sm:$0xff]  ;;  %v2864_v26 = vld [vmem:[%s9895_s30 + $0xa2] sm:$0xff] }
 0x119   : > { %v1922_v35 = vpack.c.bf16 %v1902_v32, %v1901_v31 }
 0x11f   : > { %8598 = vmatmul.mubr.msk.bf16.gmra.mrb[24].mxu0 %vm749_vm1, %v1269_v33  ;;  %v1903_v33 = vld [vmem:[%s9895_s30 + $0x118] sm:$0xff] }
 0x120   : > { %8601 = vmatprep.mubr.msk.bf16.mxu0 %vm749_vm1, %v1270_v38  ;;  %v1923_v36 = vpack.c.bf16 %v1904_v34, %v1903_v33  ;;  %v1906_v38 = vld [vmem:[%s9895_s30 + $0x130] sm:$0xff]  ;;  %v10257_v33 = vld [vmem:[%s12006_s1 + $0x20] sm:$0xf]  ;;  %v9803_v34 = vmov 0  }
 0x121   : > { %v1924_v41 = vpack.c.bf16 %v1906_v38, %v1905_v37  ;;  %9780 = vset.pattern.permute.xlu0 %v9803_v34  ;;  %9781 = vset.pattern.permute.xlu1 %v9803_v34  ;;  %v416_v37 = vld [vmem:[%s12016_s11 + $0x8] sm:$0xff]  ;;  %v418_v38 = vld [vmem:[%s12016_s11 + $0x18] sm:$0xff]  ;;  %v3286_v2 = vsel %vm804_vm0, %v10257_v33, 0  ;;  %v447_v34 = vld [vmem:[%s12016_s11 + $0x100] sm:$0xff] }
 0x127   : > { %8602 = vmatmul.mubr.msk.bf16.gmra.mrb[28].mxu0 %vm749_vm1, %v1271_v39  ;;  %v2197_v39 = vld [vmem:[%s9895_s30 + $0x19] sm:$0xff] }
 0x128   : > { %8605 = vmatprep.mubr.msk.bf16.mxu0 %vm749_vm1, %v1272_v42  ;;  %v2233_v42 = vpack.c.bf16 %v2198_v40, %v2197_v39  ;;  %v419_v39 = vld [vmem:[%s12016_s11 + $0x20] sm:$0xff]  ;;  %v420_v40 = vld [vmem:[%s12016_s11 + $0x28] sm:$0xff] }
 0x12f   : > { %8606 = vmatmul.mubr.msk.bf16.gmra.mrb[32].mxu0 %vm749_vm1, %v1598_v49  ;;  %v2634_v49 = vsel %vm804_vm0, %v10130_v58, 0 }
 0x130   : > { %8611 = vmatprep.mubr.msk.bf16.mxu0 %vm749_vm1, %v1907_v50  ;;  %v10197_v50 = vld [vmem:[%s12006_s1 + $0x1c] sm:$0xf] }
 0x131   : > { %v2960_v32 = vsel %vm804_vm0, %v10197_v50, 0 }
 0x137   : > { %8612 = vmatmul.mubr.msk.bf16.vlgmr.msra.gmra.mrb[0].mxu0 %vm749_vm1, %v1908_v55  ;;  %v2236_v55 = vpack.c.bf16 %v2204_v52, %v2203_v51  ;;  %v2850_v51 = vld [vmem:[%s9895_s30 + $0x32] sm:$0xff]  ;;  %v428_v52 = vld [vmem:[%s12016_s11 + $0x68] sm:$0xff] }
 0x138   : > { %8648 = vmatpush3.bf16.msra.mxu0 %v2308_v57  ;;  %8615 = vmatprep.mubr.msk.bf16.mxu0 %vm749_vm1, %v1909_v56  ;;  %v2237_v56 = vpack.c.bf16 %v2206_v54, %v2205_v53  ;;  %v2207_v57 = vld [vmem:[%s9895_s30 + $0x69] sm:$0xff] }
 0x139   : > { %9763 = vmatprep.subr.msk.bf16.mxu0 %vm804_vm0, %v10130_v58  ;;  %v2208_v58 = vld [vmem:[%s9895_s30 + $0x71] sm:$0xff] }
 0x13a   : > { %v2238_v61 = vpack.c.bf16 %v2208_v58, %v2207_v57  ;;  %v429_v53 = vld [vmem:[%s12016_s11 + $0x70] sm:$0xff]  ;;  %v431_v57 = vld [vmem:[%s12016_s11 + $0x80] sm:$0xff] }
 0x13b   : > { %v2851_v58 = vld [vmem:[%s9895_s30 + $0x3a] sm:$0xff] }
 0x13f   : > { %8616 = vmatmul.mubr.msk.bf16.gmra.mrb[4].mxu0 %vm749_vm1, %v1910_v63  ;;  %v2211_v63 = vld [vmem:[%s9895_s30 + $0x89] sm:$0xff] }
 0x140   : > { %8619 = vmatprep.mubr.msk.bf16.mxu0 %vm749_vm1, %v1911_v0  ;;  %v2212_v0 = vld [vmem:[%s9895_s30 + $0x91] sm:$0xff] }
 0x141   : > { %v2240_v3 = vpack.c.bf16 %v2212_v0, %v2211_v63  ;;  %v433_v63 = vld [vmem:[%s12016_s11 + $0x90] sm:$0xff]  ;;  %v2886_v0 = vpack.c.bf16 %v2852_v59, %v2851_v58 }
 0x142   : > { %v2881_v58 = vld [vmem:[%s9895_s30 + $0x12a] sm:$0xff]  ;;  %v2882_v59 = vld [vmem:[%s9895_s30 + $0x132] sm:$0xff] }
 0x147   : > { %8620 = vmatmul.mubr.msk.bf16.gmra.mrb[8].mxu0 %vm749_vm1, %v1912_v5  ;;  %v2215_v5 = vld [vmem:[%s9895_s30 + $0xa9] sm:$0xff] }
 0x148   : > { %8623 = vmatprep.mubr.msk.bf16.mxu0 %vm749_vm1, %v1913_v6  ;;  %v2216_v6 = vld [vmem:[%s9895_s30 + $0xb1] sm:$0xff] }
 0x149   : > { %v2242_v9 = vpack.c.bf16 %v2216_v6, %v2215_v5  ;;  %v2855_v5 = vld [vmem:[%s9895_s30 + $0x5a] sm:$0xff]  ;;  %v2856_v6 = vld [vmem:[%s9895_s30 + $0x62] sm:$0xff] }
 0x14f   : > { %8624 = vmatmul.mubr.msk.bf16.gmra.mrb[12].mxu0 %vm749_vm1, %v1914_v11  ;;  %v2219_v11 = vld [vmem:[%s9895_s30 + $0xc9] sm:$0xff] }
 0x150   : > { %8627 = vmatprep.mubr.msk.bf16.mxu0 %vm749_vm1, %v1915_v12  ;;  %v2220_v12 = vld [vmem:[%s9895_s30 + $0xd1] sm:$0xff] }
 0x151   : > { %v2244_v15 = vpack.c.bf16 %v2220_v12, %v2219_v11  ;;  %v2888_v11 = vpack.c.bf16 %v2856_v6, %v2855_v5  ;;  %v2889_v12 = vpack.c.bf16 %v2858_v8, %v2857_v7  ;;  %v3178_v5 = vld [vmem:[%s9895_s30 + $0x43] sm:$0xff]  ;;  %v3179_v6 = vld [vmem:[%s9895_s30 + $0x4b] sm:$0xff]  ;;  %v3180_v7 = vld [vmem:[%s9895_s30 + $0x53] sm:$0xff] }
 0x157   : > { %8628 = vmatmul.mubr.msk.bf16.gmra.mrb[16].mxu0 %vm749_vm1, %v1916_v17  ;;  %v2223_v17 = vld [vmem:[%s9895_s30 + $0xe9] sm:$0xff] }
 0x158   : > { %8631 = vmatprep.mubr.msk.bf16.mxu0 %vm749_vm1, %v1917_v18  ;;  %v2224_v18 = vld [vmem:[%s9895_s30 + $0xf1] sm:$0xff] }
 0x159   : > { %v2246_v21 = vpack.c.bf16 %v2224_v18, %v2223_v17  ;;  %v2861_v17 = vld [vmem:[%s9895_s30 + $0x8a] sm:$0xff]  ;;  %v2862_v18 = vld [vmem:[%s9895_s30 + $0x92] sm:$0xff] }
 0x15f   : > { %8632 = vmatmul.mubr.msk.bf16.gmra.mrb[20].mxu0 %vm749_vm1, %v1918_v23  ;;  %v2227_v23 = vld [vmem:[%s9895_s30 + $0x109] sm:$0xff] }
 0x160   : > { %8635 = vmatprep.mubr.msk.bf16.mxu0 %vm749_vm1, %v1919_v24  ;;  %v2228_v24 = vld [vmem:[%s9895_s30 + $0x111] sm:$0xff] }
 0x161   : > { %v2248_v27 = vpack.c.bf16 %v2228_v24, %v2227_v23  ;;  %v442_v23 = vld [vmem:[%s12016_s11 + $0xd8] sm:$0xff]  ;;  %v443_v24 = vld [vmem:[%s12016_s11 + $0xe0] sm:$0xff] }
 0x167   : > { %8636 = vmatmul.mubr.msk.bf16.gmra.mrb[24].mxu0 %vm749_vm1, %v1920_v29  ;;  %v2231_v29 = vld [vmem:[%s9895_s30 + $0x129] sm:$0xff] }
 0x168   : > { %8639 = vmatprep.mubr.msk.bf16.mxu0 %vm749_vm1, %v1921_v30  ;;  %v2232_v30 = vld [vmem:[%s9895_s30 + $0x131] sm:$0xff] }
 0x169   : > { %v2250_v31 = vpack.c.bf16 %v2232_v30, %v2231_v29  ;;  %v444_v29 = vld [vmem:[%s12016_s11 + $0xe8] sm:$0xff]  ;;  %v445_v30 = vld [vmem:[%s12016_s11 + $0xf0] sm:$0xff] }
 0x16f   : > { %8640 = vmatmul.mubr.msk.bf16.gmra.mrb[28].mxu0 %vm749_vm1, %v1922_v35  ;;  %v415_v35 = vld [vmem:[%s12016_s11] sm:$0xff] }
 0x170   : > { %8643 = vmatprep.mubr.msk.bf16.mxu0 %vm749_vm1, %v1923_v36  ;;  %v417_v36 = vld [vmem:[%s12016_s11 + $0x10] sm:$0xff]  ;;  %453 = vperm.xlu0 %9780, %v415_v35   ;;  %v2867_v35 = vld [vmem:[%s9895_s30 + $0xba] sm:$0xff] }
 0x171   : > { %463 = vperm.xlu1 %9781, %v417_v36   ;;  %v2868_v36 = vld [vmem:[%s9895_s30 + $0xc2] sm:$0xff] }
 0x174   : > { %458 = vperm.xlu0 %9780, %v416_v37   ;;  %v2869_v37 = vld [vmem:[%s9895_s30 + $0xca] sm:$0xff] }
 0x175   : > { %468 = vperm.xlu1 %9781, %v418_v38   ;;  %v2870_v38 = vld [vmem:[%s9895_s30 + $0xd2] sm:$0xff] }
 0x177   : > { %8644 = vmatmul.mubr.msk.bf16.gmra.mrb[32].mxu0 %vm749_vm1, %v1924_v41  ;;  %v421_v41 = vld [vmem:[%s12016_s11 + $0x30] sm:$0xff] }
 0x178   : > { %8649 = vmatprep.mubr.msk.bf16.mxu0 %vm749_vm1, %v2233_v42  ;;  %473 = vperm.xlu0 %9780, %v419_v39   ;;  %v422_v42 = vld [vmem:[%s12016_s11 + $0x38] sm:$0xff]  ;;  %v448_v39 = vld [vmem:[%s12016_s11 + $0x108] sm:$0xff] }
 0x179   : > { %478 = vperm.xlu1 %9781, %v420_v40   ;;  %v449_v40 = vld [vmem:[%s12016_s11 + $0x110] sm:$0xff] }
 0x17c   : > { %483 = vperm.xlu0 %9780, %v421_v41   ;;  %v2894_v41 = vpack.c.bf16 %v2868_v36, %v2867_v35  ;;  %v3198_v35 = vld [vmem:[%s9895_s30 + $0xe3] sm:$0xff]  ;;  %v3199_v36 = vld [vmem:[%s9895_s30 + $0xeb] sm:$0xff] }
 0x17d   : > { %488 = vperm.xlu1 %9781, %v422_v42   ;;  %v2895_v42 = vpack.c.bf16 %v2870_v38, %v2869_v37  ;;  %v3200_v37 = vld [vmem:[%s9895_s30 + $0xf3] sm:$0xff] }
 0x17f   : > { %8650 = vmatmul.mubr.msk.bf16.vlgmr.msra.gmra.mrb[0].mxu0 %vm749_vm1, %v10188_v47 }
 0x180   : > { %8686 = vmatpush3.bf16.msra.mxu0 %v2634_v49  ;;  %8653 = vmatprep.mubr.msk.bf16.mxu0 %vm749_vm1, %v10190_v48  ;;  %v2558_v49 = vld [vmem:[%s9895_s30 + $0x141] sm:$0xff] }
 0x181   : > { %9764 = vmatprep.subr.msk.bf16.mxu0 %vm804_vm0, %v10197_v50  ;;  %493 = vperm.xlu0 %9780, %v423_v43   ;;  %v2849_v50 = vld [vmem:[%s9895_s30 + $0x2a] sm:$0xff]  ;;  %v450_v43 = vld [vmem:[%s12016_s11 + $0x118] sm:$0xff] }
 0x182   : > { %498 = vperm.xlu1 %9781, %v424_v44   ;;  %v2871_v44 = vld [vmem:[%s9895_s30 + $0xda] sm:$0xff] }
 0x185   : > { %503 = vperm.xlu0 %9780, %v425_v45   ;;  %v2872_v45 = vld [vmem:[%s9895_s30 + $0xe2] sm:$0xff] }
 0x186   : > { %508 = vperm.xlu1 %9781, %v426_v46   ;;  %v2873_v46 = vld [vmem:[%s9895_s30 + $0xea] sm:$0xff] }
 0x187   : > { %8654 = vmatmul.mubr.msk.bf16.gmra.mrb[4].mxu0 %vm749_vm1, %v2236_v55 }
 0x188   : > { %8657 = vmatprep.mubr.msk.bf16.mxu0 %vm749_vm1, %v2237_v56 }
 0x18a   : > { %518 = vperm.xlu1 %9781, %v428_v52   ;;  %v2877_v52 = vld [vmem:[%s9895_s30 + $0x10a] sm:$0xff] }
 0x18f   : > { %8658 = vmatmul.mubr.msk.bf16.gmra.mrb[8].mxu0 %vm749_vm1, %v2238_v61 }
 0x190   : > { %8661 = vmatprep.mubr.msk.bf16.mxu0 %vm749_vm1, %v2239_v62 }
 0x197   : > { %8662 = vmatmul.mubr.msk.bf16.gmra.mrb[12].mxu0 %vm749_vm1, %v2240_v3 }
 0x198   : > { %8665 = vmatprep.mubr.msk.bf16.mxu0 %vm749_vm1, %v2241_v4 }
 0x19f   : > { %8666 = vmatmul.mubr.msk.bf16.gmra.mrb[16].mxu0 %vm749_vm1, %v2242_v9 }
 0x1a0   : > { %8669 = vmatprep.mubr.msk.bf16.mxu0 %vm749_vm1, %v2243_v10 }
 0x1a7   : > { %8670 = vmatmul.mubr.msk.bf16.gmra.mrb[20].mxu0 %vm749_vm1, %v2244_v15 }
 0x1a8   : > { %8673 = vmatprep.mubr.msk.bf16.mxu0 %vm749_vm1, %v2245_v16 }
 0x1af   : > { %8674 = vmatmul.mubr.msk.bf16.gmra.mrb[24].mxu0 %vm749_vm1, %v2246_v21 }
 0x1b0   : > { %8677 = vmatprep.mubr.msk.bf16.mxu0 %vm749_vm1, %v2247_v22 }
 0x1b7   : > { %8678 = vmatmul.mubr.msk.bf16.gmra.mrb[28].mxu0 %vm749_vm1, %v2248_v27 }
 0x1b8   : > { %8681 = vmatprep.mubr.msk.bf16.mxu0 %vm749_vm1, %v2249_v28 }
 0x1bf   : > { %8682 = vmatmul.mubr.msk.bf16.gmra.mrb[32].mxu0 %vm749_vm1, %v2250_v31 }
 0x1c0   : > { %8687 = vmatprep.mubr.msk.bf16.mxu0 %vm749_vm1, %v10188_v47  ;;  %v427_v47 = vld [vmem:[%s12016_s11 + $0x60] sm:$0xff] }
 0x1c1   : > { %513 = vperm.xlu0 %9780, %v427_v47   ;;  %v2874_v47 = vld [vmem:[%s9895_s30 + $0xf2] sm:$0xff] }
 0x1c5   : > { %523 = vperm.xlu0 %9780, %v429_v53   ;;  %v2878_v53 = vld [vmem:[%s9895_s30 + $0x112] sm:$0xff] }
 0x1c7   : > { %8688 = vmatmul.mubr.msk.bf16.vlgmr.msra.gmra.mrb[0].mxu0 %vm749_vm1, %v10190_v48  ;;  %v2557_v48 = vld [vmem:[%s9895_s30 + $0x139] sm:$0xff] }
 0x1c8   : > { %8724 = vmatpush3.bf16.msra.mxu0 %v2960_v32  ;;  %8691 = vmatprep.mubr.msk.bf16.mxu0 %vm749_vm1, %v2236_v55  ;;  %v2576_v54 = vpack.c.bf16 %v2558_v49, %v2557_v48  ;;  %v2885_v55 = vpack.c.bf16 %v2850_v51, %v2849_v50  ;;  %v2896_v48 = vpack.c.bf16 %v2872_v45, %v2871_v44  ;;  %v2875_v50 = vld [vmem:[%s9895_s30 + $0xfa] sm:$0xff]  ;;  %v2876_v51 = vld [vmem:[%s9895_s30 + $0x102] sm:$0xff] }
 0x1c9   : > { %9765 = vmatprep.subr.msk.bf16.mxu0 %vm804_vm0, %v10257_v33  ;;  %533 = vperm.xlu0 %9780, %v431_v57   ;;  %v446_v33 = vld [vmem:[%s12016_s11 + $0xf8] sm:$0xff]  ;;  %v2897_v49 = vpack.c.bf16 %v2874_v47, %v2873_v46  ;;  %v2880_v57 = vld [vmem:[%s9895_s30 + $0x122] sm:$0xff] }
 0x1ca   : > { %v3205_v46 = vld [vmem:[%s9895_s30 + $0x11b] sm:$0xff]  ;;  %v3206_v47 = vld [vmem:[%s9895_s30 + $0x123] sm:$0xff] }
 0x1cd   : > { %543 = vperm.xlu0 %9780, %v433_v63   ;;  %v2884_v63 = vld [vmem:[%s9895_s30 + $0x142] sm:$0xff] }
 0x1cf   : > { %8692 = vmatmul.mubr.msk.bf16.gmra.mrb[4].mxu0 %vm749_vm1, %v2237_v56  ;;  %v430_v56 = vld [vmem:[%s12016_s11 + $0x78] sm:$0xff] }
 0x1d0   : > { %8695 = vmatprep.mubr.msk.bf16.mxu0 %vm749_vm1, %v2238_v61  ;;  %528 = vperm.xlu1 %9781, %v430_v56   ;;  %v2854_v61 = vld [vmem:[%s9895_s30 + $0x52] sm:$0xff]  ;;  %v2879_v56 = vld [vmem:[%s9895_s30 + $0x11a] sm:$0xff] }
 0x1d1   : > { %v2887_v1 = vpack.c.bf16 %v2854_v61, %v2853_v60  ;;  %v2900_v60 = vpack.c.bf16 %v2880_v57, %v2879_v56  ;;  %v2901_v61 = vpack.c.bf16 %v2882_v59, %v2881_v58  ;;  %v3771_v56 = vld [vmem:[%s12010_s5 + $0x8] sm:$0xff]  ;;  %v12018_v57 = vmov 0.0|0.0  }
 0x1d2   : > { %9169 = vmatprep.subr.bf16.mxu1 %v12018_v57  ;;  %v12019_v59 = vmov 0.0  }
 0x1d3   : > { %8803 = vmatprep.mubr.msk.f32.mxu1 %vm9805_vm3, %v12019_v59  ;;  %632 = vst.msk [vmem:[#allocation2] sm:$0xff] %vm631_vm2, %v12019_v59  ;;  %633 = vst.msk [vmem:[#allocation2 + $0x8] sm:$0xff] %vm631_vm2, %v12019_v59 }
 0x1d4   : > { %634 = vst.msk [vmem:[#allocation2 + $0x10] sm:$0xff] %vm631_vm2, %v12019_v59  ;;  %635 = vst.msk [vmem:[#allocation2 + $0x138] sm:$0xff] %vm631_vm2, %v12019_v59 }
 0x1d5   : > { %636 = vst.msk [vmem:[#allocation2 + $0x140] sm:$0xff] %vm631_vm2, %v12019_v59  ;;  %637 = vst.msk [vmem:[#allocation2 + $0x148] sm:$0xff] %vm631_vm2, %v12019_v59 }
 0x1d7   : > { %8696 = vmatmul.mubr.msk.bf16.gmra.mrb[8].mxu0 %vm749_vm1, %v2239_v62  ;;  %v432_v62 = vld [vmem:[%s12016_s11 + $0x88] sm:$0xff] }
 0x1d8   : > { %8699 = vmatprep.mubr.msk.bf16.mxu0 %vm749_vm1, %v2240_v3  ;;  %538 = vperm.xlu1 %9781, %v432_v62   ;;  %v434_v3 = vld [vmem:[%s12016_s11 + $0x98] sm:$0xff] }
 0x1d9   : > { %v2883_v62 = vld [vmem:[%s9895_s30 + $0x13a] sm:$0xff] }
 0x1dc   : > { %548 = vperm.xlu1 %9781, %v434_v3  }
 0x1df   : > { %8700 = vmatmul.mubr.msk.bf16.gmra.mrb[12].mxu0 %vm749_vm1, %v2241_v4  ;;  %v435_v4 = vld [vmem:[%s12016_s11 + $0xa0] sm:$0xff] }
 0x1e0   : > { %8703 = vmatprep.mubr.msk.bf16.mxu0 %vm749_vm1, %v2242_v9  ;;  %553 = vperm.xlu0 %9780, %v435_v4   ;;  %v436_v9 = vld [vmem:[%s12016_s11 + $0xa8] sm:$0xff]  ;;  %v3177_v4 = vld [vmem:[%s9895_s30 + $0x3b] sm:$0xff] }
 0x1e1   : > { %558 = vperm.xlu1 %9781, %v436_v9   ;;  %v3212_v8 = vpack.c.bf16 %v3178_v5, %v3177_v4  ;;  %v3213_v9 = vpack.c.bf16 %v3180_v7, %v3179_v6 }
 0x1e5   : > { %568 = vperm.xlu1 %9781, %v438_v13   ;;  %v3184_v13 = vld [vmem:[%s9895_s30 + $0x73] sm:$0xff] }
 0x1e7   : > { %8704 = vmatmul.mubr.msk.bf16.gmra.mrb[16].mxu0 %vm749_vm1, %v2243_v10  ;;  %v437_v10 = vld [vmem:[%s12016_s11 + $0xb0] sm:$0xff] }
 0x1e8   : > { %8707 = vmatprep.mubr.msk.bf16.mxu0 %vm749_vm1, %v2244_v15  ;;  %563 = vperm.xlu0 %9780, %v437_v10   ;;  %v2859_v15 = vld [vmem:[%s9895_s30 + $0x7a] sm:$0xff] }
 0x1e9   : > { %578 = vperm.xlu1 %9781, %v440_v19   ;;  %v3181_v10 = vld [vmem:[%s9895_s30 + $0x5b] sm:$0xff]  ;;  %v3188_v19 = vld [vmem:[%s9895_s30 + $0x93] sm:$0xff] }
 0x1ec   : > { %573 = vperm.xlu0 %9780, %v439_v14  }
 0x1ed   : > { %588 = vperm.xlu1 %9781, %v442_v23   ;;  %v3190_v23 = vld [vmem:[%s9895_s30 + $0xa3] sm:$0xff] }
 0x1ef   : > { %8708 = vmatmul.mubr.msk.bf16.gmra.mrb[20].mxu0 %vm749_vm1, %v2245_v16  ;;  %v2860_v16 = vld [vmem:[%s9895_s30 + $0x82] sm:$0xff] }
 0x1f0   : > { %8711 = vmatprep.mubr.msk.bf16.mxu0 %vm749_vm1, %v2246_v21  ;;  %v2890_v21 = vpack.c.bf16 %v2860_v16, %v2859_v15  ;;  %583 = vperm.xlu0 %9780, %v441_v20   ;;  %v3185_v16 = vld [vmem:[%s9895_s30 + $0x7b] sm:$0xff] }
 0x1f1   : > { %598 = vperm.xlu1 %9781, %v444_v29   ;;  %v3194_v29 = vld [vmem:[%s9895_s30 + $0xc3] sm:$0xff] }
 0x1f4   : > { %593 = vperm.xlu0 %9780, %v443_v24   ;;  %v3191_v24 = vld [vmem:[%s9895_s30 + $0xab] sm:$0xff] }
 0x1f5   : > { %608 = vperm.xlu1 %9781, %v446_v33  }
 0x1f7   : > { %8712 = vmatmul.mubr.msk.bf16.gmra.mrb[24].mxu0 %vm749_vm1, %v2247_v22  ;;  %v2891_v22 = vpack.c.bf16 %v2862_v18, %v2861_v17  ;;  %v3186_v17 = vld [vmem:[%s9895_s30 + $0x83] sm:$0xff]  ;;  %v3187_v18 = vld [vmem:[%s9895_s30 + $0x8b] sm:$0xff] }
 0x1f8   : > { %8715 = vmatprep.mubr.msk.bf16.mxu0 %vm749_vm1, %v2248_v27  ;;  %v2865_v27 = vld [vmem:[%s9895_s30 + $0xaa] sm:$0xff]  ;;  %603 = vperm.xlu0 %9780, %v445_v30   ;;  %v3216_v20 = vpack.c.bf16 %v3186_v17, %v3185_v16 }
 0x1f9   : > { %618 = vperm.xlu1 %9781, %v448_v39   ;;  %v3195_v30 = vld [vmem:[%s9895_s30 + $0xcb] sm:$0xff]  ;;  %v3223_v39 = vpack.c.bf16 %v3200_v37, %v3199_v36 }
 0x1fc   : > { %613 = vperm.xlu0 %9780, %v447_v34   ;;  %v3197_v34 = vld [vmem:[%s9895_s30 + $0xdb] sm:$0xff] }
 0x1fd   : > { %628 = vperm.xlu1 %9781, %v450_v43   ;;  %v3222_v38 = vpack.c.bf16 %v3198_v35, %v3197_v34  ;;  %v3204_v43 = vld [vmem:[%s9895_s30 + $0x113] sm:$0xff] }
 0x1ff   : > { %8716 = vmatmul.mubr.msk.bf16.gmra.mrb[28].mxu0 %vm749_vm1, %v2249_v28  ;;  %v2866_v28 = vld [vmem:[%s9895_s30 + $0xb2] sm:$0xff] }
 0x200   : > { %8719 = vmatprep.mubr.msk.bf16.mxu0 %vm749_vm1, %v2250_v31  ;;  %v2892_v31 = vpack.c.bf16 %v2864_v26, %v2863_v25  ;;  %v2893_v32 = vpack.c.bf16 %v2866_v28, %v2865_v27  ;;  %623 = vperm.xlu0 %9780, %v449_v40   ;;  %v3192_v25 = vld [vmem:[%s9895_s30 + $0xb3] sm:$0xff]  ;;  %v3193_v28 = vld [vmem:[%s9895_s30 + $0xbb] sm:$0xff] }
 0x201   : > { %v3219_v27 = vpack.c.bf16 %v3192_v25, %v3191_v24  ;;  %v3201_v40 = vld [vmem:[%s9895_s30 + $0xfb] sm:$0xff] }
 0x207   : > { %8720 = vmatmul.mubr.msk.bf16.gmra.mrb[32].mxu0 %vm749_vm1, %v2576_v54  ;;  %v2898_v54 = vpack.c.bf16 %v2876_v51, %v2875_v50  ;;  %v3226_v50 = vpack.c.bf16 %v3206_v47, %v3205_v46 }
 0x208   : > { %8725 = vmatprep.mubr.msk.bf16.mxu0 %vm749_vm1, %v2885_v55  ;;  %v2899_v55 = vpack.c.bf16 %v2878_v53, %v2877_v52  ;;  %v3209_v52 = vld [vmem:[%s9895_s30 + $0x13b] sm:$0xff]  ;;  %v3210_v53 = vld [vmem:[%s9895_s30 + $0x143] sm:$0xff] }
 0x20f   : > { %8726 = vmatmul.mubr.msk.bf16.vlgmr.msra.gmra.mrb[0].mxu0 %vm749_vm1, %v2886_v0  ;;  %v3175_v0 = vld [vmem:[%s9895_s30 + $0x2b] sm:$0xff] }
 0x210   : > { %8762 = vmatpush3.bf16.msra.mxu0 %v3286_v2  ;;  %8729 = vmatprep.mubr.msk.bf16.mxu0 %vm749_vm1, %v2887_v1  ;;  %v3176_v1 = vld [vmem:[%s9895_s30 + $0x33] sm:$0xff]  ;;  %v2902_v2 = vpack.c.bf16 %v2884_v63, %v2883_v62 }
 0x211   : > { %v3211_v3 = vpack.c.bf16 %v3176_v1, %v3175_v0  ;;  %9175 = vmatprep.subr.bf16.mxu0 %v12018_v57 }
 0x217   : > { %8730 = vmatmul.mubr.msk.bf16.gmra.mrb[4].mxu0 %vm749_vm1, %v2888_v11  ;;  %v3182_v11 = vld [vmem:[%s9895_s30 + $0x63] sm:$0xff] }
 0x218   : > { %8733 = vmatprep.mubr.msk.bf16.mxu0 %vm749_vm1, %v2889_v12  ;;  %v3183_v12 = vld [vmem:[%s9895_s30 + $0x6b] sm:$0xff]  ;;  %v3214_v14 = vpack.c.bf16 %v3182_v11, %v3181_v10 }
 0x219   : > { %v3215_v15 = vpack.c.bf16 %v3184_v13, %v3183_v12 }
 0x21f   : > { %8734 = vmatmul.mubr.msk.bf16.gmra.mrb[8].mxu0 %vm749_vm1, %v2890_v21  ;;  %v3217_v21 = vpack.c.bf16 %v3188_v19, %v3187_v18 }
 0x220   : > { %8737 = vmatprep.mubr.msk.bf16.mxu0 %vm749_vm1, %v2891_v22  ;;  %v3189_v22 = vld [vmem:[%s9895_s30 + $0x9b] sm:$0xff] }
 0x221   : > { %v3218_v26 = vpack.c.bf16 %v3190_v23, %v3189_v22 }
 0x227   : > { %8738 = vmatmul.mubr.msk.bf16.gmra.mrb[12].mxu0 %vm749_vm1, %v2892_v31  ;;  %v3196_v31 = vld [vmem:[%s9895_s30 + $0xd3] sm:$0xff] }
 0x228   : > { %8741 = vmatprep.mubr.msk.bf16.mxu0 %vm749_vm1, %v2893_v32  ;;  %v3220_v32 = vpack.c.bf16 %v3194_v29, %v3193_v28  ;;  %v3221_v33 = vpack.c.bf16 %v3196_v31, %v3195_v30 }
 0x22f   : > { %8742 = vmatmul.mubr.msk.bf16.gmra.mrb[16].mxu0 %vm749_vm1, %v2894_v41  ;;  %v3202_v41 = vld [vmem:[%s9895_s30 + $0x103] sm:$0xff] }
 0x230   : > { %8745 = vmatprep.mubr.msk.bf16.mxu0 %vm749_vm1, %v2895_v42  ;;  %v3203_v42 = vld [vmem:[%s9895_s30 + $0x10b] sm:$0xff]  ;;  %v3224_v44 = vpack.c.bf16 %v3202_v41, %v3201_v40 }
 0x231   : > { %v3225_v45 = vpack.c.bf16 %v3204_v43, %v3203_v42 }
 0x237   : > { %8746 = vmatmul.mubr.msk.bf16.gmra.mrb[20].mxu0 %vm749_vm1, %v2896_v48  ;;  %v3207_v48 = vld [vmem:[%s9895_s30 + $0x12b] sm:$0xff] }
 0x238   : > { %8749 = vmatprep.mubr.msk.bf16.mxu0 %vm749_vm1, %v2897_v49  ;;  %v3208_v49 = vld [vmem:[%s9895_s30 + $0x133] sm:$0xff] }
 0x239   : > { %v3227_v51 = vpack.c.bf16 %v3208_v49, %v3207_v48 }
 0x23f   : > { %8750 = vmatmul.mubr.msk.bf16.gmra.mrb[24].mxu0 %vm749_vm1, %v2898_v54  ;;  %v3228_v54 = vpack.c.bf16 %v3210_v53, %v3209_v52 }
 0x240   : > { %8753 = vmatprep.mubr.msk.bf16.mxu0 %vm749_vm1, %v2899_v55  ;;  %v3770_v55 = vld [vmem:[%s12010_s5] sm:$0xff] }
 0x241   : > { %v10506_v58 = vpack.c.bf16 %v3771_v56, %v3770_v55 }
 0x243   : > { %9171 = vmatpush3.bf16.msra.mxu1 %v10506_v58 }
 0x244   : > { %9172 = vmatprep.subr.bf16.mxu1 %v12018_v57 }
 0x247   : > { %8754 = vmatmul.mubr.msk.bf16.gmra.mrb[28].mxu0 %vm749_vm1, %v2900_v60  ;;  %v10527_v60 = vpop.permute.xlu0 %453 }
 0x248   : > { %8757 = vmatprep.mubr.msk.bf16.mxu0 %vm749_vm1, %v2901_v61  ;;  %v10529_v61 = vpop.permute.xlu1 %463 }
 0x24b   : > { %v10531_v62 = vpop.permute.xlu0 %458 }
 0x24c   : > { %v10533_v63 = vpop.permute.xlu1 %468 }
 0x24f   : > { %8758 = vmatmul.mubr.msk.bf16.gmra.mrb[32].mxu0 %vm749_vm1, %v2902_v2  ;;  %v10535_v0 = vpop.permute.xlu0 %473 }
 0x250   : > { %8763 = vmatprep.mubr.msk.bf16.mxu0 %vm749_vm1, %v3211_v3  ;;  %12087 = vst [vmem:[#allocation3_spill] sm:$0xff] %v10535_v0  ;;  %v10537_v1 = vpop.permute.xlu1 %478 }
 0x251   : > { %12088 = vst [vmem:[#allocation4_spill] sm:$0xff] %v10537_v1 }
 0x253   : > { %v10539_v2 = vpop.permute.xlu0 %483 }
 0x254   : > { %12089 = vst [vmem:[#allocation5_spill] sm:$0xff] %v10539_v2  ;;  %v10541_v3 = vpop.permute.xlu1 %488 }
 0x255   : > { %12090 = vst [vmem:[#allocation6_spill] sm:$0xff] %v10541_v3 }
 0x257   : > { %8764 = vmatmul.mubr.msk.bf16.vlgmr.msra.gmra.mrb[0].mxu0 %vm749_vm1, %v3212_v8  ;;  %v10543_v4 = vpop.permute.xlu0 %493  ;;  %v10554_v8 = vld [vmem:[%s12007_s2] ss:$0 sm:$0xff] }
 0x258   : > { %8767 = vmatprep.mubr.msk.bf16.mxu0 %vm749_vm1, %v3213_v9  ;;  %12091 = vst [vmem:[#allocation7_spill] sm:$0xff] %v10543_v4  ;;  %v10545_v5 = vpop.permute.xlu1 %498 }
 0x259   : > { %12092 = vst [vmem:[#allocation8_spill] sm:$0xff] %v10545_v5 }
 0x25b   : > { %v10547_v6 = vpop.permute.xlu0 %503 }
 0x25c   : > { %12093 = vst [vmem:[#allocation9_spill] sm:$0xff] %v10547_v6  ;;  %v10549_v7 = vpop.permute.xlu1 %508 }
 0x25d   : > { %12094 = vst [vmem:[#allocation10_spill] sm:$0xff] %v10549_v7 }
 0x25f   : > { %8768 = vmatmul.mubr.msk.bf16.gmra.mrb[4].mxu0 %vm749_vm1, %v3214_v14  ;;  %v10557_v12 = vpop.permute.xlu0 %513 }
 0x260   : > { %8771 = vmatprep.mubr.msk.bf16.mxu0 %vm749_vm1, %v3215_v15  ;;  %12095 = vst [vmem:[#allocation11_spill] sm:$0xff] %v10557_v12  ;;  %v10564_v18 = vpop.permute.xlu1 %518 }
 0x261   : > { %12096 = vst [vmem:[#allocation12_spill] sm:$0xff] %v10564_v18 }
 0x263   : > { %v10580_v25 = vpop.permute.xlu0 %523 }
 0x264   : > { %12097 = vst [vmem:[#allocation13_spill] sm:$0xff] %v10580_v25  ;;  %v10591_v34 = vpop.permute.xlu1 %528 }
 0x265   : > { %12098 = vst [vmem:[#allocation14_spill] sm:$0xff] %v10591_v34 }
 0x267   : > { %8772 = vmatmul.mubr.msk.bf16.gmra.mrb[8].mxu0 %vm749_vm1, %v3216_v20 }
 0x268   : > { %8775 = vmatprep.mubr.msk.bf16.mxu0 %vm749_vm1, %v3217_v21 }
 0x26f   : > { %8776 = vmatmul.mubr.msk.bf16.gmra.mrb[12].mxu0 %vm749_vm1, %v3218_v26 }
 0x270   : > { %8779 = vmatprep.mubr.msk.bf16.mxu0 %vm749_vm1, %v3219_v27 }
 0x277   : > { %8780 = vmatmul.mubr.msk.bf16.gmra.mrb[16].mxu0 %vm749_vm1, %v3220_v32 }
 0x278   : > { %8783 = vmatprep.mubr.msk.bf16.mxu0 %vm749_vm1, %v3221_v33 }
 0x27f   : > { %8784 = vmatmul.mubr.msk.bf16.gmra.mrb[20].mxu0 %vm749_vm1, %v3222_v38 }
 0x280   : > { %8787 = vmatprep.mubr.msk.bf16.mxu0 %vm749_vm1, %v3223_v39 }
 0x287   : > { %8788 = vmatmul.mubr.msk.bf16.gmra.mrb[24].mxu0 %vm749_vm1, %v3224_v44 }
 0x288   : > { %8791 = vmatprep.mubr.msk.bf16.mxu0 %vm749_vm1, %v3225_v45 }
 0x28f   : > { %8792 = vmatmul.mubr.msk.bf16.gmra.mrb[28].mxu0 %vm749_vm1, %v3226_v50 }
 0x290   : > { %8795 = vmatprep.mubr.msk.bf16.mxu0 %vm749_vm1, %v3227_v51  ;;  %v10609_v51 = vpop.permute.xlu0 %533 }
 0x291   : > { %12099 = vst [vmem:[#allocation15_spill] sm:$0xff] %v10609_v51 }
 0x297   : > { %8796 = vmatmul.mubr.msk.bf16.gmra.mrb[32].mxu0 %vm749_vm1, %v3228_v54 }
 0x298   : > { %9159 = vmatprep.mubr.msk.f32.mxu0 %vm9805_vm3, %v12019_v59 }
 0x32a   : > { %v8765_v9 = vpop.f32.mrb[0].mxu0 }
 0x32b   : > { %v3510_v10 = vadd.f32 %v8765_v9, %v10554_v8  ;;  %v3322_v11 = vpop.f32.mrb[1].mxu0 }
 0x32c   : > { %v3508_v13 = vadd.f32 %v10554_v8, %v3322_v11  ;;  %v8766_v14 = vpop.f32.mrb[2].mxu0  ;;  %v10622_v11 = vpop.permute.xlu1 %538 }
 0x32d   : > { %v10561_v15 = vmul.f32 %v3510_v10, %v10529_v61  ;;  %v3511_v16 = vadd.f32 %v8766_v14, %v10554_v8  ;;  %v3325_v17 = vpop.f32.mrb[3].mxu0  ;;  %12100 = vst [vmem:[#allocation16_spill] sm:$0xff] %v10622_v11 }
 0x32e   : > { %v10567_v19 = vmul.f32 %v3508_v13, %v10527_v60  ;;  %v3509_v20 = vadd.f32 %v10554_v8, %v3325_v17 }
 0x32f   : > { %v10573_v22 = vmul.f32 %v3511_v16, %v10533_v63  ;;  %v3659_v24 = vmul.f32 %v10561_v15, %v10561_v15  ;;  %v3583_v30 = vsel %vm631_vm2, %v10561_v15, 0.0 }
 0x330   : > { %v3657_v21 = vmul.f32 %v10567_v19, %v10567_v19  ;;  %v10576_v23 = vmul.f32 %v3509_v20, %v10531_v62  ;;  %v3580_v26 = vsel %vm631_vm2, %v10567_v19, 0.0 }
 0x331   : > { %v3660_v36 = vmul.f32 %v10573_v22, %v10573_v22  ;;  %v3696_v40 = vsel %vm631_vm2, %v3659_v24, 0.0  ;;  %v3585_v45 = vsel %vm631_vm2, %v10573_v22, 0.0 }
 0x332   : > { %v3581_v27 = vsel %vm631_vm2, %v10576_v23, 0.0  ;;  %v3658_v28 = vmul.f32 %v10576_v23, %v10576_v23  ;;  %v8769_v29 = vpop.f32.mrb[4].mxu0  ;;  %v3693_v35 = vsel %vm631_vm2, %v3657_v21, 0.0 }
 0x333   : > { %v3582_v31 = vadd.f32 %v3581_v27, %v3580_v26  ;;  %v3514_v32 = vadd.f32 %v8769_v29, %v10554_v8  ;;  %v3338_v33 = vpop.f32.mrb[5].mxu0  ;;  %v3698_v52 = vsel %vm631_vm2, %v3660_v36, 0.0 }
 0x334   : > { %v3694_v37 = vsel %vm631_vm2, %v3658_v28, 0.0  ;;  %v3512_v38 = vadd.f32 %v10554_v8, %v3338_v33  ;;  %v8770_v39 = vpop.f32.mrb[6].mxu0 }
 0x335   : > { %v3584_v41 = vadd.f32 %v3583_v30, %v3582_v31  ;;  %v3695_v42 = vadd.f32 %v3694_v37, %v3693_v35  ;;  %v3515_v43 = vadd.f32 %v8770_v39, %v10554_v8  ;;  %v3341_v44 = vpop.f32.mrb[7].mxu0  ;;  %v10603_v46 = vmul.f32 %v3514_v32, %v10539_v2  ;;  %v10639_v37 = vpop.permute.xlu0 %543 }
 0x336   : > { %v10606_v47 = vmul.f32 %v3512_v38, %v10535_v0  ;;  %v3513_v48 = vadd.f32 %v10554_v8, %v3341_v44  ;;  %12101 = vst [vmem:[#allocation17_spill] sm:$0xff] %v10639_v37 }
 0x337   : > { %v3697_v49 = vadd.f32 %v3696_v40, %v3695_v42  ;;  %v3586_v50 = vadd.f32 %v3585_v45, %v3584_v41  ;;  %v10620_v10 = vmul.f32 %v3515_v43, %v10541_v3  ;;  %v3663_v13 = vmul.f32 %v10603_v46, %v10603_v46  ;;  %v10651_v45 = vpop.permute.xlu1 %548 }
 0x338   : > { %v3587_v53 = vsel %vm631_vm2, %v10606_v47, 0.0  ;;  %v3661_v54 = vmul.f32 %v10606_v47, %v10606_v47  ;;  %v10617_v55 = vmul.f32 %v3513_v48, %v10537_v1  ;;  %v3591_v28 = vsel %vm631_vm2, %v10603_v46, 0.0  ;;  %12102 = vst [vmem:[#allocation18_spill] sm:$0xff] %v10651_v45 }
 0x339   : > { %v3588_v56 = vadd.f32 %v3587_v53, %v3586_v50  ;;  %v3699_v9 = vadd.f32 %v3698_v52, %v3697_v49  ;;  %v3664_v31 = vmul.f32 %v10620_v10, %v10620_v10  ;;  %v3593_v38 = vsel %vm631_vm2, %v10620_v10, 0.0 }
 0x33a   : > { %v3700_v14 = vsel %vm631_vm2, %v3661_v54, 0.0  ;;  %v3589_v16 = vsel %vm631_vm2, %v10617_v55, 0.0  ;;  %v8773_v17 = vpop.f32.mrb[8].mxu0  ;;  %v3662_v24 = vmul.f32 %v10617_v55, %v10617_v55  ;;  %v3704_v42 = vsel %vm631_vm2, %v3663_v13, 0.0 }
 0x33b   : > { %v3701_v20 = vadd.f32 %v3700_v14, %v3699_v9  ;;  %v3590_v21 = vadd.f32 %v3589_v16, %v3588_v56  ;;  %v3518_v26 = vadd.f32 %v8773_v17, %v10554_v8  ;;  %v3354_v27 = vpop.f32.mrb[9].mxu0  ;;  %v3706_v53 = vsel %vm631_vm2, %v3664_v31, 0.0 }
 0x33c   : > { %v3516_v29 = vadd.f32 %v10554_v8, %v3354_v27  ;;  %v8774_v30 = vpop.f32.mrb[10].mxu0  ;;  %v3702_v33 = vsel %vm631_vm2, %v3662_v24, 0.0  ;;  %v10672_v27 = vpop.permute.xlu0 %553 }
 0x33d   : > { %v3592_v32 = vadd.f32 %v3591_v28, %v3590_v21  ;;  %v3519_v35 = vadd.f32 %v8774_v30, %v10554_v8  ;;  %v3357_v36 = vpop.f32.mrb[11].mxu0  ;;  %v3703_v39 = vadd.f32 %v3702_v33, %v3701_v20  ;;  %v10649_v43 = vmul.f32 %v3518_v26, %v10547_v6  ;;  %12103 = vst [vmem:[#allocation19_spill] sm:$0xff] %v10672_v27 }
 0x33e   : > { %v10644_v40 = vmul.f32 %v3516_v29, %v10543_v4  ;;  %v3517_v41 = vadd.f32 %v10554_v8, %v3357_v36 }
 0x33f   : > { %v3594_v44 = vadd.f32 %v3593_v38, %v3592_v32  ;;  %v3705_v48 = vadd.f32 %v3704_v42, %v3703_v39  ;;  %v10662_v56 = vmul.f32 %v3519_v35, %v10549_v7  ;;  %v3667_v20 = vmul.f32 %v10649_v43, %v10649_v43  ;;  %v10681_v39 = vpop.permute.xlu1 %558 }
 0x340   : > { %v3595_v49 = vsel %vm631_vm2, %v10644_v40, 0.0  ;;  %v3665_v50 = vmul.f32 %v10644_v40, %v10644_v40  ;;  %v10658_v52 = vmul.f32 %v3517_v41, %v10545_v5  ;;  %v3599_v28 = vsel %vm631_vm2, %v10649_v43, 0.0  ;;  %12104 = vst [vmem:[#allocation20_spill] sm:$0xff] %v10681_v39 }
 0x341   : > { %v3596_v54 = vadd.f32 %v3595_v49, %v3594_v44  ;;  %v3707_v9 = vadd.f32 %v3706_v53, %v3705_v48  ;;  %v3668_v33 = vmul.f32 %v10662_v56, %v10662_v56  ;;  %v3601_v41 = vsel %vm631_vm2, %v10662_v56, 0.0 }
 0x342   : > { %v3708_v13 = vsel %vm631_vm2, %v3665_v50, 0.0  ;;  %v3597_v14 = vsel %vm631_vm2, %v10658_v52, 0.0  ;;  %v3666_v16 = vmul.f32 %v10658_v52, %v10658_v52  ;;  %v8777_v17 = vpop.f32.mrb[12].mxu0  ;;  %v3712_v49 = vsel %vm631_vm2, %v3667_v20, 0.0  ;;  %v10704_v20 = vpop.permute.xlu0 %563 }
 0x343   : > { %v3598_v21 = vadd.f32 %v3597_v14, %v3596_v54  ;;  %v3522_v24 = vadd.f32 %v8777_v17, %v10554_v8  ;;  %v3370_v26 = vpop.f32.mrb[13].mxu0  ;;  %v3709_v29 = vadd.f32 %v3708_v13, %v3707_v9  ;;  %12105 = vst [vmem:[#allocation21_spill] sm:$0xff] %v10704_v20 }
 0x344   : > { %v3710_v30 = vsel %vm631_vm2, %v3666_v16, 0.0  ;;  %v3520_v31 = vadd.f32 %v10554_v8, %v3370_v26  ;;  %v8778_v32 = vpop.f32.mrb[14].mxu0  ;;  %v3714_v16 = vsel %vm631_vm2, %v3668_v33, 0.0 }
 0x345   : > { %v3600_v35 = vadd.f32 %v3599_v28, %v3598_v21  ;;  %v3523_v36 = vadd.f32 %v8778_v32, %v10554_v8  ;;  %v3373_v38 = vpop.f32.mrb[15].mxu0  ;;  %v3711_v42 = vadd.f32 %v3710_v30, %v3709_v29  ;;  %v10691_v50 = vmul.f32 %v3522_v24, %v10580_v25 }
 0x346   : > { %v10686_v44 = vmul.f32 %v3520_v31, %v10557_v12  ;;  %v3521_v48 = vadd.f32 %v10554_v8, %v3373_v38 }
 0x347   : > { %v3602_v53 = vadd.f32 %v3601_v41, %v3600_v35  ;;  %v3713_v54 = vadd.f32 %v3712_v49, %v3711_v42  ;;  %v10702_v21 = vmul.f32 %v3523_v36, %v10591_v34  ;;  %v3671_v31 = vmul.f32 %v10691_v50, %v10691_v50  ;;  %v10714_v36 = vpop.permute.xlu1 %568 }
 0x348   : > { %v3603_v9 = vsel %vm631_vm2, %v10686_v44, 0.0  ;;  %v3669_v13 = vmul.f32 %v10686_v44, %v10686_v44  ;;  %v10698_v14 = vmul.f32 %v3521_v48, %v10564_v18  ;;  %12106 = vst [vmem:[#allocation22_spill] sm:$0xff] %v10714_v36  ;;  %v3607_v38 = vsel %vm631_vm2, %v10691_v50, 0.0 }
 0x349   : > { %v3604_v17 = vadd.f32 %v3603_v9, %v3602_v53  ;;  %v3715_v24 = vadd.f32 %v3714_v16, %v3713_v54  ;;  %v3672_v53 = vmul.f32 %v10702_v21, %v10702_v21  ;;  %v3609_v16 = vsel %vm631_vm2, %v10702_v21, 0.0 }
 0x34a   : > { %v3716_v26 = vsel %vm631_vm2, %v3669_v13, 0.0  ;;  %v3605_v28 = vsel %vm631_vm2, %v10698_v14, 0.0  ;;  %v3670_v29 = vmul.f32 %v10698_v14, %v10698_v14  ;;  %v8781_v30 = vpop.f32.mrb[16].mxu0 }
 0x34b   : > { %v3606_v32 = vadd.f32 %v3605_v28, %v3604_v17  ;;  %v3526_v33 = vadd.f32 %v8781_v30, %v10554_v8  ;;  %v3386_v35 = vpop.f32.mrb[17].mxu0  ;;  %v3717_v41 = vadd.f32 %v3716_v26, %v3715_v24  ;;  %v3720_v26 = vsel %vm631_vm2, %v3671_v31, 0.0 }
 0x34c   : > { %v3718_v42 = vsel %vm631_vm2, %v3670_v29, 0.0  ;;  %v3524_v48 = vadd.f32 %v10554_v8, %v3386_v35  ;;  %v8782_v49 = vpop.f32.mrb[18].mxu0  ;;  %v10733_v35 = vpop.permute.xlu0 %573 }
 0x34d   : > { %v3608_v54 = vadd.f32 %v3607_v38, %v3606_v32  ;;  %v3527_v9 = vadd.f32 %v8782_v49, %v10554_v8  ;;  %v3389_v13 = vpop.f32.mrb[19].mxu0  ;;  %v3719_v17 = vadd.f32 %v3718_v42, %v3717_v41  ;;  %v10731_v29 = vmul.f32 %v3526_v33, %v10639_v37  ;;  %12107 = vst [vmem:[#allocation23_spill] sm:$0xff] %v10733_v35  ;;  %v10746_v33 = vpop.permute.xlu1 %578 }
 0x34e   : > { %v10726_v28 = vmul.f32 %v3524_v48, %v10609_v51  ;;  %v3525_v24 = vadd.f32 %v10554_v8, %v3389_v13  ;;  %v3722_v48 = vsel %vm631_vm2, %v3672_v53, 0.0  ;;  %12108 = vst [vmem:[#allocation24_spill] sm:$0xff] %v10746_v33 }
 0x34f   : > { %v3610_v30 = vadd.f32 %v3609_v16, %v3608_v54  ;;  %v3721_v32 = vadd.f32 %v3720_v26, %v3719_v17  ;;  %v10744_v31 = vmul.f32 %v3527_v9, %v10651_v45 }
 0x350   : > { %v3611_v38 = vsel %vm631_vm2, %v10726_v28, 0.0  ;;  %v3673_v41 = vmul.f32 %v10726_v28, %v10726_v28  ;;  %v10740_v42 = vmul.f32 %v3525_v24, %v10622_v11  ;;  %v3675_v24 = vmul.f32 %v10731_v29, %v10731_v29 }
 0x351   : > { %v3612_v49 = vadd.f32 %v3611_v38, %v3610_v30  ;;  %v3723_v54 = vadd.f32 %v3722_v48, %v3721_v32  ;;  %v3615_v38 = vsel %vm631_vm2, %v10731_v29, 0.0  ;;  %v3676_v59 = vmul.f32 %v10744_v31, %v10744_v31 }
 0x352   : > { %v3724_v13 = vsel %vm631_vm2, %v3673_v41, 0.0  ;;  %v3613_v16 = vsel %vm631_vm2, %v10740_v42, 0.0  ;;  %v3674_v17 = vmul.f32 %v10740_v42, %v10740_v42  ;;  %v8785_v26 = vpop.f32.mrb[20].mxu0 }
 0x353   : > { %v3614_v53 = vadd.f32 %v3613_v16, %v3612_v49  ;;  %v3530_v30 = vadd.f32 %v8785_v26, %v10554_v8  ;;  %v3402_v9 = vpop.f32.mrb[21].mxu0  ;;  %v3725_v32 = vadd.f32 %v3724_v13, %v3723_v54  ;;  %v10763_v49 = vpop.permute.xlu0 %583  ;;  %v3617_v16 = vsel %vm631_vm2, %v10744_v31, 0.0 }
 0x354   : > { %v3726_v41 = vsel %vm631_vm2, %v3674_v17, 0.0  ;;  %v3528_v48 = vadd.f32 %v10554_v8, %v3402_v9  ;;  %v8786_v57 = vpop.f32.mrb[22].mxu0  ;;  %12109 = vst [vmem:[#allocation25_spill] sm:$0xff] %v10763_v49  ;;  %v3728_v17 = vsel %vm631_vm2, %v3675_v24, 0.0 }
 0x355   : > { %v3616_v45 = vadd.f32 %v3615_v38, %v3614_v53  ;;  %v3531_v37 = vadd.f32 %v8786_v57, %v10554_v8  ;;  %v3405_v11 = vpop.f32.mrb[23].mxu0  ;;  %v3727_v26 = vadd.f32 %v3726_v41, %v3725_v32  ;;  %v10773_v9 = vmul.f32 %v3530_v30, %v10704_v20  ;;  %v10775_v38 = vpop.permute.xlu1 %588 }
 0x356   : > { %v10768_v54 = vmul.f32 %v3528_v48, %v10672_v27  ;;  %v3529_v13 = vadd.f32 %v10554_v8, %v3405_v11  ;;  %12110 = vst [vmem:[#allocation26_spill] sm:$0xff] %v10775_v38  ;;  %v3730_v11 = vsel %vm631_vm2, %v3676_v59, 0.0 }
 0x357   : > { %v3618_v53 = vadd.f32 %v3617_v16, %v3616_v45  ;;  %v3729_v57 = vadd.f32 %v3728_v17, %v3727_v26  ;;  %v10786_v24 = vmul.f32 %v3531_v37, %v10714_v36  ;;  %v3623_v37 = vsel %vm631_vm2, %v10773_v9, 0.0 }
 0x358   : > { %v3619_v51 = vsel %vm631_vm2, %v10768_v54, 0.0  ;;  %v3677_v32 = vmul.f32 %v10768_v54, %v10768_v54  ;;  %v10782_v41 = vmul.f32 %v3529_v13, %v10681_v39  ;;  %v3679_v13 = vmul.f32 %v10773_v9, %v10773_v9 }
 0x359   : > { %v3620_v48 = vadd.f32 %v3619_v51, %v3618_v53  ;;  %v3731_v30 = vadd.f32 %v3730_v11, %v3729_v57  ;;  %v10796_v53 = vpop.permute.xlu0 %593  ;;  %v3680_v39 = vmul.f32 %v10786_v24, %v10786_v24  ;;  %v3625_v34 = vsel %vm631_vm2, %v10786_v24, 0.0 }
 0x35a   : > { %v3732_v45 = vsel %vm631_vm2, %v3677_v32, 0.0  ;;  %v3621_v16 = vsel %vm631_vm2, %v10782_v41, 0.0  ;;  %v3678_v26 = vmul.f32 %v10782_v41, %v10782_v41  ;;  %v8789_v17 = vpop.f32.mrb[24].mxu0  ;;  %12111 = vst [vmem:[#allocation27_spill] sm:$0xff] %v10796_v53 }
 0x35b   : > { %v3622_v20 = vadd.f32 %v3621_v16, %v3620_v48  ;;  %v3534_v59 = vadd.f32 %v8789_v17, %v10554_v8  ;;  %v3418_v51 = vpop.f32.mrb[25].mxu0  ;;  %v3733_v57 = vadd.f32 %v3732_v45, %v3731_v30  ;;  %v10805_v17 = vpop.permute.xlu1 %598 }
 0x35c   : > { %v3734_v32 = vsel %vm631_vm2, %v3678_v26, 0.0  ;;  %v3532_v11 = vadd.f32 %v10554_v8, %v3418_v51  ;;  %v8790_v36 = vpop.f32.mrb[26].mxu0  ;;  %12112 = vst [vmem:[#allocation28_spill] sm:$0xff] %v10805_v17  ;;  %v3736_v26 = vsel %vm631_vm2, %v3679_v13, 0.0 }
 0x35d   : > { %v3624_v27 = vadd.f32 %v3623_v37, %v3622_v20  ;;  %v3535_v48 = vadd.f32 %v8790_v36, %v10554_v8  ;;  %v3421_v16 = vpop.f32.mrb[27].mxu0  ;;  %v3735_v25 = vadd.f32 %v3734_v32, %v3733_v57  ;;  %v10815_v51 = vmul.f32 %v3534_v59, %v10763_v49  ;;  %v10828_v13 = vpop.permute.xlu0 %603 }
 0x35e   : > { %v10810_v30 = vmul.f32 %v3532_v11, %v10733_v35  ;;  %v3533_v45 = vadd.f32 %v10554_v8, %v3421_v16  ;;  %v3738_v32 = vsel %vm631_vm2, %v3680_v39, 0.0  ;;  %12113 = vst [vmem:[#allocation29_spill] sm:$0xff] %v10828_v13 }
 0x35f   : > { %v3626_v20 = vadd.f32 %v3625_v34, %v3624_v27  ;;  %v3737_v37 = vadd.f32 %v3736_v26, %v3735_v25  ;;  %v10826_v16 = vmul.f32 %v3535_v48, %v10775_v38 }
 0x360   : > { %v3627_v36 = vsel %vm631_vm2, %v10810_v30, 0.0  ;;  %v3681_v18 = vmul.f32 %v10810_v30, %v10810_v30  ;;  %v10822_v57 = vmul.f32 %v3533_v45, %v10746_v33  ;;  %v3683_v45 = vmul.f32 %v10815_v51, %v10815_v51 }
 0x361   : > { %v3628_v11 = vadd.f32 %v3627_v36, %v3626_v20  ;;  %v3739_v59 = vadd.f32 %v3738_v32, %v3737_v37  ;;  %v10838_v36 = vpop.permute.xlu1 %608  ;;  %v3631_v37 = vsel %vm631_vm2, %v10815_v51, 0.0  ;;  %v3684_v33 = vmul.f32 %v10826_v16, %v10826_v16  ;;  %v10857_v6 = vpop.permute.xlu0 %613 }
 0x362   : > { %v3740_v25 = vsel %vm631_vm2, %v3681_v18, 0.0  ;;  %v3629_v34 = vsel %vm631_vm2, %v10822_v57, 0.0  ;;  %v3682_v27 = vmul.f32 %v10822_v57, %v10822_v57  ;;  %v8793_v26 = vpop.f32.mrb[28].mxu0  ;;  %12114 = vst [vmem:[#allocation30_spill] sm:$0xff] %v10838_v36  ;;  %12115 = vst [vmem:[#allocation31_spill] sm:$0xff] %v10857_v6 }
 0x363   : > { %v3630_v39 = vadd.f32 %v3629_v34, %v3628_v11  ;;  %v3538_v20 = vadd.f32 %v8793_v26, %v10554_v8  ;;  %v3434_v48 = vpop.f32.mrb[29].mxu0  ;;  %v3741_v18 = vadd.f32 %v3740_v25, %v3739_v59  ;;  %v3633_v26 = vsel %vm631_vm2, %v10826_v16, 0.0 }
 0x364   : > { %v3742_v32 = vsel %vm631_vm2, %v3682_v27, 0.0  ;;  %v3536_v38 = vadd.f32 %v10554_v8, %v3434_v48  ;;  %v8794_v49 = vpop.f32.mrb[30].mxu0  ;;  %v3744_v25 = vsel %vm631_vm2, %v3683_v45, 0.0 }
 0x365   : > { %v3632_v35 = vadd.f32 %v3631_v37, %v3630_v39  ;;  %v3539_v11 = vadd.f32 %v8794_v49, %v10554_v8  ;;  %v3437_v34 = vpop.f32.mrb[31].mxu0  ;;  %v3743_v12 = vadd.f32 %v3742_v32, %v3741_v18  ;;  %v10855_v27 = vmul.f32 %v3538_v20, %v10828_v13  ;;  %v10870_v20 = vpop.permute.xlu1 %618 }
 0x366   : > { %v10850_v7 = vmul.f32 %v3536_v38, %v10796_v53  ;;  %v3537_v59 = vadd.f32 %v10554_v8, %v3437_v34  ;;  %v3746_v18 = vsel %vm631_vm2, %v3684_v33, 0.0  ;;  %12116 = vst [vmem:[#allocation32_spill] sm:$0xff] %v10870_v20 }
 0x367   : > { %v3634_v48 = vadd.f32 %v3633_v26, %v3632_v35  ;;  %v3745_v39 = vadd.f32 %v3744_v25, %v3743_v12  ;;  %v10868_v45 = vmul.f32 %v3539_v11, %v10838_v36 }
 0x368   : > { %v3635_v49 = vsel %vm631_vm2, %v10850_v7, 0.0  ;;  %v3685_v37 = vmul.f32 %v10850_v7, %v10850_v7  ;;  %v10864_v38 = vmul.f32 %v3537_v59, %v10805_v17  ;;  %v3687_v59 = vmul.f32 %v10855_v27, %v10855_v27 }
 0x369   : > { %v3636_v32 = vadd.f32 %v3635_v49, %v3634_v48  ;;  %v3747_v35 = vadd.f32 %v3746_v18, %v3745_v39  ;;  %v3639_v49 = vsel %vm631_vm2, %v10855_v27, 0.0  ;;  %v3688_v13 = vmul.f32 %v10868_v45, %v10868_v45 }
 0x36a   : > { %v3748_v12 = vsel %vm631_vm2, %v3685_v37, 0.0  ;;  %v3637_v34 = vsel %vm631_vm2, %v10864_v38, 0.0  ;;  %v3686_v26 = vmul.f32 %v10864_v38, %v10864_v38  ;;  %v8797_v25 = vpop.f32.mrb[32].mxu0 }
 0x36b   : > { %v3638_v33 = vadd.f32 %v3637_v34, %v3636_v32  ;;  %v3542_v48 = vadd.f32 %v8797_v25, %v10554_v8  ;;  %v3450_v11 = vpop.f32.mrb[33].mxu0  ;;  %v3749_v39 = vadd.f32 %v3748_v12, %v3747_v35  ;;  %v10887_v32 = vpop.permute.xlu0 %623  ;;  %v3641_v34 = vsel %vm631_vm2, %v10868_v45, 0.0 }
 0x36c   : > { %v3750_v37 = vsel %vm631_vm2, %v3686_v26, 0.0  ;;  %v3540_v18 = vadd.f32 %v10554_v8, %v3450_v11  ;;  %v8798_v36 = vpop.f32.mrb[34].mxu0  ;;  %12117 = vst [vmem:[#allocation33_spill] sm:$0xff] %v10887_v32  ;;  %v3752_v26 = vsel %vm631_vm2, %v3687_v59, 0.0 }
 0x36d   : > { %v3640_v17 = vadd.f32 %v3639_v49, %v3638_v33  ;;  %v3543_v53 = vadd.f32 %v8798_v36, %v10554_v8  ;;  %v3453_v5 = vpop.f32.mrb[35].mxu0  ;;  %v3751_v25 = vadd.f32 %v3750_v37, %v3749_v39  ;;  %v10897_v11 = vmul.f32 %v3542_v48, %v10887_v32  ;;  %v10899_v49 = vpop.permute.xlu1 %628 }
 0x36e   : > { %v10892_v35 = vmul.f32 %v3540_v18, %v10857_v6  ;;  %v3541_v12 = vadd.f32 %v10554_v8, %v3453_v5  ;;  %12118 = vst [vmem:[#allocation34_spill] sm:$0xff] %v10899_v49  ;;  %v3754_v5 = vsel %vm631_vm2, %v3688_v13, 0.0 }
 0x36f   : > { %v3642_v33 = vadd.f32 %v3641_v34, %v3640_v17  ;;  %v3753_v36 = vadd.f32 %v3752_v26, %v3751_v25  ;;  %v10910_v59 = vmul.f32 %v3543_v53, %v10899_v49  ;;  %v3691_v25 = vmul.f32 %v10897_v11, %v10897_v11 }
 0x370   : > { %v3643_v4 = vsel %vm631_vm2, %v10892_v35, 0.0  ;;  %v3689_v39 = vmul.f32 %v10892_v35, %v10892_v35  ;;  %v10906_v37 = vmul.f32 %v3541_v12, %v10870_v20  ;;  %v3647_v13 = vsel %vm631_vm2, %v10897_v11, 0.0 }
 0x371   : > { %v3644_v8 = vadd.f32 %v3643_v4, %v3642_v33  ;;  %v3755_v48 = vadd.f32 %v3754_v5, %v3753_v36  ;;  %v3692_v26 = vmul.f32 %v10910_v59, %v10910_v59  ;;  %v3649_v36 = vsel %vm631_vm2, %v10910_v59, 0.0 }
 0x372   : > { %v3756_v17 = vsel %vm631_vm2, %v3689_v39, 0.0  ;;  %v3645_v18 = vsel %vm631_vm2, %v10906_v37, 0.0  ;;  %v3690_v34 = vmul.f32 %v10906_v37, %v10906_v37  ;;  %v3760_v5 = vsel %vm631_vm2, %v3691_v25, 0.0 }
 0x373   : > { %v3646_v12 = vadd.f32 %v3645_v18, %v3644_v8  ;;  %v3757_v4 = vadd.f32 %v3756_v17, %v3755_v48  ;;  %v3762_v8 = vsel %vm631_vm2, %v3692_v26, 0.0  ;;  %v12119_v25 = vmov 0.0  }
 0x374   : > { %v3758_v53 = vsel %vm631_vm2, %v3690_v34, 0.0 }
 0x375   : > { %v3648_v33 = vadd.f32 %v3647_v13, %v3646_v12  ;;  %v3759_v39 = vadd.f32 %v3758_v53, %v3757_v4  ;;  %v3924_v53 = vlaneseq }
 0x377   : > { %v3650_v49 = vadd.f32 %v3649_v36, %v3648_v33  ;;  %v3761_v32 = vadd.f32 %v3760_v5, %v3759_v39  ;;  %v3925_v33 = vshrl.u32 %v3924_v53, 7 }
 0x379   : > { %v3651_v18 = vrot.slane %v3650_v49, 4  ;;  %v3763_v20 = vadd.f32 %v3762_v8, %v3761_v32  ;;  %v4214_v32 = vld [vmem:[#allocation2 + $0xe] sm:$0xff]  ;;  %v10943_v8 = vsub.s32 0, %v3925_v33 }
 0x37b   : > { %v3652_v6 = vadd.f32 %v3651_v18, %v3650_v49  ;;  %v3764_v48 = vrot.slane %v3763_v20, 4  ;;  %12120 = vst [vmem:[#allocation35_spill] sm:$0xff] %v10943_v8 }
 0x37d   : > { %v3653_v17 = vrot.slane %v3652_v6, 2  ;;  %v3765_v34 = vadd.f32 %v3764_v48, %v3763_v20  ;;  %v9782_v20 = vld [vmem:[%s12011_s6 + $0x8] sm:$0xff]  }
 0x37f   : > { %v3654_v3 = vadd.f32 %v3653_v17, %v3652_v6  ;;  %v3766_v2 = vrot.slane %v3765_v34, 2  ;;  %v4213_v6 = vld [vmem:[#allocation2 + $0x6] sm:$0xff] }
 0x380   : > { %v4249_v49 = vpack.c.bf16 %v4214_v32, %v4213_v6 }
 0x381   : > { %v3655_v1 = vrot.slane %v3654_v3, 1  ;;  %v3767_v12 = vadd.f32 %v3766_v2, %v3765_v34 }
 0x383   : > { %v3656_v13 = vadd.f32 %v3655_v1, %v3654_v3  ;;  %v3768_v0 = vrot.slane %v3767_v12, 1  ;;  %v10939_v1 = vld [vmem:[%s12011_s6] sm:$0xff]  }
 0x385   : > { %8804 = vmatmul.mubr.msk.f32.vlgmr.msra.gmra.mrb[0].mxu1 %vm631_vm2, %v3656_v13  ;;  %v3769_v4 = vadd.f32 %v3768_v0, %v3767_v12 }
 0x386   : > { %9174 = vmatpush3.bf16.msra.mxu1 %v10506_v58  ;;  %8810 = vmatprep.mubr.msk.f32.mxu1 %vm9805_vm3, %v12119_v25 }
 0x387   : > { %8813 = vmatprep.subr.bf16.mxu1 %v9782_v20 }
 0x389   : > { %8811 = vmatmul.mubr.msk.f32.vlgmr.msra.gmra.mrb[2].mxu1 %vm631_vm2, %v3769_v4 }
 0x38a   : > { %8814 = vmatpush3.bf16.msra.mxu1 %v9782_v20  ;;  %8815 = vmatprep.mubr.msk.bf16.mxu1 %vm631_vm2, %v4249_v49 }
 0x38b   : > { %8851 = vmatprep.subr.bf16.mxu1 %v10939_v1 }
 0x458   : > { %v3841_v58 = vpop.f32.mrb[0].mxu1 }
 0x459   : > { %v8805_v0 = vpop.f32.mrb[1].mxu1  ;;  %v3845_v26 = vmul.f32 0.001953125, %v3841_v58 }
 0x45b   : > { %v3920_v36 = vmul.f32 %v3845_v26, %v3845_v26  ;;  %v10946_v48 = vrot.slane %v3845_v26, %v10943_v8 }
 0x45c   : > { %v3915_v2 = vpop.f32.mrb[2].mxu1 }
 0x45d   : > { %v8812_v3 = vpop.f32.mrb[3].mxu1  ;;  %v3919_v39 = vmul.f32 0.001953125, %v3915_v2  ;;  %v3928_v17 = vsub.f32 %v10567_v19, %v10946_v48  ;;  %v3929_v34 = vsub.f32 %v10576_v23, %v10946_v48  ;;  %v3930_v12 = vsub.f32 %v10561_v15, %v10946_v48 }
 0x45e   : > { %v3931_v13 = vsub.f32 %v10573_v22, %v10946_v48  ;;  %v3932_v4 = vsub.f32 %v10606_v47, %v10946_v48  ;;  %v3933_v20 = vsub.f32 %v10617_v55, %v10946_v48  ;;  %v3934_v6 = vsub.f32 %v10603_v46, %v10946_v48 }
 0x45f   : > { %v3921_v5 = vsub.f32 %v3919_v39, %v3920_v36  ;;  %v3935_v19 = vsub.f32 %v10620_v10, %v10946_v48  ;;  %v3936_v23 = vsub.f32 %v10644_v40, %v10946_v48  ;;  %v3937_v15 = vsub.f32 %v10658_v52, %v10946_v48  ;;  %v3964_v10 = vld [vmem:[%s12008_s3] sm:$0x1] }
 0x460   : > { %v3938_v22 = vsub.f32 %v10649_v43, %v10946_v48  ;;  %v3939_v47 = vsub.f32 %v10662_v56, %v10946_v48  ;;  %v3940_v55 = vsub.f32 %v10686_v44, %v10946_v48  ;;  %v3941_v46 = vsub.f32 %v10698_v14, %v10946_v48 }
 0x461   : > { %v3922_v18 = vadd.f32 1e-05, %v3921_v5  ;;  %v3942_v40 = vsub.f32 %v10691_v50, %v10946_v48  ;;  %v3943_v52 = vsub.f32 %v10702_v21, %v10946_v48  ;;  %v3944_v43 = vsub.f32 %v10726_v28, %v10946_v48 }
 0x462   : > { %v3945_v56 = vsub.f32 %v10740_v42, %v10946_v48  ;;  %v3946_v14 = vsub.f32 %v10731_v29, %v10946_v48  ;;  %v3947_v32 = vsub.f32 %v10744_v31, %v10946_v48  ;;  %v3948_v49 = vsub.f32 %v10768_v54, %v10946_v48 }
 0x463   : > { %9791 = vrsqrt.f32 %v3922_v18  ;;  %v3949_v50 = vsub.f32 %v10782_v41, %v10946_v48  ;;  %v3950_v21 = vsub.f32 %v10773_v9, %v10946_v48  ;;  %v3951_v28 = vsub.f32 %v10786_v24, %v10946_v48 }
 0x464   : > { %v3952_v42 = vsub.f32 %v10810_v30, %v10946_v48  ;;  %v3953_v29 = vsub.f32 %v10822_v57, %v10946_v48  ;;  %v3954_v31 = vsub.f32 %v10815_v51, %v10946_v48  ;;  %v3955_v54 = vsub.f32 %v10826_v16, %v10946_v48 }
 0x465   : > { %v3956_v41 = vsub.f32 %v10850_v7, %v10946_v48  ;;  %v3957_v9 = vsub.f32 %v10864_v38, %v10946_v48  ;;  %v3958_v24 = vsub.f32 %v10855_v27, %v10946_v48  ;;  %v3959_v30 = vsub.f32 %v10868_v45, %v10946_v48 }
 0x466   : > { %v3960_v51 = vsub.f32 %v10892_v35, %v10946_v48  ;;  %v3961_v16 = vsub.f32 %v10906_v37, %v10946_v48  ;;  %v3962_v7 = vsub.f32 %v10897_v11, %v10946_v48  ;;  %v3963_v38 = vsub.f32 %v10910_v59, %v10946_v48 }
 0x46d   : > { %v9792_v44 = vpop.eup %9791 }
 0x46e   : > { %v3965_v58 = vmul.f32 %v9792_v44, %v3964_v10 }
 0x470   : > { %v3969_v57 = vrot.slane %v3965_v58, %v10943_v8 }
 0x472   : > { %v3970_v0 = vmul.f32 %v3969_v57, %v3928_v17  ;;  %v3971_v2 = vmul.f32 %v3969_v57, %v3929_v34  ;;  %v3972_v27 = vmul.f32 %v3969_v57, %v3930_v12  ;;  %v3973_v3 = vmul.f32 %v3969_v57, %v3931_v13  ;;  %v7909_v13 = vld [vmem:[%s12009_s4] ss:$0 sm:$0xff] }
 0x473   : > { %v3974_v53 = vmul.f32 %v3969_v57, %v3932_v4  ;;  %v3975_v45 = vmul.f32 %v3969_v57, %v3933_v20  ;;  %v3976_v26 = vmul.f32 %v3969_v57, %v3934_v6  ;;  %v3977_v33 = vmul.f32 %v3969_v57, %v3935_v19 }
 0x474   : > { %v3978_v36 = vmul.f32 %v3969_v57, %v3936_v23  ;;  %v3979_v39 = vmul.f32 %v3969_v57, %v3937_v15  ;;  %v3980_v35 = vmul.f32 %v3969_v57, %v3938_v22  ;;  %v3981_v5 = vmul.f32 %v3969_v57, %v3939_v47 }
 0x475   : > { %v3982_v18 = vmul.f32 %v3969_v57, %v3940_v55  ;;  %v3983_v37 = vmul.f32 %v3969_v57, %v3941_v46  ;;  %v3984_v10 = vmul.f32 %v3969_v57, %v3942_v40  ;;  %v3985_v44 = vmul.f32 %v3969_v57, %v3943_v52 }
 0x476   : > { %v3986_v11 = vmul.f32 %v3969_v57, %v3944_v43  ;;  %v3987_v58 = vmul.f32 %v3969_v57, %v3945_v56  ;;  %v3988_v8 = vmul.f32 %v3969_v57, %v3946_v14  ;;  %v3989_v59 = vmul.f32 %v3969_v57, %v3947_v32 }
 0x477   : > { %v3990_v48 = vmul.f32 %v3969_v57, %v3948_v49  ;;  %v3991_v17 = vmul.f32 %v3969_v57, %v3949_v50  ;;  %v3992_v34 = vmul.f32 %v3969_v57, %v3950_v21  ;;  %v3993_v12 = vmul.f32 %v3969_v57, %v3951_v28 }
 0x478   : > { %v3994_v4 = vmul.f32 %v3969_v57, %v3952_v42  ;;  %v3995_v20 = vmul.f32 %v3969_v57, %v3953_v29  ;;  %v3996_v6 = vmul.f32 %v3969_v57, %v3954_v31  ;;  %v3997_v19 = vmul.f32 %v3969_v57, %v3955_v54 }
 0x479   : > { %v3998_v23 = vmul.f32 %v3969_v57, %v3956_v41  ;;  %v3999_v15 = vmul.f32 %v3969_v57, %v3957_v9  ;;  %v4000_v22 = vmul.f32 %v3969_v57, %v3958_v24  ;;  %v4001_v47 = vmul.f32 %v3969_v57, %v3959_v30 }
 0x47a   : > { %v4002_v55 = vmul.f32 %v3969_v57, %v3960_v51  ;;  %v4003_v46 = vmul.f32 %v3969_v57, %v3961_v16  ;;  %v4004_v40 = vmul.f32 %v3969_v57, %v3962_v7  ;;  %v4005_v52 = vmul.f32 %v3969_v57, %v3963_v38 }
 0x47b   : > { %v11027_v43 = vadd.f32 %v7909_v13, %v3970_v0  ;;  %v11029_v56 = vadd.f32 %v7909_v13, %v3971_v2  ;;  %v11031_v14 = vadd.f32 %v7909_v13, %v3972_v27  ;;  %v11033_v32 = vadd.f32 %v7909_v13, %v3973_v3 }
 0x47c   : > { %v11035_v49 = vadd.f32 %v7909_v13, %v3974_v53  ;;  %v11037_v50 = vadd.f32 %v7909_v13, %v3975_v45  ;;  %v11039_v21 = vadd.f32 %v7909_v13, %v3976_v26  ;;  %v11041_v28 = vadd.f32 %v7909_v13, %v3977_v33 }
 0x47d   : > { %v11043_v42 = vadd.f32 %v7909_v13, %v3978_v36  ;;  %v11045_v29 = vadd.f32 %v7909_v13, %v3979_v39  ;;  %v11047_v31 = vadd.f32 %v7909_v13, %v3980_v35  ;;  %v11049_v54 = vadd.f32 %v7909_v13, %v3981_v5 }
 0x47e   : > { %v11051_v41 = vadd.f32 %v7909_v13, %v3982_v18  ;;  %v11053_v9 = vadd.f32 %v7909_v13, %v3983_v37  ;;  %v11055_v24 = vadd.f32 %v7909_v13, %v3984_v10  ;;  %v11057_v30 = vadd.f32 %v7909_v13, %v3985_v44 }
 0x47f   : > { %v11059_v57 = vadd.f32 %v7909_v13, %v3986_v11  ;;  %v11061_v51 = vadd.f32 %v7909_v13, %v3987_v58  ;;  %v11063_v16 = vadd.f32 %v7909_v13, %v3988_v8  ;;  %v11065_v7 = vadd.f32 %v7909_v13, %v3989_v59 }
 0x480   : > { %v11067_v38 = vadd.f32 %v7909_v13, %v3990_v48  ;;  %v11069_v0 = vadd.f32 %v7909_v13, %v3991_v17  ;;  %v11071_v2 = vadd.f32 %v7909_v13, %v3992_v34  ;;  %v11073_v27 = vadd.f32 %v7909_v13, %v3993_v12 }
 0x481   : > { %v11075_v3 = vadd.f32 %v7909_v13, %v3994_v4  ;;  %v11077_v53 = vadd.f32 %v7909_v13, %v3995_v20  ;;  %v11079_v45 = vadd.f32 %v7909_v13, %v3996_v6  ;;  %v11081_v26 = vadd.f32 %v7909_v13, %v3997_v19 }
 0x482   : > { %v11083_v8 = vadd.f32 %v7909_v13, %v3998_v23  ;;  %v11085_v33 = vadd.f32 %v7909_v13, %v3999_v15  ;;  %v11087_v36 = vadd.f32 %v7909_v13, %v4000_v22  ;;  %v11089_v39 = vadd.f32 %v7909_v13, %v4001_v47 }
 0x483   : > { %v11091_v35 = vadd.f32 %v7909_v13, %v4002_v55  ;;  %v11093_v5 = vadd.f32 %v7909_v13, %v4003_v46  ;;  %v11095_v18 = vadd.f32 %v7909_v13, %v4004_v40  ;;  %v11097_v37 = vadd.f32 %v7909_v13, %v4005_v52 }
 0x484   : > { %v4049_v10 = vmax.f32 %v11027_v43, 0.0  ;;  %v4050_v44 = vmax.f32 %v11029_v56, 0.0  ;;  %v4051_v11 = vmax.f32 %v11031_v14, 0.0  ;;  %v4052_v58 = vmax.f32 %v11033_v32, 0.0 }
 0x485   : > { %v4053_v59 = vmax.f32 %v11035_v49, 0.0  ;;  %v4054_v48 = vmax.f32 %v11037_v50, 0.0  ;;  %v4055_v17 = vmax.f32 %v11039_v21, 0.0  ;;  %v4056_v34 = vmax.f32 %v11041_v28, 0.0 }
 0x486   : > { %v4057_v12 = vmax.f32 %v11043_v42, 0.0  ;;  %v4058_v13 = vmax.f32 %v11045_v29, 0.0  ;;  %v4059_v4 = vmax.f32 %v11047_v31, 0.0  ;;  %v4060_v20 = vmax.f32 %v11049_v54, 0.0 }
 0x487   : > { %v4061_v6 = vmax.f32 %v11051_v41, 0.0  ;;  %v4062_v19 = vmax.f32 %v11053_v9, 0.0  ;;  %v4063_v23 = vmax.f32 %v11055_v24, 0.0  ;;  %v4064_v15 = vmax.f32 %v11057_v30, 0.0 }
 0x488   : > { %v4065_v22 = vmax.f32 %v11059_v57, 0.0  ;;  %v4066_v47 = vmax.f32 %v11061_v51, 0.0  ;;  %v4067_v55 = vmax.f32 %v11063_v16, 0.0  ;;  %v4068_v46 = vmax.f32 %v11065_v7, 0.0  ;;  %v12121_v16 = vld [vmem:[#allocation3_spill] sm:$0xff] }
 0x489   : > { %v4069_v40 = vmax.f32 %v11067_v38, 0.0  ;;  %v4070_v52 = vmax.f32 %v11069_v0, 0.0  ;;  %v4071_v43 = vmax.f32 %v11071_v2, 0.0  ;;  %v4072_v56 = vmax.f32 %v11073_v27, 0.0  ;;  %v12122_v38 = vld [vmem:[#allocation4_spill] sm:$0xff]  ;;  %v12123_v2 = vld [vmem:[#allocation5_spill] sm:$0xff] }
 0x48a   : > { %v4073_v14 = vmax.f32 %v11075_v3, 0.0  ;;  %v4074_v32 = vmax.f32 %v11077_v53, 0.0  ;;  %v4075_v49 = vmax.f32 %v11079_v45, 0.0  ;;  %v4076_v50 = vmax.f32 %v11081_v26, 0.0  ;;  %v12124_v3 = vld [vmem:[#allocation6_spill] sm:$0xff]  ;;  %v12125_v45 = vld [vmem:[#allocation7_spill] sm:$0xff] }
 0x48b   : > { %v4077_v21 = vmax.f32 %v11083_v8, 0.0  ;;  %v4078_v28 = vmax.f32 %v11085_v33, 0.0  ;;  %v4079_v42 = vmax.f32 %v11087_v36, 0.0  ;;  %v4080_v29 = vmax.f32 %v11089_v39, 0.0  ;;  %v12126_v8 = vld [vmem:[#allocation8_spill] sm:$0xff]  ;;  %v12127_v36 = vld [vmem:[#allocation9_spill] sm:$0xff] }
 0x48c   : > { %v4081_v31 = vmax.f32 %v11091_v35, 0.0  ;;  %v4082_v54 = vmax.f32 %v11093_v5, 0.0  ;;  %v4083_v41 = vmax.f32 %v11095_v18, 0.0  ;;  %v4084_v9 = vmax.f32 %v11097_v37, 0.0  ;;  %v12128_v35 = vld [vmem:[#allocation10_spill] sm:$0xff]  ;;  %v12129_v18 = vld [vmem:[#allocation11_spill] sm:$0xff] }
 0x48d   : > { %v4085_v24 = vmul.f32 %v4049_v10, %v10527_v60  ;;  %v4086_v30 = vmul.f32 %v4050_v44, %v10531_v62  ;;  %v4087_v57 = vmul.f32 %v4051_v11, %v10529_v61  ;;  %v4088_v51 = vmul.f32 %v4052_v58, %v10533_v63  ;;  %v12130_v10 = vld [vmem:[#allocation12_spill] sm:$0xff]  ;;  %v12131_v11 = vld [vmem:[#allocation13_spill] sm:$0xff] }
 0x48e   : > { %v4089_v7 = vmul.f32 %v4053_v59, %v12121_v16  ;;  %v4090_v0 = vmul.f32 %v4054_v48, %v12122_v38  ;;  %v4091_v27 = vmul.f32 %v4055_v17, %v12123_v2  ;;  %v4092_v53 = vmul.f32 %v4056_v34, %v12124_v3  ;;  %v12132_v59 = vld [vmem:[#allocation14_spill] sm:$0xff]  ;;  %v12133_v17 = vld [vmem:[#allocation15_spill] sm:$0xff] }
 0x48f   : > { %v4093_v26 = vmul.f32 %v4057_v12, %v12125_v45  ;;  %v4094_v33 = vmul.f32 %v4058_v13, %v12126_v8  ;;  %v4095_v39 = vmul.f32 %v4059_v4, %v12127_v36  ;;  %v4096_v5 = vmul.f32 %v4060_v20, %v12128_v35  ;;  %4121 = vst.msk [vmem:[#allocation2 + $0x18] sm:$0xff] %vm631_vm2, %v4085_v24  ;;  %v12134_v12 = vld [vmem:[#allocation16_spill] sm:$0xff]  ;;  %v12135_v4 = vld [vmem:[#allocation17_spill] sm:$0xff] }
 0x490   : > { %4122 = vst.msk [vmem:[#allocation2 + $0x20] sm:$0xff] %vm631_vm2, %v4086_v30  ;;  %4123 = vst.msk [vmem:[#allocation2 + $0x28] sm:$0xff] %vm631_vm2, %v4087_v57  ;;  %v4097_v37 = vmul.f32 %v4061_v6, %v12129_v18  ;;  %v4098_v44 = vmul.f32 %v4062_v19, %v12130_v10  ;;  %v4099_v58 = vmul.f32 %v4063_v23, %v12131_v11  ;;  %v12136_v6 = vld [vmem:[#allocation18_spill] sm:$0xff]  ;;  %v12137_v23 = vld [vmem:[#allocation19_spill] sm:$0xff] }
 0x491   : > { %4124 = vst.msk [vmem:[#allocation2 + $0x30] sm:$0xff] %vm631_vm2, %v4088_v51  ;;  %v4100_v48 = vmul.f32 %v4064_v15, %v12132_v59  ;;  %4125 = vst.msk [vmem:[#allocation2 + $0x38] sm:$0xff] %vm631_vm2, %v4089_v7  ;;  %v4101_v34 = vmul.f32 %v4065_v22, %v12133_v17  ;;  %v4102_v13 = vmul.f32 %v4066_v47, %v12134_v12  ;;  %v12138_v24 = vld [vmem:[#allocation20_spill] sm:$0xff]  ;;  %v12139_v57 = vld [vmem:[#allocation21_spill] sm:$0xff] }
 0x492   : > { %4126 = vst.msk [vmem:[#allocation2 + $0x40] sm:$0xff] %vm631_vm2, %v4090_v0  ;;  %4127 = vst.msk [vmem:[#allocation2 + $0x48] sm:$0xff] %vm631_vm2, %v4091_v27  ;;  %v4103_v20 = vmul.f32 %v4067_v55, %v12135_v4  ;;  %v4104_v19 = vmul.f32 %v4068_v46, %v12136_v6  ;;  %v4105_v15 = vmul.f32 %v4069_v40, %v12137_v23  ;;  %v12140_v51 = vld [vmem:[#allocation22_spill] sm:$0xff]  ;;  %v12141_v55 = vld [vmem:[#allocation23_spill] sm:$0xff] }
 0x493   : > { %4128 = vst.msk [vmem:[#allocation2 + $0x50] sm:$0xff] %vm631_vm2, %v4092_v53  ;;  %4129 = vst.msk [vmem:[#allocation2 + $0x58] sm:$0xff] %vm631_vm2, %v4093_v26  ;;  %v4106_v30 = vmul.f32 %v4070_v52, %v12138_v24  ;;  %v4107_v22 = vmul.f32 %v4071_v43, %v12139_v57  ;;  %v4108_v47 = vmul.f32 %v4072_v56, %v12140_v51  ;;  %v12142_v7 = vld [vmem:[#allocation24_spill] sm:$0xff]  ;;  %v12143_v27 = vld [vmem:[#allocation25_spill] sm:$0xff] }
 0x494   : > { %4130 = vst.msk [vmem:[#allocation2 + $0x60] sm:$0xff] %vm631_vm2, %v4094_v33  ;;  %4131 = vst.msk [vmem:[#allocation2 + $0x68] sm:$0xff] %vm631_vm2, %v4095_v39  ;;  %v4109_v46 = vmul.f32 %v4073_v14, %v12141_v55  ;;  %v4110_v0 = vmul.f32 %v4074_v32, %v12142_v7  ;;  %v4111_v40 = vmul.f32 %v4075_v49, %v12143_v27  ;;  %v12144_v53 = vld [vmem:[#allocation26_spill] sm:$0xff]  ;;  %v12145_v43 = vld [vmem:[#allocation27_spill] sm:$0xff] }
 0x495   : > { %4132 = vst.msk [vmem:[#allocation2 + $0x70] sm:$0xff] %vm631_vm2, %v4096_v5  ;;  %4133 = vst.msk [vmem:[#allocation2 + $0x78] sm:$0xff] %vm631_vm2, %v4097_v37  ;;  %v4112_v52 = vmul.f32 %v4076_v50, %v12144_v53  ;;  %v4113_v56 = vmul.f32 %v4077_v21, %v12145_v43  ;;  %v12146_v26 = vld [vmem:[#allocation28_spill] sm:$0xff]  ;;  %v12147_v39 = vld [vmem:[#allocation29_spill] sm:$0xff] }
 0x496   : > { %4134 = vst.msk [vmem:[#allocation2 + $0x80] sm:$0xff] %vm631_vm2, %v4098_v44  ;;  %4135 = vst.msk [vmem:[#allocation2 + $0x88] sm:$0xff] %vm631_vm2, %v4099_v58  ;;  %v4114_v33 = vmul.f32 %v4078_v28, %v12146_v26  ;;  %v4115_v14 = vmul.f32 %v4079_v42, %v12147_v39  ;;  %v12148_v5 = vld [vmem:[#allocation30_spill] sm:$0xff]  ;;  %v12149_v49 = vld [vmem:[#allocation31_spill] sm:$0xff] }
 0x497   : > { %4136 = vst.msk [vmem:[#allocation2 + $0x90] sm:$0xff] %vm631_vm2, %v4100_v48  ;;  %4137 = vst.msk [vmem:[#allocation2 + $0x98] sm:$0xff] %vm631_vm2, %v4101_v34  ;;  %v4116_v32 = vmul.f32 %v4080_v29, %v12148_v5  ;;  %v4117_v50 = vmul.f32 %v4081_v31, %v12149_v49  ;;  %v12150_v37 = vld [vmem:[#allocation32_spill] sm:$0xff]  ;;  %v12151_v58 = vld [vmem:[#allocation33_spill] sm:$0xff] }
 0x498   : > { %4138 = vst.msk [vmem:[#allocation2 + $0xa0] sm:$0xff] %vm631_vm2, %v4102_v13  ;;  %4139 = vst.msk [vmem:[#allocation2 + $0xa8] sm:$0xff] %vm631_vm2, %v4103_v20  ;;  %v4118_v44 = vmul.f32 %v4082_v54, %v12150_v37  ;;  %v4119_v21 = vmul.f32 %v4083_v41, %v12151_v58  ;;  %v12152_v48 = vld [vmem:[#allocation34_spill] sm:$0xff]  ;;  %v4215_v42 = vld [vmem:[#allocation2 + $0x16] sm:$0xff] }
 0x499   : > { %4140 = vst.msk [vmem:[#allocation2 + $0xb0] sm:$0xff] %vm631_vm2, %v4104_v19  ;;  %4141 = vst.msk [vmem:[#allocation2 + $0xb8] sm:$0xff] %vm631_vm2, %v4105_v15  ;;  %v4120_v28 = vmul.f32 %v4084_v9, %v12152_v48  ;;  %v4216_v29 = vld [vmem:[#allocation2 + $0x1e] sm:$0xff]  ;;  %v4217_v31 = vld [vmem:[#allocation2 + $0x26] sm:$0xff] }
 0x49a   : > { %4142 = vst.msk [vmem:[#allocation2 + $0xc0] sm:$0xff] %vm631_vm2, %v4106_v30  ;;  %4143 = vst.msk [vmem:[#allocation2 + $0xc8] sm:$0xff] %vm631_vm2, %v4107_v22  ;;  %v4250_v54 = vpack.c.bf16 %v4216_v29, %v4215_v42  ;;  %v4218_v41 = vld [vmem:[#allocation2 + $0x2e] sm:$0xff]  ;;  %v4219_v13 = vld [vmem:[#allocation2 + $0x36] sm:$0xff] }
 0x49b   : > { %4144 = vst.msk [vmem:[#allocation2 + $0xd0] sm:$0xff] %vm631_vm2, %v4108_v47  ;;  %4145 = vst.msk [vmem:[#allocation2 + $0xd8] sm:$0xff] %vm631_vm2, %v4109_v46  ;;  %v11210_v9 = vld [vmem:[%s12011_s6 + $0x10] sm:$0xff]   ;;  %v4251_v34 = vpack.c.bf16 %v4218_v41, %v4217_v31  ;;  %v4220_v20 = vld [vmem:[#allocation2 + $0x3e] sm:$0xff] }
 0x49c   : > { %4146 = vst.msk [vmem:[#allocation2 + $0xe0] sm:$0xff] %vm631_vm2, %v4110_v0  ;;  %4147 = vst.msk [vmem:[#allocation2 + $0xe8] sm:$0xff] %vm631_vm2, %v4111_v40  ;;  %8816 = vmatmul.mubr.msk.bf16.vlgmr.msra.gmra.mrb[4].mxu1 %vm631_vm2, %v4250_v54  ;;  %v4221_v19 = vld [vmem:[#allocation2 + $0x46] sm:$0xff]  ;;  %v4222_v15 = vld [vmem:[#allocation2 + $0x4e] sm:$0xff]  ;;  %v4252_v30 = vpack.c.bf16 %v4220_v20, %v4219_v13 }
 0x49d   : > { %4148 = vst.msk [vmem:[#allocation2 + $0xf0] sm:$0xff] %vm631_vm2, %v4112_v52  ;;  %4149 = vst.msk [vmem:[#allocation2 + $0xf8] sm:$0xff] %vm631_vm2, %v4113_v56  ;;  %8852 = vmatpush3.bf16.msra.mxu1 %v10939_v1  ;;  %8819 = vmatprep.mubr.msk.bf16.mxu1 %vm631_vm2, %v4251_v34  ;;  %v4253_v22 = vpack.c.bf16 %v4222_v15, %v4221_v19  ;;  %v4223_v47 = vld [vmem:[#allocation2 + $0x56] sm:$0xff]  ;;  %v4224_v46 = vld [vmem:[#allocation2 + $0x5e] sm:$0xff] }
 0x49e   : > { %4150 = vst.msk [vmem:[#allocation2 + $0x100] sm:$0xff] %vm631_vm2, %v4114_v33  ;;  %4151 = vst.msk [vmem:[#allocation2 + $0x108] sm:$0xff] %vm631_vm2, %v4115_v14  ;;  %8889 = vmatprep.subr.bf16.mxu1 %v11210_v9  ;;  %v4225_v0 = vld [vmem:[#allocation2 + $0x66] sm:$0xff]  ;;  %v4226_v40 = vld [vmem:[#allocation2 + $0x6e] sm:$0xff]  ;;  %v4254_v52 = vpack.c.bf16 %v4224_v46, %v4223_v47 }
 0x49f   : > { %4152 = vst.msk [vmem:[#allocation2 + $0x110] sm:$0xff] %vm631_vm2, %v4116_v32  ;;  %4153 = vst.msk [vmem:[#allocation2 + $0x118] sm:$0xff] %vm631_vm2, %v4117_v50  ;;  %v4255_v1 = vpack.c.bf16 %v4226_v40, %v4225_v0  ;;  %v4227_v56 = vld [vmem:[#allocation2 + $0x76] sm:$0xff]  ;;  %v4228_v33 = vld [vmem:[#allocation2 + $0x7e] sm:$0xff] }
 0x4a0   : > { %4154 = vst.msk [vmem:[#allocation2 + $0x120] sm:$0xff] %vm631_vm2, %v4118_v44  ;;  %4155 = vst.msk [vmem:[#allocation2 + $0x128] sm:$0xff] %vm631_vm2, %v4119_v21  ;;  %v4229_v14 = vld [vmem:[#allocation2 + $0x86] sm:$0xff]  ;;  %v4230_v32 = vld [vmem:[#allocation2 + $0x8e] sm:$0xff]  ;;  %v4256_v50 = vpack.c.bf16 %v4228_v33, %v4227_v56 }
 0x4a1   : > { %4156 = vst.msk [vmem:[#allocation2 + $0x130] sm:$0xff] %vm631_vm2, %v4120_v28  ;;  %v4257_v44 = vpack.c.bf16 %v4230_v32, %v4229_v14  ;;  %v4231_v21 = vld [vmem:[#allocation2 + $0x96] sm:$0xff]  ;;  %v4232_v28 = vld [vmem:[#allocation2 + $0x9e] sm:$0xff]  ;;  %v4233_v42 = vld [vmem:[#allocation2 + $0xa6] sm:$0xff] }
 0x4a2   : > { %v4234_v29 = vld [vmem:[#allocation2 + $0xae] sm:$0xff]  ;;  %v4258_v31 = vpack.c.bf16 %v4232_v28, %v4231_v21  ;;  %v4235_v41 = vld [vmem:[#allocation2 + $0xb6] sm:$0xff]  ;;  %v4236_v34 = vld [vmem:[#allocation2 + $0xbe] sm:$0xff] }
 0x4a3   : > { %v4259_v54 = vpack.c.bf16 %v4234_v29, %v4233_v42  ;;  %v4237_v13 = vld [vmem:[#allocation2 + $0xc6] sm:$0xff]  ;;  %v4238_v20 = vld [vmem:[#allocation2 + $0xce] sm:$0xff]  ;;  %v4260_v19 = vpack.c.bf16 %v4236_v34, %v4235_v41 }
 0x4a4   : > { %8820 = vmatmul.mubr.msk.bf16.gmra.mrb[8].mxu1 %vm631_vm2, %v4252_v30  ;;  %v4261_v15 = vpack.c.bf16 %v4238_v20, %v4237_v13  ;;  %v4239_v30 = vld [vmem:[#allocation2 + $0xd6] sm:$0xff]  ;;  %v4241_v47 = vld [vmem:[#allocation2 + $0xe6] sm:$0xff]  ;;  %v4242_v46 = vld [vmem:[#allocation2 + $0xee] sm:$0xff] }
 0x4a5   : > { %8823 = vmatprep.mubr.msk.bf16.mxu1 %vm631_vm2, %v4253_v22  ;;  %v4240_v22 = vld [vmem:[#allocation2 + $0xde] sm:$0xff]  ;;  %v4263_v40 = vpack.c.bf16 %v4242_v46, %v4241_v47  ;;  %v4245_v56 = vld [vmem:[#allocation2 + $0x106] sm:$0xff] }
 0x4a6   : > { %v4262_v0 = vpack.c.bf16 %v4240_v22, %v4239_v30  ;;  %v4246_v33 = vld [vmem:[#allocation2 + $0x10e] sm:$0xff]  ;;  %v4247_v21 = vld [vmem:[#allocation2 + $0x116] sm:$0xff]  ;;  %v4161_v41 = vld [vmem:[#allocation2 + $0x25] sm:$0xff] }
 0x4a7   : > { %v4265_v32 = vpack.c.bf16 %v4246_v33, %v4245_v56  ;;  %v4248_v28 = vld [vmem:[#allocation2 + $0x11e] sm:$0xff]  ;;  %v4162_v34 = vld [vmem:[#allocation2 + $0x2d] sm:$0xff] }
 0x4a8   : > { %v4266_v29 = vpack.c.bf16 %v4248_v28, %v4247_v21  ;;  %v11235_v20 = vld [vmem:[%s12011_s6 + $0x18] sm:$0xff]   ;;  %v4165_v22 = vld [vmem:[#allocation2 + $0x45] sm:$0xff]  ;;  %v4166_v47 = vld [vmem:[#allocation2 + $0x4d] sm:$0xff] }
 0x4a9   : > { %v4164_v30 = vld [vmem:[#allocation2 + $0x3d] sm:$0xff]  ;;  %v4170_v56 = vld [vmem:[#allocation2 + $0x6d] sm:$0xff] }
 0x4ac   : > { %8824 = vmatmul.mubr.msk.bf16.gmra.mrb[12].mxu1 %vm631_vm2, %v4254_v52  ;;  %v4243_v52 = vld [vmem:[#allocation2 + $0xf6] sm:$0xff] }
 0x4ad   : > { %8827 = vmatprep.mubr.msk.bf16.mxu1 %vm631_vm2, %v4255_v1  ;;  %v4244_v1 = vld [vmem:[#allocation2 + $0xfe] sm:$0xff] }
 0x4ae   : > { %v4264_v14 = vpack.c.bf16 %v4244_v1, %v4243_v52  ;;  %v4168_v52 = vld [vmem:[#allocation2 + $0x5d] sm:$0xff]  ;;  %v4169_v1 = vld [vmem:[#allocation2 + $0x65] sm:$0xff] }
 0x4b4   : > { %8828 = vmatmul.mubr.msk.bf16.gmra.mrb[16].mxu1 %vm631_vm2, %v4256_v50  ;;  %v4157_v50 = vld [vmem:[#allocation2 + $0x5] sm:$0xff] }
 0x4b5   : > { %8831 = vmatprep.mubr.msk.bf16.mxu1 %vm631_vm2, %v4257_v44  ;;  %v4158_v44 = vld [vmem:[#allocation2 + $0xd] sm:$0xff] }
 0x4b6   : > { %v4193_v42 = vpack.c.bf16 %v4158_v44, %v4157_v50  ;;  %v4173_v50 = vld [vmem:[#allocation2 + $0x85] sm:$0xff]  ;;  %v4174_v44 = vld [vmem:[#allocation2 + $0x8d] sm:$0xff] }
 0x4b7   : > { %v4201_v28 = vpack.c.bf16 %v4174_v44, %v4173_v50 }
 0x4bc   : > { %8832 = vmatmul.mubr.msk.bf16.gmra.mrb[20].mxu1 %vm631_vm2, %v4258_v31  ;;  %v4159_v31 = vld [vmem:[#allocation2 + $0x15] sm:$0xff] }
 0x4bd   : > { %8835 = vmatprep.mubr.msk.bf16.mxu1 %vm631_vm2, %v4259_v54  ;;  %v4160_v54 = vld [vmem:[#allocation2 + $0x1d] sm:$0xff] }
 0x4be   : > { %v4194_v13 = vpack.c.bf16 %v4160_v54, %v4159_v31  ;;  %v4177_v31 = vld [vmem:[#allocation2 + $0xa5] sm:$0xff]  ;;  %v4178_v54 = vld [vmem:[#allocation2 + $0xad] sm:$0xff] }
 0x4c4   : > { %8836 = vmatmul.mubr.msk.bf16.gmra.mrb[24].mxu1 %vm631_vm2, %v4260_v19  ;;  %v4195_v19 = vpack.c.bf16 %v4162_v34, %v4161_v41  ;;  %v4203_v34 = vpack.c.bf16 %v4178_v54, %v4177_v31 }
 0x4c5   : > { %8839 = vmatprep.mubr.msk.bf16.mxu1 %vm631_vm2, %v4261_v15  ;;  %v4163_v15 = vld [vmem:[#allocation2 + $0x35] sm:$0xff] }
 0x4c6   : > { %v4196_v46 = vpack.c.bf16 %v4164_v30, %v4163_v15  ;;  %v4181_v15 = vld [vmem:[#allocation2 + $0xc5] sm:$0xff]  ;;  %v4182_v30 = vld [vmem:[#allocation2 + $0xcd] sm:$0xff] }
 0x4cc   : > { %8840 = vmatmul.mubr.msk.bf16.gmra.mrb[28].mxu1 %vm631_vm2, %v4262_v0  ;;  %v4197_v0 = vpack.c.bf16 %v4166_v47, %v4165_v22  ;;  %v4205_v47 = vpack.c.bf16 %v4182_v30, %v4181_v15  ;;  %v11262_v30 = vld [vmem:[%s12011_s6 + $0x20] sm:$0xff]  }
 0x4cd   : > { %8843 = vmatprep.mubr.msk.bf16.mxu1 %vm631_vm2, %v4263_v40  ;;  %v4167_v40 = vld [vmem:[#allocation2 + $0x55] sm:$0xff] }
 0x4ce   : > { %v4198_v33 = vpack.c.bf16 %v4168_v52, %v4167_v40  ;;  %v4185_v40 = vld [vmem:[#allocation2 + $0xe5] sm:$0xff]  ;;  %v4186_v52 = vld [vmem:[#allocation2 + $0xed] sm:$0xff] }
 0x4d4   : > { %8844 = vmatmul.mubr.msk.bf16.gmra.mrb[32].mxu1 %vm631_vm2, %v4264_v14  ;;  %v4171_v14 = vld [vmem:[#allocation2 + $0x75] sm:$0xff] }
 0x4d5   : > { %8847 = vmatprep.mubr.msk.bf16.mxu1 %vm631_vm2, %v4265_v32  ;;  %v4172_v32 = vld [vmem:[#allocation2 + $0x7d] sm:$0xff] }
 0x4d6   : > { %v4200_v21 = vpack.c.bf16 %v4172_v32, %v4171_v14  ;;  %v4189_v14 = vld [vmem:[#allocation2 + $0x105] sm:$0xff]  ;;  %v4190_v32 = vld [vmem:[#allocation2 + $0x10d] sm:$0xff] }
 0x4d7   : > { %v4209_v44 = vpack.c.bf16 %v4190_v32, %v4189_v14  ;;  %v4757_v14 = vld [vmem:[#allocation2 + $0x6f] sm:$0xff] }
 0x4dc   : > { %8848 = vmatmul.mubr.msk.bf16.gmra.mrb[36].mxu1 %vm631_vm2, %v4266_v29  ;;  %v4176_v29 = vld [vmem:[#allocation2 + $0x9d] sm:$0xff] }
 0x4dd   : > { %8853 = vmatprep.mubr.msk.bf16.mxu1 %vm631_vm2, %v4193_v42  ;;  %v4175_v42 = vld [vmem:[#allocation2 + $0x95] sm:$0xff] }
 0x4de   : > { %v4202_v41 = vpack.c.bf16 %v4176_v29, %v4175_v42  ;;  %v4191_v42 = vld [vmem:[#allocation2 + $0x115] sm:$0xff]  ;;  %v4192_v29 = vld [vmem:[#allocation2 + $0x11d] sm:$0xff] }
 0x4df   : > { %v4210_v54 = vpack.c.bf16 %v4192_v29, %v4191_v42 }
 0x4e4   : > { %8854 = vmatmul.mubr.msk.bf16.vlgmr.msra.gmra.mrb[4].mxu1 %vm631_vm2, %v4194_v13  ;;  %v4179_v13 = vld [vmem:[#allocation2 + $0xb5] sm:$0xff] }
 0x4e5   : > { %8890 = vmatpush3.bf16.msra.mxu1 %v11210_v9  ;;  %8857 = vmatprep.mubr.msk.bf16.mxu1 %vm631_vm2, %v4195_v19  ;;  %v4199_v9 = vpack.c.bf16 %v4170_v56, %v4169_v1  ;;  %v4180_v19 = vld [vmem:[#allocation2 + $0xbd] sm:$0xff]  ;;  %v4207_v56 = vpack.c.bf16 %v4186_v52, %v4185_v40  ;;  %v4753_v40 = vld [vmem:[#allocation2 + $0x4f] sm:$0xff] }
 0x4e6   : > { %8927 = vmatprep.subr.bf16.mxu1 %v11235_v20  ;;  %v4204_v22 = vpack.c.bf16 %v4180_v19, %v4179_v13  ;;  %v4748_v13 = vld [vmem:[#allocation2 + $0x27] sm:$0xff]  ;;  %v4749_v19 = vld [vmem:[#allocation2 + $0x2f] sm:$0xff] }
 0x4ec   : > { %8858 = vmatmul.mubr.msk.bf16.gmra.mrb[8].mxu1 %vm631_vm2, %v4196_v46  ;;  %v4183_v46 = vld [vmem:[#allocation2 + $0xd5] sm:$0xff] }
 0x4ed   : > { %8861 = vmatprep.mubr.msk.bf16.mxu1 %vm631_vm2, %v4197_v0  ;;  %v4184_v0 = vld [vmem:[#allocation2 + $0xdd] sm:$0xff] }
 0x4ee   : > { %v4206_v1 = vpack.c.bf16 %v4184_v0, %v4183_v46  ;;  %v4751_v46 = vld [vmem:[#allocation2 + $0x3f] sm:$0xff]  ;;  %v4752_v0 = vld [vmem:[#allocation2 + $0x47] sm:$0xff] }
 0x4f4   : > { %8862 = vmatmul.mubr.msk.bf16.gmra.mrb[12].mxu1 %vm631_vm2, %v4198_v33  ;;  %v4187_v33 = vld [vmem:[#allocation2 + $0xf5] sm:$0xff] }
 0x4f5   : > { %8865 = vmatprep.mubr.msk.bf16.mxu1 %vm631_vm2, %v4199_v9  ;;  %v4188_v9 = vld [vmem:[#allocation2 + $0xfd] sm:$0xff] }
 0x4f6   : > { %v4208_v50 = vpack.c.bf16 %v4188_v9, %v4187_v33  ;;  %v4755_v33 = vld [vmem:[#allocation2 + $0x5f] sm:$0xff]  ;;  %v4756_v9 = vld [vmem:[#allocation2 + $0x67] sm:$0xff] }
 0x4f7   : > { %v4786_v32 = vpack.c.bf16 %v4757_v14, %v4756_v9  ;;  %v4770_v9 = vld [vmem:[#allocation2 + $0xd7] sm:$0xff]  ;;  %v4771_v14 = vld [vmem:[#allocation2 + $0xdf] sm:$0xff] }
 0x4fc   : > { %8866 = vmatmul.mubr.msk.bf16.gmra.mrb[16].mxu1 %vm631_vm2, %v4200_v21  ;;  %v4744_v21 = vld [vmem:[#allocation2 + $0x7] sm:$0xff] }
 0x4fd   : > { %8869 = vmatprep.mubr.msk.bf16.mxu1 %vm631_vm2, %v4201_v28  ;;  %v4745_v28 = vld [vmem:[#allocation2 + $0xf] sm:$0xff] }
 0x4fe   : > { %v4780_v31 = vpack.c.bf16 %v4745_v28, %v4744_v21  ;;  %v4760_v21 = vld [vmem:[#allocation2 + $0x87] sm:$0xff]  ;;  %v4761_v28 = vld [vmem:[#allocation2 + $0x8f] sm:$0xff] }
 0x4ff   : > { %v4788_v29 = vpack.c.bf16 %v4761_v28, %v4760_v21  ;;  %v4793_v21 = vpack.c.bf16 %v4771_v14, %v4770_v9  ;;  %v9787_v9 = vld [vmem:[%s12011_s6 + $0x28] sm:$0xff]   ;;  %v5411_v14 = vld [vmem:[#allocation2 + $0x50] sm:$0xff] }
 0x504   : > { %8870 = vmatmul.mubr.msk.bf16.gmra.mrb[20].mxu1 %vm631_vm2, %v4202_v41  ;;  %v4746_v41 = vld [vmem:[#allocation2 + $0x17] sm:$0xff] }
 0x505   : > { %8873 = vmatprep.mubr.msk.bf16.mxu1 %vm631_vm2, %v4203_v34  ;;  %v4747_v34 = vld [vmem:[#allocation2 + $0x1f] sm:$0xff] }
 0x506   : > { %v11257_v15 = vpack.c.bf16 %v4747_v34, %v4746_v41  ;;  %v4764_v41 = vld [vmem:[#allocation2 + $0xa7] sm:$0xff]  ;;  %v4765_v34 = vld [vmem:[#allocation2 + $0xaf] sm:$0xff] }
 0x50c   : > { %8874 = vmatmul.mubr.msk.bf16.gmra.mrb[24].mxu1 %vm631_vm2, %v4204_v22  ;;  %v11264_v22 = vpack.c.bf16 %v4749_v19, %v4748_v13  ;;  %v4790_v19 = vpack.c.bf16 %v4765_v34, %v4764_v41  ;;  %v4776_v41 = vld [vmem:[#allocation2 + $0x107] sm:$0xff]  ;;  %v4777_v34 = vld [vmem:[#allocation2 + $0x10f] sm:$0xff] }
 0x50d   : > { %8877 = vmatprep.mubr.msk.bf16.mxu1 %vm631_vm2, %v4205_v47  ;;  %v4750_v47 = vld [vmem:[#allocation2 + $0x37] sm:$0xff] }
 0x50e   : > { %v4783_v52 = vpack.c.bf16 %v4751_v46, %v4750_v47  ;;  %v4766_v47 = vld [vmem:[#allocation2 + $0xb7] sm:$0xff]  ;;  %v4767_v46 = vld [vmem:[#allocation2 + $0xbf] sm:$0xff] }
 0x514   : > { %8878 = vmatmul.mubr.msk.bf16.gmra.mrb[28].mxu1 %vm631_vm2, %v4206_v1  ;;  %v4784_v1 = vpack.c.bf16 %v4753_v40, %v4752_v0  ;;  %v4768_v0 = vld [vmem:[#allocation2 + $0xc7] sm:$0xff]  ;;  %v4769_v40 = vld [vmem:[#allocation2 + $0xcf] sm:$0xff] }
 0x515   : > { %8881 = vmatprep.mubr.msk.bf16.mxu1 %vm631_vm2, %v4207_v56  ;;  %v4754_v56 = vld [vmem:[#allocation2 + $0x57] sm:$0xff] }
 0x51c   : > { %8882 = vmatmul.mubr.msk.bf16.gmra.mrb[32].mxu1 %vm631_vm2, %v4208_v50  ;;  %v4758_v50 = vld [vmem:[#allocation2 + $0x77] sm:$0xff] }
 0x51d   : > { %8885 = vmatprep.mubr.msk.bf16.mxu1 %vm631_vm2, %v4209_v44  ;;  %v4759_v44 = vld [vmem:[#allocation2 + $0x7f] sm:$0xff] }
 0x51e   : > { %v4787_v42 = vpack.c.bf16 %v4759_v44, %v4758_v50  ;;  %v4772_v50 = vld [vmem:[#allocation2 + $0xe7] sm:$0xff]  ;;  %v4773_v44 = vld [vmem:[#allocation2 + $0xef] sm:$0xff] }
 0x51f   : > { %v4794_v28 = vpack.c.bf16 %v4773_v44, %v4772_v50  ;;  %v5412_v50 = vld [vmem:[#allocation2 + $0x58] sm:$0xff]  ;;  %v5413_v44 = vld [vmem:[#allocation2 + $0x60] sm:$0xff] }
 0x524   : > { %8886 = vmatmul.mubr.msk.bf16.gmra.mrb[36].mxu1 %vm631_vm2, %v4210_v54  ;;  %v4763_v54 = vld [vmem:[#allocation2 + $0x9f] sm:$0xff] }
 0x525   : > { %8891 = vmatprep.mubr.msk.bf16.mxu1 %vm631_vm2, %v4780_v31  ;;  %v4762_v31 = vld [vmem:[#allocation2 + $0x97] sm:$0xff] }
 0x526   : > { %v4789_v13 = vpack.c.bf16 %v4763_v54, %v4762_v31  ;;  %v4774_v31 = vld [vmem:[#allocation2 + $0xf7] sm:$0xff]  ;;  %v4775_v54 = vld [vmem:[#allocation2 + $0xff] sm:$0xff] }
 0x52c   : > { %8892 = vmatmul.mubr.msk.bf16.vlgmr.msra.gmra.mrb[4].mxu1 %vm631_vm2, %v11257_v15 }
 0x52d   : > { %8928 = vmatpush3.bf16.msra.mxu1 %v11235_v20  ;;  %8895 = vmatprep.mubr.msk.bf16.mxu1 %vm631_vm2, %v11264_v22  ;;  %v4785_v20 = vpack.c.bf16 %v4755_v33, %v4754_v56  ;;  %v4791_v56 = vpack.c.bf16 %v4767_v46, %v4766_v47  ;;  %v4792_v33 = vpack.c.bf16 %v4769_v40, %v4768_v0  ;;  %v4778_v0 = vld [vmem:[#allocation2 + $0x117] sm:$0xff]  ;;  %v4779_v40 = vld [vmem:[#allocation2 + $0x11f] sm:$0xff] }
 0x52e   : > { %8965 = vmatprep.subr.bf16.mxu1 %v11262_v30  ;;  %v4795_v47 = vpack.c.bf16 %v4775_v54, %v4774_v31  ;;  %v4796_v46 = vpack.c.bf16 %v4777_v34, %v4776_v41  ;;  %v4797_v25 = vpack.c.bf16 %v4779_v40, %v4778_v0  ;;  %v5414_v31 = vld [vmem:[#allocation2 + $0x68] sm:$0xff]  ;;  %v5415_v54 = vld [vmem:[#allocation2 + $0x70] sm:$0xff]  ;;  %v5416_v41 = vld [vmem:[#allocation2 + $0x78] sm:$0xff] }
 0x52f   : > { %v5417_v34 = vld [vmem:[#allocation2 + $0x80] sm:$0xff]  ;;  %v5418_v0 = vld [vmem:[#allocation2 + $0x88] sm:$0xff]  ;;  %v5419_v40 = vld [vmem:[#allocation2 + $0x90] sm:$0xff] }
 0x534   : > { %8896 = vmatmul.mubr.msk.bf16.gmra.mrb[8].mxu1 %vm631_vm2, %v4783_v52 }
 0x535   : > { %8899 = vmatprep.mubr.msk.bf16.mxu1 %vm631_vm2, %v4784_v1 }
 0x53c   : > { %8900 = vmatmul.mubr.msk.bf16.gmra.mrb[12].mxu1 %vm631_vm2, %v4785_v20 }
 0x53d   : > { %8903 = vmatprep.mubr.msk.bf16.mxu1 %vm631_vm2, %v4786_v32 }
 0x544   : > { %8904 = vmatmul.mubr.msk.bf16.gmra.mrb[16].mxu1 %vm631_vm2, %v4787_v42 }
 0x545   : > { %8907 = vmatprep.mubr.msk.bf16.mxu1 %vm631_vm2, %v4788_v29 }
 0x54c   : > { %8908 = vmatmul.mubr.msk.bf16.gmra.mrb[20].mxu1 %vm631_vm2, %v4789_v13 }
 0x54d   : > { %8911 = vmatprep.mubr.msk.bf16.mxu1 %vm631_vm2, %v4790_v19 }
 0x554   : > { %8912 = vmatmul.mubr.msk.bf16.gmra.mrb[24].mxu1 %vm631_vm2, %v4791_v56 }
 0x555   : > { %8915 = vmatprep.mubr.msk.bf16.mxu1 %vm631_vm2, %v4792_v33 }
 0x55c   : > { %8916 = vmatmul.mubr.msk.bf16.gmra.mrb[28].mxu1 %vm631_vm2, %v4793_v21 }
 0x55d   : > { %8919 = vmatprep.mubr.msk.bf16.mxu1 %vm631_vm2, %v4794_v28 }
 0x564   : > { %8920 = vmatmul.mubr.msk.bf16.gmra.mrb[32].mxu1 %vm631_vm2, %v4795_v47 }
 0x565   : > { %8923 = vmatprep.mubr.msk.bf16.mxu1 %vm631_vm2, %v4796_v46 }
 0x56c   : > { %8924 = vmatmul.mubr.msk.bf16.gmra.mrb[36].mxu1 %vm631_vm2, %v4797_v25 }
 0x56d   : > { %8929 = vmatprep.mubr.msk.bf16.mxu1 %vm631_vm2, %v11257_v15  ;;  %v5108_v15 = vld [vmem:[#allocation2 + $0x127] sm:$0xff] }
 0x574   : > { %8930 = vmatmul.mubr.msk.bf16.vlgmr.msra.gmra.mrb[4].mxu1 %vm631_vm2, %v11264_v22  ;;  %v5404_v22 = vld [vmem:[#allocation2 + $0x18] sm:$0xff] }
 0x575   : > { %8966 = vmatpush3.bf16.msra.mxu1 %v11262_v30  ;;  %8933 = vmatprep.mubr.msk.bf16.mxu1 %vm631_vm2, %v4783_v52  ;;  %v5109_v30 = vld [vmem:[#allocation2 + $0x12f] sm:$0xff]  ;;  %v5405_v52 = vld [vmem:[#allocation2 + $0x20] sm:$0xff] }
 0x576   : > { %9003 = vmatprep.subr.bf16.mxu1 %v9787_v9 }
 0x57c   : > { %8934 = vmatmul.mubr.msk.bf16.gmra.mrb[8].mxu1 %vm631_vm2, %v4784_v1  ;;  %v5127_v1 = vpack.c.bf16 %v5109_v30, %v5108_v15  ;;  %v5421_v15 = vld [vmem:[#allocation2 + $0xa0] sm:$0xff]  ;;  %v5447_v30 = vpack.c.bf16 %v5419_v40, %v5418_v0 }
 0x57d   : > { %8937 = vmatprep.mubr.msk.bf16.mxu1 %vm631_vm2, %v4785_v20  ;;  %v5440_v20 = vpack.c.bf16 %v5405_v52, %v5404_v22  ;;  %v5422_v52 = vld [vmem:[#allocation2 + $0xa8] sm:$0xff]  ;;  %v5437_v0 = vld [vmem:[#allocation2 + $0x120] sm:$0xff] }
 0x584   : > { %8938 = vmatmul.mubr.msk.bf16.gmra.mrb[12].mxu1 %vm631_vm2, %v4786_v32  ;;  %v5406_v32 = vld [vmem:[#allocation2 + $0x28] sm:$0xff] }
 0x585   : > { %8941 = vmatprep.mubr.msk.bf16.mxu1 %vm631_vm2, %v4787_v42  ;;  %v5407_v42 = vld [vmem:[#allocation2 + $0x30] sm:$0xff] }
 0x58c   : > { %8942 = vmatmul.mubr.msk.bf16.gmra.mrb[16].mxu1 %vm631_vm2, %v4788_v29  ;;  %v5408_v29 = vld [vmem:[#allocation2 + $0x38] sm:$0xff] }
 0x58d   : > { %8945 = vmatprep.mubr.msk.bf16.mxu1 %vm631_vm2, %v4789_v13  ;;  %v5409_v13 = vld [vmem:[#allocation2 + $0x40] sm:$0xff] }
 0x594   : > { %8946 = vmatmul.mubr.msk.bf16.gmra.mrb[20].mxu1 %vm631_vm2, %v4790_v19  ;;  %v5441_v19 = vpack.c.bf16 %v5407_v42, %v5406_v32  ;;  %v5425_v32 = vld [vmem:[#allocation2 + $0xc0] sm:$0xff] }
 0x595   : > { %8949 = vmatprep.mubr.msk.bf16.mxu1 %vm631_vm2, %v4791_v56  ;;  %v11315_v56 = vld [vmem:[%s12011_s6 + $0x30] sm:$0xff]  }
 0x59c   : > { %8950 = vmatmul.mubr.msk.bf16.gmra.mrb[24].mxu1 %vm631_vm2, %v4792_v33  ;;  %v5410_v33 = vld [vmem:[#allocation2 + $0x48] sm:$0xff] }
 0x59d   : > { %8953 = vmatprep.mubr.msk.bf16.mxu1 %vm631_vm2, %v4793_v21  ;;  %v5443_v21 = vpack.c.bf16 %v5411_v14, %v5410_v33  ;;  %v5429_v33 = vld [vmem:[#allocation2 + $0xe0] sm:$0xff] }
 0x5a4   : > { %8954 = vmatmul.mubr.msk.bf16.gmra.mrb[28].mxu1 %vm631_vm2, %v4794_v28  ;;  %v5444_v28 = vpack.c.bf16 %v5413_v44, %v5412_v50  ;;  %v5430_v44 = vld [vmem:[#allocation2 + $0xe8] sm:$0xff] }
 0x5a5   : > { %8957 = vmatprep.mubr.msk.bf16.mxu1 %vm631_vm2, %v4795_v47  ;;  %v5445_v47 = vpack.c.bf16 %v5415_v54, %v5414_v31  ;;  %v5433_v31 = vld [vmem:[#allocation2 + $0x100] sm:$0xff] }
 0x5ac   : > { %8958 = vmatmul.mubr.msk.bf16.gmra.mrb[32].mxu1 %vm631_vm2, %v4796_v46  ;;  %v5446_v46 = vpack.c.bf16 %v5417_v34, %v5416_v41  ;;  %v5434_v34 = vld [vmem:[#allocation2 + $0x108] sm:$0xff] }
 0x5ad   : > { %8961 = vmatprep.mubr.msk.bf16.mxu1 %vm631_vm2, %v4797_v25  ;;  %v5442_v25 = vpack.c.bf16 %v5409_v13, %v5408_v29  ;;  %v5426_v13 = vld [vmem:[#allocation2 + $0xc8] sm:$0xff] }
 0x5b4   : > { %8962 = vmatmul.mubr.msk.bf16.gmra.mrb[36].mxu1 %vm631_vm2, %v5127_v1  ;;  %v5423_v1 = vld [vmem:[#allocation2 + $0xb0] sm:$0xff] }
 0x5b5   : > { %8967 = vmatprep.mubr.msk.bf16.mxu1 %vm631_vm2, %v5440_v20  ;;  %v5424_v20 = vld [vmem:[#allocation2 + $0xb8] sm:$0xff]  ;;  %v5449_v42 = vpack.c.bf16 %v5423_v1, %v5422_v52  ;;  %v5735_v52 = vld [vmem:[#allocation2 + $0x21] sm:$0xff] }
 0x5b6   : > { %v5450_v29 = vpack.c.bf16 %v5425_v32, %v5424_v20  ;;  %v5736_v32 = vld [vmem:[#allocation2 + $0x29] sm:$0xff] }
 0x5bc   : > { %8968 = vmatmul.mubr.msk.bf16.vlgmr.msra.gmra.mrb[4].mxu1 %vm631_vm2, %v5441_v19  ;;  %v5427_v19 = vld [vmem:[#allocation2 + $0xd0] sm:$0xff] }
 0x5bd   : > { %9004 = vmatpush3.bf16.msra.mxu1 %v9787_v9  ;;  %8971 = vmatprep.mubr.msk.bf16.mxu1 %vm631_vm2, %v5442_v25  ;;  %v5420_v9 = vld [vmem:[#allocation2 + $0x98] sm:$0xff]  ;;  %v5451_v14 = vpack.c.bf16 %v5427_v19, %v5426_v13  ;;  %v5739_v13 = vld [vmem:[#allocation2 + $0x41] sm:$0xff] }
 0x5be   : > { %9041 = vmatprep.subr.bf16.mxu1 %v11315_v56  ;;  %v5448_v22 = vpack.c.bf16 %v5421_v15, %v5420_v9  ;;  %v5428_v25 = vld [vmem:[#allocation2 + $0xd8] sm:$0xff]  ;;  %v5438_v15 = vld [vmem:[#allocation2 + $0x128] sm:$0xff] }
 0x5bf   : > { %v5452_v50 = vpack.c.bf16 %v5429_v33, %v5428_v25  ;;  %v11341_v25 = vld [vmem:[%s12011_s6 + $0x38] sm:$0xff]  }
 0x5c4   : > { %8972 = vmatmul.mubr.msk.bf16.gmra.mrb[8].mxu1 %vm631_vm2, %v5443_v21  ;;  %v5431_v21 = vld [vmem:[#allocation2 + $0xf0] sm:$0xff] }
 0x5c5   : > { %8975 = vmatprep.mubr.msk.bf16.mxu1 %vm631_vm2, %v5444_v28  ;;  %v5432_v28 = vld [vmem:[#allocation2 + $0xf8] sm:$0xff]  ;;  %v5453_v54 = vpack.c.bf16 %v5431_v21, %v5430_v44  ;;  %v5743_v21 = vld [vmem:[#allocation2 + $0x61] sm:$0xff] }
 0x5c6   : > { %v5454_v41 = vpack.c.bf16 %v5433_v31, %v5432_v28  ;;  %v5742_v44 = vld [vmem:[#allocation2 + $0x59] sm:$0xff] }
 0x5c7   : > { %v5774_v31 = vpack.c.bf16 %v5743_v21, %v5742_v44  ;;  %v5759_v44 = vld [vmem:[#allocation2 + $0xe1] sm:$0xff] }
 0x5cc   : > { %8976 = vmatmul.mubr.msk.bf16.gmra.mrb[12].mxu1 %vm631_vm2, %v5445_v47  ;;  %v5435_v47 = vld [vmem:[#allocation2 + $0x110] sm:$0xff] }
 0x5cd   : > { %8979 = vmatprep.mubr.msk.bf16.mxu1 %vm631_vm2, %v5446_v46  ;;  %v5436_v46 = vld [vmem:[#allocation2 + $0x118] sm:$0xff]  ;;  %v5455_v40 = vpack.c.bf16 %v5435_v47, %v5434_v34  ;;  %v5747_v47 = vld [vmem:[#allocation2 + $0x81] sm:$0xff] }
 0x5ce   : > { %v5456_v9 = vpack.c.bf16 %v5437_v0, %v5436_v46  ;;  %v5746_v34 = vld [vmem:[#allocation2 + $0x79] sm:$0xff]  ;;  %v5748_v0 = vld [vmem:[#allocation2 + $0x89] sm:$0xff] }
 0x5cf   : > { %v5776_v46 = vpack.c.bf16 %v5747_v47, %v5746_v34  ;;  %v5761_v34 = vld [vmem:[#allocation2 + $0xf1] sm:$0xff]  ;;  %v5762_v47 = vld [vmem:[#allocation2 + $0xf9] sm:$0xff] }
 0x5d4   : > { %8980 = vmatmul.mubr.msk.bf16.gmra.mrb[16].mxu1 %vm631_vm2, %v5447_v30  ;;  %v5439_v30 = vld [vmem:[#allocation2 + $0x130] sm:$0xff] }
 0x5d5   : > { %8983 = vmatprep.mubr.msk.bf16.mxu1 %vm631_vm2, %v5448_v22  ;;  %v5734_v22 = vld [vmem:[#allocation2 + $0x19] sm:$0xff]  ;;  %v5457_v1 = vpack.c.bf16 %v5439_v30, %v5438_v15  ;;  %v5751_v15 = vld [vmem:[#allocation2 + $0xa1] sm:$0xff] }
 0x5d6   : > { %v5770_v20 = vpack.c.bf16 %v5735_v52, %v5734_v22  ;;  %v5752_v52 = vld [vmem:[#allocation2 + $0xa9] sm:$0xff] }
 0x5dc   : > { %8984 = vmatmul.mubr.msk.bf16.gmra.mrb[20].mxu1 %vm631_vm2, %v5449_v42  ;;  %v5737_v42 = vld [vmem:[#allocation2 + $0x31] sm:$0xff] }
 0x5dd   : > { %8987 = vmatprep.mubr.msk.bf16.mxu1 %vm631_vm2, %v5450_v29  ;;  %v5738_v29 = vld [vmem:[#allocation2 + $0x39] sm:$0xff]  ;;  %v11336_v19 = vpack.c.bf16 %v5737_v42, %v5736_v32  ;;  %v5755_v32 = vld [vmem:[#allocation2 + $0xc1] sm:$0xff] }
 0x5de   : > { %v11343_v33 = vpack.c.bf16 %v5739_v13, %v5738_v29  ;;  %v5756_v13 = vld [vmem:[#allocation2 + $0xc9] sm:$0xff] }
 0x5e4   : > { %8988 = vmatmul.mubr.msk.bf16.gmra.mrb[24].mxu1 %vm631_vm2, %v5451_v14  ;;  %v5740_v14 = vld [vmem:[#allocation2 + $0x49] sm:$0xff] }
 0x5e5   : > { %8991 = vmatprep.mubr.msk.bf16.mxu1 %vm631_vm2, %v5452_v50  ;;  %v5741_v50 = vld [vmem:[#allocation2 + $0x51] sm:$0xff] }
 0x5e6   : > { %v5773_v28 = vpack.c.bf16 %v5741_v50, %v5740_v14  ;;  %v5757_v14 = vld [vmem:[#allocation2 + $0xd1] sm:$0xff]  ;;  %v5758_v50 = vld [vmem:[#allocation2 + $0xd9] sm:$0xff] }
 0x5e7   : > { %v5781_v21 = vpack.c.bf16 %v5757_v14, %v5756_v13  ;;  %v5768_v14 = vld [vmem:[#allocation2 + $0x129] sm:$0xff] }
 0x5ec   : > { %8992 = vmatmul.mubr.msk.bf16.gmra.mrb[28].mxu1 %vm631_vm2, %v5453_v54  ;;  %v5744_v54 = vld [vmem:[#allocation2 + $0x69] sm:$0xff] }
 0x5ed   : > { %8995 = vmatprep.mubr.msk.bf16.mxu1 %vm631_vm2, %v5454_v41  ;;  %v5745_v41 = vld [vmem:[#allocation2 + $0x71] sm:$0xff] }
 0x5f4   : > { %8996 = vmatmul.mubr.msk.bf16.gmra.mrb[32].mxu1 %vm631_vm2, %v5455_v40  ;;  %v5749_v40 = vld [vmem:[#allocation2 + $0x91] sm:$0xff] }
 0x5f5   : > { %8999 = vmatprep.mubr.msk.bf16.mxu1 %vm631_vm2, %v5456_v9  ;;  %v5750_v9 = vld [vmem:[#allocation2 + $0x99] sm:$0xff]  ;;  %v5777_v30 = vpack.c.bf16 %v5749_v40, %v5748_v0  ;;  %v5763_v0 = vld [vmem:[#allocation2 + $0x101] sm:$0xff] }
 0x5f6   : > { %v5778_v22 = vpack.c.bf16 %v5751_v15, %v5750_v9  ;;  %v5784_v9 = vpack.c.bf16 %v5763_v0, %v5762_v47  ;;  %v5764_v15 = vld [vmem:[#allocation2 + $0x109] sm:$0xff]  ;;  %v6403_v0 = vld [vmem:[#allocation2 + $0x72] sm:$0xff] }
 0x5f7   : > { %v6402_v47 = vld [vmem:[#allocation2 + $0x6a] sm:$0xff] }
 0x5fc   : > { %9000 = vmatmul.mubr.msk.bf16.gmra.mrb[36].mxu1 %vm631_vm2, %v5457_v1  ;;  %v5753_v1 = vld [vmem:[#allocation2 + $0xb1] sm:$0xff] }
 0x5fd   : > { %9005 = vmatprep.mubr.msk.bf16.mxu1 %vm631_vm2, %v5770_v20  ;;  %v5754_v20 = vld [vmem:[#allocation2 + $0xb9] sm:$0xff]  ;;  %v5779_v42 = vpack.c.bf16 %v5753_v1, %v5752_v52  ;;  %v5765_v52 = vld [vmem:[#allocation2 + $0x111] sm:$0xff] }
 0x5fe   : > { %v5780_v29 = vpack.c.bf16 %v5755_v32, %v5754_v20  ;;  %v5766_v1 = vld [vmem:[#allocation2 + $0x119] sm:$0xff]  ;;  %v5767_v20 = vld [vmem:[#allocation2 + $0x121] sm:$0xff]  ;;  %v5785_v32 = vpack.c.bf16 %v5765_v52, %v5764_v15 }
 0x5ff   : > { %v5786_v13 = vpack.c.bf16 %v5767_v20, %v5766_v1  ;;  %v6404_v15 = vld [vmem:[#allocation2 + $0x7a] sm:$0xff]  ;;  %v6405_v52 = vld [vmem:[#allocation2 + $0x82] sm:$0xff]  ;;  %v6406_v1 = vld [vmem:[#allocation2 + $0x8a] sm:$0xff] }
 0x600   : > { %v6407_v20 = vld [vmem:[#allocation2 + $0x92] sm:$0xff] }
 0x604   : > { %9006 = vmatmul.mubr.msk.bf16.vlgmr.msra.gmra.mrb[4].mxu1 %vm631_vm2, %v11336_v19 }
 0x605   : > { %9042 = vmatpush3.bf16.msra.mxu1 %v11315_v56  ;;  %9009 = vmatprep.mubr.msk.bf16.mxu1 %vm631_vm2, %v11343_v33  ;;  %v5775_v56 = vpack.c.bf16 %v5745_v41, %v5744_v54  ;;  %v5782_v54 = vpack.c.bf16 %v5759_v44, %v5758_v50  ;;  %v5760_v41 = vld [vmem:[#allocation2 + $0xe9] sm:$0xff]  ;;  %v5769_v50 = vld [vmem:[#allocation2 + $0x131] sm:$0xff] }
 0x606   : > { %9079 = vmatprep.subr.bf16.mxu1 %v11341_v25  ;;  %v5783_v40 = vpack.c.bf16 %v5761_v34, %v5760_v41  ;;  %v5787_v44 = vpack.c.bf16 %v5769_v50, %v5768_v14  ;;  %v9790_v41 = vld [vmem:[%s12011_s6 + $0x40] sm:$0xff]  }
 0x607   : > { %v6401_v34 = vld [vmem:[#allocation2 + $0x62] sm:$0xff]  ;;  %v6408_v14 = vld [vmem:[#allocation2 + $0x9a] sm:$0xff] }
 0x608   : > { %v6409_v50 = vld [vmem:[#allocation2 + $0xa2] sm:$0xff] }
 0x60c   : > { %9010 = vmatmul.mubr.msk.bf16.gmra.mrb[8].mxu1 %vm631_vm2, %v5773_v28 }
 0x60d   : > { %9013 = vmatprep.mubr.msk.bf16.mxu1 %vm631_vm2, %v5774_v31 }
 0x614   : > { %9014 = vmatmul.mubr.msk.bf16.gmra.mrb[12].mxu1 %vm631_vm2, %v5775_v56 }
 0x615   : > { %9017 = vmatprep.mubr.msk.bf16.mxu1 %vm631_vm2, %v5776_v46 }
 0x61c   : > { %9018 = vmatmul.mubr.msk.bf16.gmra.mrb[16].mxu1 %vm631_vm2, %v5777_v30 }
 0x61d   : > { %9021 = vmatprep.mubr.msk.bf16.mxu1 %vm631_vm2, %v5778_v22 }
 0x624   : > { %9022 = vmatmul.mubr.msk.bf16.gmra.mrb[20].mxu1 %vm631_vm2, %v5779_v42 }
 0x625   : > { %9025 = vmatprep.mubr.msk.bf16.mxu1 %vm631_vm2, %v5780_v29 }
 0x62c   : > { %9026 = vmatmul.mubr.msk.bf16.gmra.mrb[24].mxu1 %vm631_vm2, %v5781_v21 }
 0x62d   : > { %9029 = vmatprep.mubr.msk.bf16.mxu1 %vm631_vm2, %v5782_v54 }
 0x634   : > { %9030 = vmatmul.mubr.msk.bf16.gmra.mrb[28].mxu1 %vm631_vm2, %v5783_v40 }
 0x635   : > { %9033 = vmatprep.mubr.msk.bf16.mxu1 %vm631_vm2, %v5784_v9 }
 0x63c   : > { %9034 = vmatmul.mubr.msk.bf16.gmra.mrb[32].mxu1 %vm631_vm2, %v5785_v32 }
 0x63d   : > { %9037 = vmatprep.mubr.msk.bf16.mxu1 %vm631_vm2, %v5786_v13 }
 0x644   : > { %9038 = vmatmul.mubr.msk.bf16.gmra.mrb[36].mxu1 %vm631_vm2, %v5787_v44 }
 0x645   : > { %9043 = vmatprep.mubr.msk.bf16.mxu1 %vm631_vm2, %v11336_v19  ;;  %v6098_v19 = vld [vmem:[#allocation2 + $0x139] sm:$0xff] }
 0x64c   : > { %9044 = vmatmul.mubr.msk.bf16.vlgmr.msra.gmra.mrb[4].mxu1 %vm631_vm2, %v11343_v33 }
 0x64d   : > { %9080 = vmatpush3.bf16.msra.mxu1 %v11341_v25  ;;  %9047 = vmatprep.mubr.msk.bf16.mxu1 %vm631_vm2, %v5773_v28  ;;  %v6099_v25 = vld [vmem:[#allocation2 + $0x141] sm:$0xff]  ;;  %v6394_v28 = vld [vmem:[#allocation2 + $0x2a] sm:$0xff] }
 0x64e   : > { %9117 = vmatprep.subr.bf16.mxu1 %v9790_v41  ;;  %v6117_v33 = vpack.c.bf16 %v6099_v25, %v6098_v19  ;;  %v6437_v19 = vpack.c.bf16 %v6409_v50, %v6408_v14 }
 0x654   : > { %9048 = vmatmul.mubr.msk.bf16.gmra.mrb[8].mxu1 %vm631_vm2, %v5774_v31  ;;  %v6395_v31 = vld [vmem:[#allocation2 + $0x32] sm:$0xff] }
 0x655   : > { %9051 = vmatprep.mubr.msk.bf16.mxu1 %vm631_vm2, %v5775_v56  ;;  %v6430_v56 = vpack.c.bf16 %v6395_v31, %v6394_v28  ;;  %v6413_v28 = vld [vmem:[#allocation2 + $0xc2] sm:$0xff]  ;;  %v6414_v31 = vld [vmem:[#allocation2 + $0xca] sm:$0xff] }
 0x65c   : > { %9052 = vmatmul.mubr.msk.bf16.gmra.mrb[12].mxu1 %vm631_vm2, %v5776_v46  ;;  %v6396_v46 = vld [vmem:[#allocation2 + $0x3a] sm:$0xff] }
 0x65d   : > { %9055 = vmatprep.mubr.msk.bf16.mxu1 %vm631_vm2, %v5777_v30  ;;  %v6397_v30 = vld [vmem:[#allocation2 + $0x42] sm:$0xff] }
 0x664   : > { %9056 = vmatmul.mubr.msk.bf16.gmra.mrb[16].mxu1 %vm631_vm2, %v5778_v22  ;;  %v6398_v22 = vld [vmem:[#allocation2 + $0x4a] sm:$0xff] }
 0x665   : > { %9059 = vmatprep.mubr.msk.bf16.mxu1 %vm631_vm2, %v5779_v42  ;;  %v6399_v42 = vld [vmem:[#allocation2 + $0x52] sm:$0xff] }
 0x66c   : > { %9060 = vmatmul.mubr.msk.bf16.gmra.mrb[20].mxu1 %vm631_vm2, %v5780_v29  ;;  %v6431_v29 = vpack.c.bf16 %v6397_v30, %v6396_v46 }
 0x66d   : > { %9063 = vmatprep.mubr.msk.bf16.mxu1 %vm631_vm2, %v5781_v21  ;;  %v6432_v21 = vpack.c.bf16 %v6399_v42, %v6398_v22  ;;  %v6416_v22 = vld [vmem:[#allocation2 + $0xda] sm:$0xff]  ;;  %v6417_v42 = vld [vmem:[#allocation2 + $0xe2] sm:$0xff] }
 0x674   : > { %9064 = vmatmul.mubr.msk.bf16.gmra.mrb[24].mxu1 %vm631_vm2, %v5782_v54  ;;  %v6400_v54 = vld [vmem:[#allocation2 + $0x5a] sm:$0xff] }
 0x675   : > { %9067 = vmatprep.mubr.msk.bf16.mxu1 %vm631_vm2, %v5783_v40  ;;  %v6433_v40 = vpack.c.bf16 %v6401_v34, %v6400_v54  ;;  %v6441_v54 = vpack.c.bf16 %v6417_v42, %v6416_v22 }
 0x67c   : > { %9068 = vmatmul.mubr.msk.bf16.gmra.mrb[28].mxu1 %vm631_vm2, %v5784_v9  ;;  %v6434_v9 = vpack.c.bf16 %v6403_v0, %v6402_v47  ;;  %v6420_v47 = vld [vmem:[#allocation2 + $0xfa] sm:$0xff]  ;;  %v6421_v0 = vld [vmem:[#allocation2 + $0x102] sm:$0xff] }
 0x67d   : > { %9071 = vmatprep.mubr.msk.bf16.mxu1 %vm631_vm2, %v5785_v32  ;;  %v6435_v32 = vpack.c.bf16 %v6405_v52, %v6404_v15  ;;  %v6443_v15 = vpack.c.bf16 %v6421_v0, %v6420_v47 }
 0x684   : > { %9072 = vmatmul.mubr.msk.bf16.gmra.mrb[32].mxu1 %vm631_vm2, %v5786_v13  ;;  %v6436_v13 = vpack.c.bf16 %v6407_v20, %v6406_v1  ;;  %v6424_v1 = vld [vmem:[#allocation2 + $0x11a] sm:$0xff]  ;;  %v6425_v20 = vld [vmem:[#allocation2 + $0x122] sm:$0xff] }
 0x685   : > { %9075 = vmatprep.mubr.msk.bf16.mxu1 %vm631_vm2, %v5787_v44  ;;  %v6410_v44 = vld [vmem:[#allocation2 + $0xaa] sm:$0xff]  ;;  %v6445_v14 = vpack.c.bf16 %v6425_v20, %v6424_v1 }
 0x68c   : > { %9076 = vmatmul.mubr.msk.bf16.gmra.mrb[36].mxu1 %vm631_vm2, %v6117_v33  ;;  %v6412_v33 = vld [vmem:[#allocation2 + $0xba] sm:$0xff] }
 0x68d   : > { %9081 = vmatprep.mubr.msk.bf16.mxu1 %vm631_vm2, %v6430_v56  ;;  %v6415_v56 = vld [vmem:[#allocation2 + $0xd2] sm:$0xff]  ;;  %v6439_v46 = vpack.c.bf16 %v6413_v28, %v6412_v33 }
 0x68e   : > { %v6440_v30 = vpack.c.bf16 %v6415_v56, %v6414_v31  ;;  %v6725_v33 = vld [vmem:[#allocation2 + $0x33] sm:$0xff]  ;;  %v6726_v31 = vld [vmem:[#allocation2 + $0x3b] sm:$0xff]  ;;  %v6727_v56 = vld [vmem:[#allocation2 + $0x43] sm:$0xff] }
 0x68f   : > { %v6761_v22 = vpack.c.bf16 %v6727_v56, %v6726_v31 }
 0x694   : > { %9082 = vmatmul.mubr.msk.bf16.vlgmr.msra.gmra.mrb[4].mxu1 %vm631_vm2, %v6431_v29  ;;  %v6418_v29 = vld [vmem:[#allocation2 + $0xea] sm:$0xff] }
 0x695   : > { %9118 = vmatpush3.bf16.msra.mxu1 %v9790_v41  ;;  %9085 = vmatprep.mubr.msk.bf16.mxu1 %vm631_vm2, %v6432_v21  ;;  %v6411_v41 = vld [vmem:[#allocation2 + $0xb2] sm:$0xff] }
 0x696   : > { %v6438_v25 = vpack.c.bf16 %v6411_v41, %v6410_v44  ;;  %v6419_v21 = vld [vmem:[#allocation2 + $0xf2] sm:$0xff]  ;;  %v6428_v44 = vld [vmem:[#allocation2 + $0x13a] sm:$0xff]  ;;  %v6429_v41 = vld [vmem:[#allocation2 + $0x142] sm:$0xff] }
 0x697   : > { %v6442_v34 = vpack.c.bf16 %v6419_v21, %v6418_v29  ;;  %v6730_v29 = vld [vmem:[#allocation2 + $0x5b] sm:$0xff]  ;;  %v6731_v21 = vld [vmem:[#allocation2 + $0x63] sm:$0xff] }
 0x698   : > { %v6763_v47 = vpack.c.bf16 %v6731_v21, %v6730_v29 }
 0x69c   : > { %9086 = vmatmul.mubr.msk.bf16.gmra.mrb[8].mxu1 %vm631_vm2, %v6433_v40  ;;  %v6422_v40 = vld [vmem:[#allocation2 + $0x10a] sm:$0xff] }
 0x69d   : > { %9089 = vmatprep.mubr.msk.bf16.mxu1 %vm631_vm2, %v6434_v9  ;;  %v6423_v9 = vld [vmem:[#allocation2 + $0x112] sm:$0xff] }
 0x69e   : > { %v6444_v52 = vpack.c.bf16 %v6423_v9, %v6422_v40  ;;  %v6734_v40 = vld [vmem:[#allocation2 + $0x7b] sm:$0xff]  ;;  %v6735_v9 = vld [vmem:[#allocation2 + $0x83] sm:$0xff] }
 0x69f   : > { %v6765_v1 = vpack.c.bf16 %v6735_v9, %v6734_v40 }
 0x6a4   : > { %9090 = vmatmul.mubr.msk.bf16.gmra.mrb[12].mxu1 %vm631_vm2, %v6435_v32  ;;  %v6426_v32 = vld [vmem:[#allocation2 + $0x12a] sm:$0xff] }
 0x6a5   : > { %9093 = vmatprep.mubr.msk.bf16.mxu1 %vm631_vm2, %v6436_v13  ;;  %v6427_v13 = vld [vmem:[#allocation2 + $0x132] sm:$0xff] }
 0x6a6   : > { %v6446_v50 = vpack.c.bf16 %v6427_v13, %v6426_v32  ;;  %v6738_v32 = vld [vmem:[#allocation2 + $0x9b] sm:$0xff]  ;;  %v6739_v13 = vld [vmem:[#allocation2 + $0xa3] sm:$0xff] }
 0x6ac   : > { %9094 = vmatmul.mubr.msk.bf16.gmra.mrb[16].mxu1 %vm631_vm2, %v6437_v19  ;;  %v6447_v19 = vpack.c.bf16 %v6429_v41, %v6428_v44  ;;  %v6767_v44 = vpack.c.bf16 %v6739_v13, %v6738_v32 }
 0x6ad   : > { %9097 = vmatprep.mubr.msk.bf16.mxu1 %vm631_vm2, %v6438_v25  ;;  %v6724_v25 = vld [vmem:[#allocation2 + $0x2b] sm:$0xff] }
 0x6ae   : > { %v6760_v28 = vpack.c.bf16 %v6725_v33, %v6724_v25  ;;  %v6743_v25 = vld [vmem:[#allocation2 + $0xc3] sm:$0xff]  ;;  %v6744_v33 = vld [vmem:[#allocation2 + $0xcb] sm:$0xff] }
 0x6b4   : > { %9098 = vmatmul.mubr.msk.bf16.gmra.mrb[20].mxu1 %vm631_vm2, %v6439_v46  ;;  %v6728_v46 = vld [vmem:[#allocation2 + $0x4b] sm:$0xff] }
 0x6b5   : > { %9101 = vmatprep.mubr.msk.bf16.mxu1 %vm631_vm2, %v6440_v30  ;;  %v6729_v30 = vld [vmem:[#allocation2 + $0x53] sm:$0xff] }
 0x6b6   : > { %v6762_v42 = vpack.c.bf16 %v6729_v30, %v6728_v46  ;;  %v6746_v46 = vld [vmem:[#allocation2 + $0xdb] sm:$0xff]  ;;  %v6747_v30 = vld [vmem:[#allocation2 + $0xe3] sm:$0xff] }
 0x6b7   : > { %v6771_v29 = vpack.c.bf16 %v6747_v30, %v6746_v46 }
 0x6bc   : > { %9102 = vmatmul.mubr.msk.bf16.gmra.mrb[24].mxu1 %vm631_vm2, %v6441_v54  ;;  %v6732_v54 = vld [vmem:[#allocation2 + $0x6b] sm:$0xff] }
 0x6bd   : > { %9105 = vmatprep.mubr.msk.bf16.mxu1 %vm631_vm2, %v6442_v34  ;;  %v6733_v34 = vld [vmem:[#allocation2 + $0x73] sm:$0xff] }
 0x6be   : > { %v6764_v0 = vpack.c.bf16 %v6733_v34, %v6732_v54  ;;  %v6750_v54 = vld [vmem:[#allocation2 + $0xfb] sm:$0xff]  ;;  %v6751_v34 = vld [vmem:[#allocation2 + $0x103] sm:$0xff] }
 0x6bf   : > { %v6773_v40 = vpack.c.bf16 %v6751_v34, %v6750_v54 }
 0x6c4   : > { %9106 = vmatmul.mubr.msk.bf16.gmra.mrb[28].mxu1 %vm631_vm2, %v6443_v15  ;;  %v6736_v15 = vld [vmem:[#allocation2 + $0x8b] sm:$0xff] }
 0x6c5   : > { %9109 = vmatprep.mubr.msk.bf16.mxu1 %vm631_vm2, %v6444_v52  ;;  %v6737_v52 = vld [vmem:[#allocation2 + $0x93] sm:$0xff] }
 0x6c6   : > { %v6766_v20 = vpack.c.bf16 %v6737_v52, %v6736_v15  ;;  %v6754_v15 = vld [vmem:[#allocation2 + $0x11b] sm:$0xff]  ;;  %v6755_v52 = vld [vmem:[#allocation2 + $0x123] sm:$0xff] }
 0x6c7   : > { %v6775_v32 = vpack.c.bf16 %v6755_v52, %v6754_v15 }
 0x6cc   : > { %9110 = vmatmul.mubr.msk.bf16.gmra.mrb[32].mxu1 %vm631_vm2, %v6445_v14  ;;  %v6740_v14 = vld [vmem:[#allocation2 + $0xab] sm:$0xff] }
 0x6cd   : > { %9113 = vmatprep.mubr.msk.bf16.mxu1 %vm631_vm2, %v6446_v50  ;;  %v6741_v50 = vld [vmem:[#allocation2 + $0xb3] sm:$0xff] }
 0x6ce   : > { %v6768_v41 = vpack.c.bf16 %v6741_v50, %v6740_v14  ;;  %v6758_v14 = vld [vmem:[#allocation2 + $0x13b] sm:$0xff]  ;;  %v6759_v50 = vld [vmem:[#allocation2 + $0x143] sm:$0xff] }
 0x6d4   : > { %9114 = vmatmul.mubr.msk.bf16.gmra.mrb[36].mxu1 %vm631_vm2, %v6447_v19  ;;  %v6742_v19 = vld [vmem:[#allocation2 + $0xbb] sm:$0xff] }
 0x6d5   : > { %9119 = vmatprep.mubr.msk.bf16.mxu1 %vm631_vm2, %v6760_v28  ;;  %v6745_v28 = vld [vmem:[#allocation2 + $0xd3] sm:$0xff]  ;;  %v6769_v31 = vpack.c.bf16 %v6743_v25, %v6742_v19  ;;  %v7324_v19 = vld [vmem:[%s12015_s10 + $0x8] sm:$0xff] }
 0x6d6   : > { %v6770_v56 = vpack.c.bf16 %v6745_v28, %v6744_v33  ;;  %v12153_v33 = vmov 0.0|0.0   ;;  %v11439_v28 = vld [vmem:[%s12012_s7] ss:$0 sm:$0xff] }
 0x6dc   : > { %9120 = vmatmul.mubr.msk.bf16.vlgmr.msra.gmra.mrb[4].mxu1 %vm631_vm2, %v6761_v22  ;;  %v6748_v22 = vld [vmem:[#allocation2 + $0xeb] sm:$0xff] }
 0x6dd   : > { %9123 = vmatprep.mubr.msk.bf16.mxu1 %vm631_vm2, %v6762_v42  ;;  %v6749_v42 = vld [vmem:[#allocation2 + $0xf3] sm:$0xff] }
 0x6de   : > { %v6772_v21 = vpack.c.bf16 %v6749_v42, %v6748_v22 }
 0x6e4   : > { %9124 = vmatmul.mubr.msk.bf16.gmra.mrb[8].mxu1 %vm631_vm2, %v6763_v47  ;;  %v6752_v47 = vld [vmem:[#allocation2 + $0x10b] sm:$0xff] }
 0x6e5   : > { %9127 = vmatprep.mubr.msk.bf16.mxu1 %vm631_vm2, %v6764_v0  ;;  %v6753_v0 = vld [vmem:[#allocation2 + $0x113] sm:$0xff] }
 0x6e6   : > { %v6774_v9 = vpack.c.bf16 %v6753_v0, %v6752_v47 }
 0x6ec   : > { %9128 = vmatmul.mubr.msk.bf16.gmra.mrb[12].mxu1 %vm631_vm2, %v6765_v1  ;;  %v6756_v1 = vld [vmem:[#allocation2 + $0x12b] sm:$0xff] }
 0x6ed   : > { %9131 = vmatprep.mubr.msk.bf16.mxu1 %vm631_vm2, %v6766_v20  ;;  %v6757_v20 = vld [vmem:[#allocation2 + $0x133] sm:$0xff] }
 0x6ee   : > { %v6776_v13 = vpack.c.bf16 %v6757_v20, %v6756_v1 }
 0x6f4   : > { %9132 = vmatmul.mubr.msk.bf16.gmra.mrb[16].mxu1 %vm631_vm2, %v6767_v44  ;;  %v6777_v44 = vpack.c.bf16 %v6759_v50, %v6758_v14 }
 0x6f5   : > { %9135 = vmatprep.mubr.msk.bf16.mxu1 %vm631_vm2, %v6768_v41  ;;  %v7323_v41 = vld [vmem:[%s12015_s10] sm:$0xff] }
 0x6f6   : > { %v11432_v25 = vpack.c.bf16 %v7324_v19, %v7323_v41 }
 0x6f8   : > { %9177 = vmatpush3.bf16.msra.mxu0 %v11432_v25 }
 0x6f9   : > { %9178 = vmatprep.subr.bf16.mxu0 %v12153_v33 }
 0x6fc   : > { %9136 = vmatmul.mubr.msk.bf16.gmra.mrb[20].mxu1 %vm631_vm2, %v6769_v31 }
 0x6fd   : > { %9139 = vmatprep.mubr.msk.bf16.mxu1 %vm631_vm2, %v6770_v56 }
 0x704   : > { %9140 = vmatmul.mubr.msk.bf16.gmra.mrb[24].mxu1 %vm631_vm2, %v6771_v29 }
 0x705   : > { %9143 = vmatprep.mubr.msk.bf16.mxu1 %vm631_vm2, %v6772_v21 }
 0x70c   : > { %9144 = vmatmul.mubr.msk.bf16.gmra.mrb[28].mxu1 %vm631_vm2, %v6773_v40 }
 0x70d   : > { %9147 = vmatprep.mubr.msk.bf16.mxu1 %vm631_vm2, %v6774_v9 }
 0x714   : > { %9148 = vmatmul.mubr.msk.bf16.gmra.mrb[32].mxu1 %vm631_vm2, %v6775_v32 }
 0x715   : > { %9151 = vmatprep.mubr.msk.bf16.mxu1 %vm631_vm2, %v6776_v13 }
 0x71c   : > { %9152 = vmatmul.mubr.msk.bf16.gmra.mrb[36].mxu1 %vm631_vm2, %v6777_v44 }
 0x7af   : > { %v9121_v31 = vpop.f32.mrb[4].mxu1 }
 0x7b0   : > { %v7063_v56 = vadd.f32 %v9121_v31, %v11439_v28  ;;  %v6875_v46 = vpop.f32.mrb[5].mxu1 }
 0x7b1   : > { %v7061_v30 = vadd.f32 %v11439_v28, %v6875_v46  ;;  %v9122_v22 = vpop.f32.mrb[6].mxu1 }
 0x7b2   : > { %v11444_v42 = vmul.f32 %v7063_v56, %v10529_v61  ;;  %v7064_v29 = vadd.f32 %v9122_v22, %v11439_v28  ;;  %v6878_v21 = vpop.f32.mrb[7].mxu1 }
 0x7b3   : > { %v11448_v54 = vmul.f32 %v7061_v30, %v10527_v60  ;;  %v7062_v34 = vadd.f32 %v11439_v28, %v6878_v21 }
 0x7b4   : > { %v11454_v0 = vmul.f32 %v7064_v29, %v10533_v63  ;;  %v7212_v61 = vmul.f32 %v11444_v42, %v11444_v42  ;;  %v7136_v63 = vsel %vm631_vm2, %v11444_v42, 0.0 }
 0x7b5   : > { %v7210_v47 = vmul.f32 %v11448_v54, %v11448_v54  ;;  %v11457_v40 = vmul.f32 %v7062_v34, %v10531_v62  ;;  %v7133_v9 = vsel %vm631_vm2, %v11448_v54, 0.0 }
 0x7b6   : > { %v7213_v13 = vmul.f32 %v11454_v0, %v11454_v0  ;;  %v7249_v41 = vsel %vm631_vm2, %v7212_v61, 0.0  ;;  %v7138_v46 = vsel %vm631_vm2, %v11454_v0, 0.0 }
 0x7b7   : > { %v7134_v60 = vsel %vm631_vm2, %v11457_v40, 0.0  ;;  %v7211_v15 = vmul.f32 %v11457_v40, %v11457_v40  ;;  %v9125_v52 = vpop.f32.mrb[8].mxu1  ;;  %v7246_v32 = vsel %vm631_vm2, %v7210_v47, 0.0 }
 0x7b8   : > { %v7135_v1 = vadd.f32 %v7134_v60, %v7133_v9  ;;  %v7067_v62 = vadd.f32 %v9125_v52, %v11439_v28  ;;  %v6891_v20 = vpop.f32.mrb[9].mxu1  ;;  %v7251_v47 = vsel %vm631_vm2, %v7213_v13, 0.0 }
 0x7b9   : > { %v7247_v14 = vsel %vm631_vm2, %v7211_v15, 0.0  ;;  %v7065_v50 = vadd.f32 %v11439_v28, %v6891_v20  ;;  %v9126_v44 = vpop.f32.mrb[10].mxu1 }
 0x7ba   : > { %v7137_v19 = vadd.f32 %v7136_v63, %v7135_v1  ;;  %v7248_v33 = vadd.f32 %v7247_v14, %v7246_v32  ;;  %v7068_v31 = vadd.f32 %v9126_v44, %v11439_v28  ;;  %v6894_v56 = vpop.f32.mrb[11].mxu1  ;;  %v11480_v30 = vmul.f32 %v7067_v62, %v12123_v2 }
 0x7bb   : > { %v11483_v22 = vmul.f32 %v7065_v50, %v12121_v16  ;;  %v7066_v29 = vadd.f32 %v11439_v28, %v6894_v56 }
 0x7bc   : > { %v7250_v21 = vadd.f32 %v7249_v41, %v7248_v33  ;;  %v7139_v34 = vadd.f32 %v7138_v46, %v7137_v19  ;;  %v11495_v16 = vmul.f32 %v7068_v31, %v12124_v3  ;;  %v7216_v52 = vmul.f32 %v11480_v30, %v11480_v30 }
 0x7bd   : > { %v7140_v61 = vsel %vm631_vm2, %v11483_v22, 0.0  ;;  %v7214_v9 = vmul.f32 %v11483_v22, %v11483_v22  ;;  %v11492_v60 = vmul.f32 %v7066_v29, %v12122_v38  ;;  %v7144_v3 = vsel %vm631_vm2, %v11480_v30, 0.0 }
 0x7be   : > { %v7141_v2 = vadd.f32 %v7140_v61, %v7139_v34  ;;  %v7252_v15 = vadd.f32 %v7251_v47, %v7250_v21  ;;  %v7217_v41 = vmul.f32 %v11495_v16, %v11495_v16  ;;  %v7146_v46 = vsel %vm631_vm2, %v11495_v16, 0.0 }
 0x7bf   : > { %v7253_v63 = vsel %vm631_vm2, %v7214_v9, 0.0  ;;  %v7142_v1 = vsel %vm631_vm2, %v11492_v60, 0.0  ;;  %v9129_v62 = vpop.f32.mrb[12].mxu1  ;;  %v7215_v38 = vmul.f32 %v11492_v60, %v11492_v60  ;;  %v7257_v47 = vsel %vm631_vm2, %v7216_v52, 0.0 }
 0x7c0   : > { %v7254_v20 = vadd.f32 %v7253_v63, %v7252_v15  ;;  %v7143_v32 = vadd.f32 %v7142_v1, %v7141_v2  ;;  %v7071_v13 = vadd.f32 %v9129_v62, %v11439_v28  ;;  %v6907_v14 = vpop.f32.mrb[13].mxu1 }
 0x7c1   : > { %v7069_v50 = vadd.f32 %v11439_v28, %v6907_v14  ;;  %v9130_v44 = vpop.f32.mrb[14].mxu1  ;;  %v7255_v33 = vsel %vm631_vm2, %v7215_v38, 0.0 }
 0x7c2   : > { %v7145_v19 = vadd.f32 %v7144_v3, %v7143_v32  ;;  %v7072_v31 = vadd.f32 %v9130_v44, %v11439_v28  ;;  %v6910_v56 = vpop.f32.mrb[15].mxu1  ;;  %v7256_v29 = vadd.f32 %v7255_v33, %v7254_v20  ;;  %v11520_v61 = vmul.f32 %v7071_v13, %v12127_v36 }
 0x7c3   : > { %v11515_v21 = vmul.f32 %v7069_v50, %v12125_v45  ;;  %v7070_v34 = vadd.f32 %v11439_v28, %v6910_v56  ;;  %v7259_v45 = vsel %vm631_vm2, %v7217_v41, 0.0 }
 0x7c4   : > { %v7147_v9 = vadd.f32 %v7146_v46, %v7145_v19  ;;  %v7258_v2 = vadd.f32 %v7257_v47, %v7256_v29  ;;  %v11531_v20 = vmul.f32 %v7072_v31, %v12128_v35  ;;  %v7152_v35 = vsel %vm631_vm2, %v11520_v61, 0.0 }
 0x7c5   : > { %v7148_v15 = vsel %vm631_vm2, %v11515_v21, 0.0  ;;  %v7218_v63 = vmul.f32 %v11515_v21, %v11515_v21  ;;  %v11527_v1 = vmul.f32 %v7070_v34, %v12126_v8  ;;  %v7220_v8 = vmul.f32 %v11520_v61, %v11520_v61 }
 0x7c6   : > { %v7149_v62 = vadd.f32 %v7148_v15, %v7147_v9  ;;  %v7260_v52 = vadd.f32 %v7259_v45, %v7258_v2  ;;  %v7221_v31 = vmul.f32 %v11531_v20, %v11531_v20  ;;  %v7154_v34 = vsel %vm631_vm2, %v11531_v20, 0.0 }
 0x7c7   : > { %v7261_v36 = vsel %vm631_vm2, %v7218_v63, 0.0  ;;  %v7150_v32 = vsel %vm631_vm2, %v11527_v1, 0.0  ;;  %v7219_v38 = vmul.f32 %v11527_v1, %v11527_v1  ;;  %v9133_v13 = vpop.f32.mrb[16].mxu1  ;;  %v7265_v15 = vsel %vm631_vm2, %v7220_v8, 0.0 }
 0x7c8   : > { %v7151_v14 = vadd.f32 %v7150_v32, %v7149_v62  ;;  %v7075_v3 = vadd.f32 %v9133_v13, %v11439_v28  ;;  %v6923_v50 = vpop.f32.mrb[17].mxu1  ;;  %v7262_v44 = vadd.f32 %v7261_v36, %v7260_v52 }
 0x7c9   : > { %v7263_v41 = vsel %vm631_vm2, %v7219_v38, 0.0  ;;  %v7073_v19 = vadd.f32 %v11439_v28, %v6923_v50  ;;  %v9134_v33 = vpop.f32.mrb[18].mxu1 }
 0x7ca   : > { %v7153_v56 = vadd.f32 %v7152_v35, %v7151_v14  ;;  %v7076_v46 = vadd.f32 %v9134_v33, %v11439_v28  ;;  %v6926_v29 = vpop.f32.mrb[19].mxu1  ;;  %v7264_v47 = vadd.f32 %v7263_v41, %v7262_v44  ;;  %v11556_v63 = vmul.f32 %v7075_v3, %v12131_v11 }
 0x7cb   : > { %v11551_v9 = vmul.f32 %v7073_v19, %v12129_v18  ;;  %v7074_v2 = vadd.f32 %v11439_v28, %v6926_v29  ;;  %v7267_v18 = vsel %vm631_vm2, %v7221_v31, 0.0 }
 0x7cc   : > { %v7155_v45 = vadd.f32 %v7154_v34, %v7153_v56  ;;  %v7266_v62 = vadd.f32 %v7265_v15, %v7264_v47  ;;  %v11567_v13 = vmul.f32 %v7076_v46, %v12132_v59  ;;  %v7160_v59 = vsel %vm631_vm2, %v11556_v63, 0.0 }
 0x7cd   : > { %v7156_v52 = vsel %vm631_vm2, %v11551_v9, 0.0  ;;  %v7222_v36 = vmul.f32 %v11551_v9, %v11551_v9  ;;  %v11563_v32 = vmul.f32 %v7074_v2, %v12130_v10  ;;  %v7224_v10 = vmul.f32 %v11556_v63, %v11556_v63 }
 0x7ce   : > { %v7157_v38 = vadd.f32 %v7156_v52, %v7155_v45  ;;  %v7268_v8 = vadd.f32 %v7267_v18, %v7266_v62  ;;  %v7225_v46 = vmul.f32 %v11567_v13, %v11567_v13  ;;  %v7162_v2 = vsel %vm631_vm2, %v11567_v13, 0.0 }
 0x7cf   : > { %v7269_v11 = vsel %vm631_vm2, %v7222_v36, 0.0  ;;  %v7158_v14 = vsel %vm631_vm2, %v11563_v32, 0.0  ;;  %v7223_v3 = vmul.f32 %v11563_v32, %v11563_v32  ;;  %v9137_v50 = vpop.f32.mrb[20].mxu1  ;;  %v7273_v52 = vsel %vm631_vm2, %v7224_v10, 0.0 }
 0x7d0   : > { %v7159_v35 = vadd.f32 %v7158_v14, %v7157_v38  ;;  %v7079_v44 = vadd.f32 %v9137_v50, %v11439_v28  ;;  %v6939_v41 = vpop.f32.mrb[21].mxu1  ;;  %v7270_v19 = vadd.f32 %v7269_v11, %v7268_v8 }
 0x7d1   : > { %v7271_v33 = vsel %vm631_vm2, %v7223_v3, 0.0  ;;  %v7077_v31 = vadd.f32 %v11439_v28, %v6939_v41  ;;  %v9138_v56 = vpop.f32.mrb[22].mxu1 }
 0x7d2   : > { %v7161_v29 = vadd.f32 %v7160_v59, %v7159_v35  ;;  %v7080_v34 = vadd.f32 %v9138_v56, %v11439_v28  ;;  %v6942_v47 = vpop.f32.mrb[23].mxu1  ;;  %v7272_v15 = vadd.f32 %v7271_v33, %v7270_v19  ;;  %v11592_v36 = vmul.f32 %v7079_v44, %v12135_v4 }
 0x7d3   : > { %v11587_v45 = vmul.f32 %v7077_v31, %v12133_v17  ;;  %v7078_v62 = vadd.f32 %v11439_v28, %v6942_v47  ;;  %v7275_v17 = vsel %vm631_vm2, %v7225_v46, 0.0 }
 0x7d4   : > { %v7163_v18 = vadd.f32 %v7162_v2, %v7161_v29  ;;  %v7274_v38 = vadd.f32 %v7273_v52, %v7272_v15  ;;  %v11603_v50 = vmul.f32 %v7080_v34, %v12136_v6  ;;  %v7168_v6 = vsel %vm631_vm2, %v11592_v36, 0.0 }
 0x7d5   : > { %v7164_v8 = vsel %vm631_vm2, %v11587_v45, 0.0  ;;  %v7226_v11 = vmul.f32 %v11587_v45, %v11587_v45  ;;  %v11599_v14 = vmul.f32 %v7078_v62, %v12134_v12  ;;  %v7228_v12 = vmul.f32 %v11592_v36, %v11592_v36 }
 0x7d6   : > { %v7165_v3 = vadd.f32 %v7164_v8, %v7163_v18  ;;  %v7276_v10 = vadd.f32 %v7275_v17, %v7274_v38  ;;  %v7229_v34 = vmul.f32 %v11603_v50, %v11603_v50  ;;  %v7170_v62 = vsel %vm631_vm2, %v11603_v50, 0.0 }
 0x7d7   : > { %v7277_v4 = vsel %vm631_vm2, %v7226_v11, 0.0  ;;  %v7166_v35 = vsel %vm631_vm2, %v11599_v14, 0.0  ;;  %v7227_v44 = vmul.f32 %v11599_v14, %v11599_v14  ;;  %v9141_v41 = vpop.f32.mrb[24].mxu1  ;;  %v7281_v8 = vsel %vm631_vm2, %v7228_v12, 0.0 }
 0x7d8   : > { %v7167_v59 = vadd.f32 %v7166_v35, %v7165_v3  ;;  %v7083_v19 = vadd.f32 %v9141_v41, %v11439_v28  ;;  %v6955_v33 = vpop.f32.mrb[25].mxu1  ;;  %v7278_v31 = vadd.f32 %v7277_v4, %v7276_v10 }
 0x7d9   : > { %v7279_v56 = vsel %vm631_vm2, %v7227_v44, 0.0  ;;  %v7081_v46 = vadd.f32 %v11439_v28, %v6955_v33  ;;  %v9142_v29 = vpop.f32.mrb[26].mxu1 }
 0x7da   : > { %v7169_v47 = vadd.f32 %v7168_v6, %v7167_v59  ;;  %v7084_v2 = vadd.f32 %v9142_v29, %v11439_v28  ;;  %v6958_v15 = vpop.f32.mrb[27].mxu1  ;;  %v7280_v52 = vadd.f32 %v7279_v56, %v7278_v31  ;;  %v11628_v11 = vmul.f32 %v7083_v19, %v12139_v57 }
 0x7db   : > { %v11623_v18 = vmul.f32 %v7081_v46, %v12137_v23  ;;  %v7082_v38 = vadd.f32 %v11439_v28, %v6958_v15  ;;  %v7283_v23 = vsel %vm631_vm2, %v7229_v34, 0.0 }
 0x7dc   : > { %v7171_v17 = vadd.f32 %v7170_v62, %v7169_v47  ;;  %v7282_v3 = vadd.f32 %v7281_v8, %v7280_v52  ;;  %v11639_v41 = vmul.f32 %v7084_v2, %v12140_v51  ;;  %v7176_v51 = vsel %vm631_vm2, %v11628_v11, 0.0 }
 0x7dd   : > { %v7172_v10 = vsel %vm631_vm2, %v11623_v18, 0.0  ;;  %v7230_v4 = vmul.f32 %v11623_v18, %v11623_v18  ;;  %v11635_v35 = vmul.f32 %v7082_v38, %v12138_v24  ;;  %v7232_v24 = vmul.f32 %v11628_v11, %v11628_v11 }
 0x7de   : > { %v7173_v44 = vadd.f32 %v7172_v10, %v7171_v17  ;;  %v7284_v12 = vadd.f32 %v7283_v23, %v7282_v3  ;;  %v7233_v2 = vmul.f32 %v11639_v41, %v11639_v41  ;;  %v7178_v38 = vsel %vm631_vm2, %v11639_v41, 0.0 }
 0x7df   : > { %v7285_v57 = vsel %vm631_vm2, %v7230_v4, 0.0  ;;  %v7174_v59 = vsel %vm631_vm2, %v11635_v35, 0.0  ;;  %v7231_v19 = vmul.f32 %v11635_v35, %v11635_v35  ;;  %v9145_v33 = vpop.f32.mrb[28].mxu1  ;;  %v7289_v10 = vsel %vm631_vm2, %v7232_v24, 0.0 }
 0x7e0   : > { %v7175_v6 = vadd.f32 %v7174_v59, %v7173_v44  ;;  %v7087_v31 = vadd.f32 %v9145_v33, %v11439_v28  ;;  %v6971_v56 = vpop.f32.mrb[29].mxu1  ;;  %v7286_v46 = vadd.f32 %v7285_v57, %v7284_v12 }
 0x7e1   : > { %v7287_v29 = vsel %vm631_vm2, %v7231_v19, 0.0  ;;  %v7085_v34 = vadd.f32 %v11439_v28, %v6971_v56  ;;  %v9146_v47 = vpop.f32.mrb[30].mxu1 }
 0x7e2   : > { %v7177_v15 = vadd.f32 %v7176_v51, %v7175_v6  ;;  %v7088_v62 = vadd.f32 %v9146_v47, %v11439_v28  ;;  %v6974_v52 = vpop.f32.mrb[31].mxu1  ;;  %v7288_v8 = vadd.f32 %v7287_v29, %v7286_v46  ;;  %v11664_v4 = vmul.f32 %v7087_v31, %v12143_v27 }
 0x7e3   : > { %v11659_v17 = vmul.f32 %v7085_v34, %v12141_v55  ;;  %v7086_v3 = vadd.f32 %v11439_v28, %v6974_v52  ;;  %v7291_v55 = vsel %vm631_vm2, %v7233_v2, 0.0 }
 0x7e4   : > { %v7179_v23 = vadd.f32 %v7178_v38, %v7177_v15  ;;  %v7290_v44 = vadd.f32 %v7289_v10, %v7288_v8  ;;  %v11675_v33 = vmul.f32 %v7088_v62, %v12144_v53  ;;  %v7184_v53 = vsel %vm631_vm2, %v11664_v4, 0.0 }
 0x7e5   : > { %v7180_v12 = vsel %vm631_vm2, %v11659_v17, 0.0  ;;  %v7234_v57 = vmul.f32 %v11659_v17, %v11659_v17  ;;  %v11671_v59 = vmul.f32 %v7086_v3, %v12142_v7  ;;  %v7236_v7 = vmul.f32 %v11664_v4, %v11664_v4 }
 0x7e6   : > { %v7181_v19 = vadd.f32 %v7180_v12, %v7179_v23  ;;  %v7292_v24 = vadd.f32 %v7291_v55, %v7290_v44  ;;  %v7237_v62 = vmul.f32 %v11675_v33, %v11675_v33  ;;  %v7186_v3 = vsel %vm631_vm2, %v11675_v33, 0.0 }
 0x7e7   : > { %v7293_v27 = vsel %vm631_vm2, %v7234_v57, 0.0  ;;  %v7182_v6 = vsel %vm631_vm2, %v11671_v59, 0.0  ;;  %v7235_v31 = vmul.f32 %v11671_v59, %v11671_v59  ;;  %v9149_v56 = vpop.f32.mrb[32].mxu1  ;;  %v7297_v12 = vsel %vm631_vm2, %v7236_v7, 0.0 }
 0x7e8   : > { %v7183_v51 = vadd.f32 %v7182_v6, %v7181_v19  ;;  %v7091_v46 = vadd.f32 %v9149_v56, %v11439_v28  ;;  %v6987_v29 = vpop.f32.mrb[33].mxu1  ;;  %v7294_v34 = vadd.f32 %v7293_v27, %v7292_v24 }
 0x7e9   : > { %v7295_v47 = vsel %vm631_vm2, %v7235_v31, 0.0  ;;  %v7089_v2 = vadd.f32 %v11439_v28, %v6987_v29  ;;  %v9150_v15 = vpop.f32.mrb[34].mxu1 }
 0x7ea   : > { %v7185_v52 = vadd.f32 %v7184_v53, %v7183_v51  ;;  %v7092_v38 = vadd.f32 %v9150_v15, %v11439_v28  ;;  %v6990_v8 = vpop.f32.mrb[35].mxu1  ;;  %v7296_v10 = vadd.f32 %v7295_v47, %v7294_v34  ;;  %v11700_v57 = vmul.f32 %v7091_v46, %v12147_v39 }
 0x7eb   : > { %v11695_v23 = vmul.f32 %v7089_v2, %v12145_v43  ;;  %v7090_v44 = vadd.f32 %v11439_v28, %v6990_v8  ;;  %v7299_v43 = vsel %vm631_vm2, %v7237_v62, 0.0 }
 0x7ec   : > { %v7187_v55 = vadd.f32 %v7186_v3, %v7185_v52  ;;  %v7298_v19 = vadd.f32 %v7297_v12, %v7296_v10  ;;  %v11711_v56 = vmul.f32 %v7092_v38, %v12148_v5  ;;  %v7192_v5 = vsel %vm631_vm2, %v11700_v57, 0.0 }
 0x7ed   : > { %v7188_v24 = vsel %vm631_vm2, %v11695_v23, 0.0  ;;  %v7238_v27 = vmul.f32 %v11695_v23, %v11695_v23  ;;  %v11707_v6 = vmul.f32 %v7090_v44, %v12146_v26  ;;  %v7240_v26 = vmul.f32 %v11700_v57, %v11700_v57 }
 0x7ee   : > { %v7189_v31 = vadd.f32 %v7188_v24, %v7187_v55  ;;  %v7300_v7 = vadd.f32 %v7299_v43, %v7298_v19  ;;  %v7241_v38 = vmul.f32 %v11711_v56, %v11711_v56  ;;  %v7194_v44 = vsel %vm631_vm2, %v11711_v56, 0.0 }
 0x7ef   : > { %v7301_v39 = vsel %vm631_vm2, %v7238_v27, 0.0  ;;  %v7190_v51 = vsel %vm631_vm2, %v11707_v6, 0.0  ;;  %v7239_v46 = vmul.f32 %v11707_v6, %v11707_v6  ;;  %v9153_v29 = vpop.f32.mrb[36].mxu1  ;;  %v7305_v24 = vsel %vm631_vm2, %v7240_v26, 0.0 }
 0x7f0   : > { %v7191_v53 = vadd.f32 %v7190_v51, %v7189_v31  ;;  %v7095_v34 = vadd.f32 %v9153_v29, %v11439_v28  ;;  %v7003_v47 = vpop.f32.mrb[37].mxu1  ;;  %v7302_v2 = vadd.f32 %v7301_v39, %v7300_v7 }
 0x7f1   : > { %v7303_v15 = vsel %vm631_vm2, %v7239_v46, 0.0  ;;  %v7093_v62 = vadd.f32 %v11439_v28, %v7003_v47  ;;  %v9154_v52 = vpop.f32.mrb[38].mxu1 }
 0x7f2   : > { %v7193_v8 = vadd.f32 %v7192_v5, %v7191_v53  ;;  %v7096_v3 = vadd.f32 %v9154_v52, %v11439_v28  ;;  %v7006_v10 = vpop.f32.mrb[39].mxu1  ;;  %v7304_v12 = vadd.f32 %v7303_v15, %v7302_v2  ;;  %v11736_v27 = vmul.f32 %v7095_v34, %v12151_v58 }
 0x7f3   : > { %v11731_v55 = vmul.f32 %v7093_v62, %v12149_v49  ;;  %v7094_v19 = vadd.f32 %v11439_v28, %v7006_v10  ;;  %v7307_v49 = vsel %vm631_vm2, %v7241_v38, 0.0 }
 0x7f4   : > { %v7195_v43 = vadd.f32 %v7194_v44, %v7193_v8  ;;  %v7306_v31 = vadd.f32 %v7305_v24, %v7304_v12  ;;  %v11747_v28 = vmul.f32 %v7096_v3, %v12152_v48  ;;  %v7244_v34 = vmul.f32 %v11736_v27, %v11736_v27 }
 0x7f5   : > { %v7196_v7 = vsel %vm631_vm2, %v11731_v55, 0.0  ;;  %v7242_v39 = vmul.f32 %v11731_v55, %v11731_v55  ;;  %v11743_v51 = vmul.f32 %v7094_v19, %v12150_v37  ;;  %v7200_v47 = vsel %vm631_vm2, %v11736_v27, 0.0 }
 0x7f6   : > { %v7197_v46 = vadd.f32 %v7196_v7, %v7195_v43  ;;  %v7308_v29 = vadd.f32 %v7307_v49, %v7306_v31  ;;  %v7245_v2 = vmul.f32 %v11747_v28, %v11747_v28  ;;  %v7202_v62 = vsel %vm631_vm2, %v11747_v28, 0.0 }
 0x7f7   : > { %v7309_v58 = vsel %vm631_vm2, %v7242_v39, 0.0  ;;  %v7198_v26 = vsel %vm631_vm2, %v11743_v51, 0.0  ;;  %v7243_v53 = vmul.f32 %v11743_v51, %v11743_v51  ;;  %v7313_v38 = vsel %vm631_vm2, %v7244_v34, 0.0 }
 0x7f8   : > { %v7199_v37 = vadd.f32 %v7198_v26, %v7197_v46  ;;  %v7310_v5 = vadd.f32 %v7309_v58, %v7308_v29  ;;  %v7315_v10 = vsel %vm631_vm2, %v7245_v2, 0.0  ;;  %v12154_v26 = vmov 0.0  }
 0x7f9   : > { %v7311_v48 = vsel %vm631_vm2, %v7243_v53, 0.0 }
 0x7fa   : > { %v7201_v15 = vadd.f32 %v7200_v47, %v7199_v37  ;;  %v7312_v52 = vadd.f32 %v7311_v48, %v7310_v5 }
 0x7fc   : > { %v7203_v8 = vadd.f32 %v7202_v62, %v7201_v15  ;;  %v7314_v3 = vadd.f32 %v7313_v38, %v7312_v52  ;;  %v12155_v38 = vld [vmem:[#allocation35_spill] sm:$0xff] }
 0x7fe   : > { %v7204_v44 = vrot.slane %v7203_v8, 4  ;;  %v7316_v12 = vadd.f32 %v7315_v10, %v7314_v3 }
 0x800   : > { %v7205_v19 = vadd.f32 %v7204_v44, %v7203_v8  ;;  %v7317_v24 = vrot.slane %v7316_v12, 4 }
 0x802   : > { %v7206_v43 = vrot.slane %v7205_v19, 2  ;;  %v7318_v31 = vadd.f32 %v7317_v24, %v7316_v12 }
 0x804   : > { %v7207_v7 = vadd.f32 %v7206_v43, %v7205_v19  ;;  %v7319_v39 = vrot.slane %v7318_v31, 2 }
 0x806   : > { %v7208_v49 = vrot.slane %v7207_v7, 1  ;;  %v7320_v46 = vadd.f32 %v7319_v39, %v7318_v31 }
 0x808   : > { %v7209_v29 = vadd.f32 %v7208_v49, %v7207_v7  ;;  %v7321_v58 = vrot.slane %v7320_v46, 1 }
 0x80a   : > { %9160 = vmatmul.mubr.msk.f32.vlgmr.msra.gmra.mrb[36].mxu0 %vm631_vm2, %v7209_v29  ;;  %v7322_v53 = vadd.f32 %v7321_v58, %v7320_v46 }
 0x80b   : > { %9180 = vmatpush3.bf16.msra.mxu0 %v11432_v25  ;;  %9166 = vmatprep.mubr.msk.f32.mxu0 %vm9805_vm3, %v12154_v26 }
 0x80e   : > { %9167 = vmatmul.mubr.msk.f32.vlgmr.msra.gmra.mrb[38].mxu0 %vm631_vm2, %v7322_v53 }
 0x8dd   : > { %v7394_v34 = vpop.f32.mrb[36].mxu0 }
 0x8de   : > { %v9161_v37 = vpop.f32.mrb[37].mxu0  ;;  %v7398_v48 = vmul.f32 0.001953125, %v7394_v34 }
 0x8e0   : > { %v7473_v2 = vmul.f32 %v7398_v48, %v7398_v48  ;;  %v11771_v8 = vrot.slane %v7398_v48, %v12155_v38 }
 0x8e1   : > { %v7468_v47 = vpop.f32.mrb[38].mxu0 }
 0x8e2   : > { %v9168_v5 = vpop.f32.mrb[39].mxu0  ;;  %v7472_v15 = vmul.f32 0.001953125, %v7468_v47  ;;  %v7481_v25 = vsub.f32 %v11448_v54, %v11771_v8  ;;  %v7482_v3 = vsub.f32 %v11457_v40, %v11771_v8  ;;  %v7483_v10 = vsub.f32 %v11444_v42, %v11771_v8 }
 0x8e3   : > { %v7484_v44 = vsub.f32 %v11454_v0, %v11771_v8  ;;  %v7485_v12 = vsub.f32 %v11483_v22, %v11771_v8  ;;  %v7486_v19 = vsub.f32 %v11492_v60, %v11771_v8  ;;  %v7487_v24 = vsub.f32 %v11480_v30, %v11771_v8 }
 0x8e4   : > { %v7474_v62 = vsub.f32 %v7472_v15, %v7473_v2  ;;  %v7488_v54 = vsub.f32 %v11495_v16, %v11771_v8  ;;  %v7489_v40 = vsub.f32 %v11515_v21, %v11771_v8  ;;  %v7490_v42 = vsub.f32 %v11527_v1, %v11771_v8  ;;  %v7517_v16 = vld [vmem:[%s12013_s8] sm:$0x1] }
 0x8e5   : > { %v7491_v0 = vsub.f32 %v11520_v61, %v11771_v8  ;;  %v7492_v22 = vsub.f32 %v11531_v20, %v11771_v8  ;;  %v7493_v60 = vsub.f32 %v11551_v9, %v11771_v8  ;;  %v7494_v30 = vsub.f32 %v11563_v32, %v11771_v8 }
 0x8e6   : > { %v7475_v52 = vadd.f32 1e-05, %v7474_v62  ;;  %v7495_v21 = vsub.f32 %v11556_v63, %v11771_v8  ;;  %v7496_v1 = vsub.f32 %v11567_v13, %v11771_v8  ;;  %v7497_v61 = vsub.f32 %v11587_v45, %v11771_v8 }
 0x8e7   : > { %v7498_v20 = vsub.f32 %v11599_v14, %v11771_v8  ;;  %v7499_v32 = vsub.f32 %v11592_v36, %v11771_v8  ;;  %v7500_v43 = vsub.f32 %v11603_v50, %v11771_v8  ;;  %v7501_v31 = vsub.f32 %v11623_v18, %v11771_v8 }
 0x8e8   : > { %9793 = vrsqrt.f32 %v7475_v52  ;;  %v7502_v63 = vsub.f32 %v11635_v35, %v11771_v8  ;;  %v7503_v13 = vsub.f32 %v11628_v11, %v11771_v8  ;;  %v7504_v45 = vsub.f32 %v11639_v41, %v11771_v8 }
 0x8e9   : > { %v7505_v14 = vsub.f32 %v11659_v17, %v11771_v8  ;;  %v7506_v36 = vsub.f32 %v11671_v59, %v11771_v8  ;;  %v7507_v50 = vsub.f32 %v11664_v4, %v11771_v8  ;;  %v7508_v18 = vsub.f32 %v11675_v33, %v11771_v8 }
 0x8ea   : > { %v7509_v35 = vsub.f32 %v11695_v23, %v11771_v8  ;;  %v7510_v11 = vsub.f32 %v11707_v6, %v11771_v8  ;;  %v7511_v41 = vsub.f32 %v11700_v57, %v11771_v8  ;;  %v7512_v17 = vsub.f32 %v11711_v56, %v11771_v8 }
 0x8eb   : > { %v7513_v4 = vsub.f32 %v11731_v55, %v11771_v8  ;;  %v7514_v33 = vsub.f32 %v11743_v51, %v11771_v8  ;;  %v7515_v23 = vsub.f32 %v11736_v27, %v11771_v8  ;;  %v7516_v6 = vsub.f32 %v11747_v28, %v11771_v8 }
 0x8f2   : > { %v9794_v9 = vpop.eup %9793 }
 0x8f3   : > { %v7518_v7 = vmul.f32 %v9794_v9, %v7517_v16 }
 0x8f5   : > { %v7522_v59 = vrot.slane %v7518_v7, %v12155_v38 }
 0x8f7   : > { %v7523_v39 = vmul.f32 %v7522_v59, %v7481_v25  ;;  %v7524_v49 = vmul.f32 %v7522_v59, %v7482_v3  ;;  %v7525_v57 = vmul.f32 %v7522_v59, %v7483_v10  ;;  %v7526_v46 = vmul.f32 %v7522_v59, %v7484_v44 }
 0x8f8   : > { %v7527_v29 = vmul.f32 %v7522_v59, %v7485_v12  ;;  %v7528_v56 = vmul.f32 %v7522_v59, %v7486_v19  ;;  %v7529_v58 = vmul.f32 %v7522_v59, %v7487_v24  ;;  %v7530_v26 = vmul.f32 %v7522_v59, %v7488_v54  ;;  %v8100_v12 = vld [vmem:[%s12014_s9] ss:$0 sm:$0xff] }
 0x8f9   : > { %v7531_v53 = vmul.f32 %v7522_v59, %v7489_v40  ;;  %v7532_v34 = vmul.f32 %v7522_v59, %v7490_v42  ;;  %v7533_v55 = vmul.f32 %v7522_v59, %v7491_v0  ;;  %v7534_v37 = vmul.f32 %v7522_v59, %v7492_v22 }
 0x8fa   : > { %v7535_v47 = vmul.f32 %v7522_v59, %v7493_v60  ;;  %v7536_v51 = vmul.f32 %v7522_v59, %v7494_v30  ;;  %v7537_v5 = vmul.f32 %v7522_v59, %v7495_v21  ;;  %v7538_v48 = vmul.f32 %v7522_v59, %v7496_v1 }
 0x8fb   : > { %v7539_v27 = vmul.f32 %v7522_v59, %v7497_v61  ;;  %v7540_v2 = vmul.f32 %v7522_v59, %v7498_v20  ;;  %v7541_v15 = vmul.f32 %v7522_v59, %v7499_v32  ;;  %v7542_v28 = vmul.f32 %v7522_v59, %v7500_v43 }
 0x8fc   : > { %v7543_v62 = vmul.f32 %v7522_v59, %v7501_v31  ;;  %v7544_v52 = vmul.f32 %v7522_v59, %v7502_v63  ;;  %v7545_v38 = vmul.f32 %v7522_v59, %v7503_v13  ;;  %v7546_v8 = vmul.f32 %v7522_v59, %v7504_v45 }
 0x8fd   : > { %v7547_v25 = vmul.f32 %v7522_v59, %v7505_v14  ;;  %v7548_v3 = vmul.f32 %v7522_v59, %v7506_v36  ;;  %v7549_v10 = vmul.f32 %v7522_v59, %v7507_v50  ;;  %v7550_v44 = vmul.f32 %v7522_v59, %v7508_v18 }
 0x8fe   : > { %v7551_v19 = vmul.f32 %v7522_v59, %v7509_v35  ;;  %v7552_v24 = vmul.f32 %v7522_v59, %v7510_v11  ;;  %v7553_v54 = vmul.f32 %v7522_v59, %v7511_v41  ;;  %v7554_v40 = vmul.f32 %v7522_v59, %v7512_v17 }
 0x8ff   : > { %v7555_v42 = vmul.f32 %v7522_v59, %v7513_v4  ;;  %v7556_v0 = vmul.f32 %v7522_v59, %v7514_v33  ;;  %v7557_v22 = vmul.f32 %v7522_v59, %v7515_v23  ;;  %v7558_v60 = vmul.f32 %v7522_v59, %v7516_v6 }
 0x900   : > { %v7566_v30 = vadd.f32 %v8100_v12, %v7523_v39  ;;  %v7567_v16 = vadd.f32 %v8100_v12, %v7524_v49  ;;  %v7568_v21 = vadd.f32 %v8100_v12, %v7525_v57  ;;  %v7569_v1 = vadd.f32 %v8100_v12, %v7526_v46 }
 0x901   : > { %v7570_v61 = vadd.f32 %v8100_v12, %v7527_v29  ;;  %v7571_v20 = vadd.f32 %v8100_v12, %v7528_v56  ;;  %v7572_v9 = vadd.f32 %v8100_v12, %v7529_v58  ;;  %v7573_v32 = vadd.f32 %v8100_v12, %v7530_v26 }
 0x902   : > { %v7574_v43 = vadd.f32 %v8100_v12, %v7531_v53  ;;  %v7575_v31 = vadd.f32 %v8100_v12, %v7532_v34  ;;  %v7576_v63 = vadd.f32 %v8100_v12, %v7533_v55  ;;  %v7577_v13 = vadd.f32 %v8100_v12, %v7534_v37 }
 0x903   : > { %v11852_v45 = vadd.f32 %v8100_v12, %v7535_v47  ;;  %v11854_v14 = vadd.f32 %v8100_v12, %v7536_v51  ;;  %v11856_v7 = vadd.f32 %v8100_v12, %v7537_v5  ;;  %v11858_v36 = vadd.f32 %v8100_v12, %v7538_v48 }
 0x904   : > { %v11861_v50 = vadd.f32 %v8100_v12, %v7539_v27  ;;  %v11863_v18 = vadd.f32 %v8100_v12, %v7540_v2  ;;  %v11865_v35 = vadd.f32 %v8100_v12, %v7541_v15  ;;  %v11867_v11 = vadd.f32 %v8100_v12, %v7542_v28 }
 0x905   : > { %v11869_v41 = vadd.f32 %v8100_v12, %v7543_v62  ;;  %v11871_v17 = vadd.f32 %v8100_v12, %v7544_v52  ;;  %v11873_v59 = vadd.f32 %v8100_v12, %v7545_v38  ;;  %v11875_v4 = vadd.f32 %v8100_v12, %v7546_v8 }
 0x906   : > { %v11877_v33 = vadd.f32 %v8100_v12, %v7547_v25  ;;  %v11879_v23 = vadd.f32 %v8100_v12, %v7548_v3  ;;  %v11881_v6 = vadd.f32 %v8100_v12, %v7549_v10  ;;  %v11883_v39 = vadd.f32 %v8100_v12, %v7550_v44 }
 0x907   : > { %v11885_v49 = vadd.f32 %v8100_v12, %v7551_v19  ;;  %v11887_v57 = vadd.f32 %v8100_v12, %v7552_v24  ;;  %v11889_v46 = vadd.f32 %v8100_v12, %v7553_v54  ;;  %v11891_v29 = vadd.f32 %v8100_v12, %v7554_v40 }
 0x908   : > { %v11898_v56 = vadd.f32 %v8100_v12, %v7555_v42  ;;  %v11900_v58 = vadd.f32 %v8100_v12, %v7556_v0  ;;  %v11902_v26 = vadd.f32 %v8100_v12, %v7557_v22  ;;  %v11904_v53 = vadd.f32 %v8100_v12, %v7558_v60 }
 0x909   : > { %v7602_v34 = vmax.f32 %v7566_v30, 0.0  ;;  %v7603_v55 = vmax.f32 %v7567_v16, 0.0  ;;  %v7604_v37 = vmax.f32 %v7568_v21, 0.0  ;;  %v7605_v47 = vmax.f32 %v7569_v1, 0.0 }
 0x90a   : > { %v7606_v51 = vmax.f32 %v7570_v61, 0.0  ;;  %v7607_v5 = vmax.f32 %v7571_v20, 0.0  ;;  %v7608_v48 = vmax.f32 %v7572_v9, 0.0  ;;  %v7609_v27 = vmax.f32 %v7573_v32, 0.0 }
 0x90b   : > { %v7610_v2 = vmax.f32 %v7574_v43, 0.0  ;;  %v7611_v15 = vmax.f32 %v7575_v31, 0.0  ;;  %v7612_v28 = vmax.f32 %v7576_v63, 0.0  ;;  %v7613_v62 = vmax.f32 %v7577_v13, 0.0  ;;  %7638 = vst.msk [vmem:[%s11896_s16] sm:$0xff] %vm631_vm2, %v7602_v34  ;;  %7639 = vst.msk [vmem:[%s11896_s16 + $0x8] sm:$0xff] %vm631_vm2, %v7603_v55 }
 0x90c   : > { %7640 = vst.msk [vmem:[%s11896_s16 + $0x10] sm:$0xff] %vm631_vm2, %v7604_v37  ;;  %7641 = vst.msk [vmem:[%s11896_s16 + $0x18] sm:$0xff] %vm631_vm2, %v7605_v47  ;;  %v7614_v52 = vmax.f32 %v11852_v45, 0.0  ;;  %v7615_v38 = vmax.f32 %v11854_v14, 0.0  ;;  %v7616_v8 = vmax.f32 %v11856_v7, 0.0  ;;  %v7617_v25 = vmax.f32 %v11858_v36, 0.0 }
 0x90d   : > { %7642 = vst.msk [vmem:[%s11896_s16 + $0x20] sm:$0xff] %vm631_vm2, %v7606_v51  ;;  %7643 = vst.msk [vmem:[%s11896_s16 + $0x28] sm:$0xff] %vm631_vm2, %v7607_v5  ;;  %v7618_v3 = vmax.f32 %v11861_v50, 0.0  ;;  %v7619_v10 = vmax.f32 %v11863_v18, 0.0  ;;  %v7620_v44 = vmax.f32 %v11865_v35, 0.0  ;;  %v7621_v12 = vmax.f32 %v11867_v11, 0.0 }
 0x90e   : > { %7644 = vst.msk [vmem:[%s11896_s16 + $0x30] sm:$0xff] %vm631_vm2, %v7608_v48  ;;  %7645 = vst.msk [vmem:[%s11896_s16 + $0x38] sm:$0xff] %vm631_vm2, %v7609_v27  ;;  %v7622_v19 = vmax.f32 %v11869_v41, 0.0  ;;  %v7623_v24 = vmax.f32 %v11871_v17, 0.0  ;;  %v7624_v54 = vmax.f32 %v11873_v59, 0.0  ;;  %v7625_v40 = vmax.f32 %v11875_v4, 0.0 }
 0x90f   : > { %7646 = vst.msk [vmem:[%s11896_s16 + $0x40] sm:$0xff] %vm631_vm2, %v7610_v2  ;;  %7647 = vst.msk [vmem:[%s11896_s16 + $0x48] sm:$0xff] %vm631_vm2, %v7611_v15  ;;  %v7626_v42 = vmax.f32 %v11877_v33, 0.0  ;;  %v7627_v0 = vmax.f32 %v11879_v23, 0.0  ;;  %v7628_v22 = vmax.f32 %v11881_v6, 0.0  ;;  %v7629_v60 = vmax.f32 %v11883_v39, 0.0 }
 0x910   : > { %7648 = vst.msk [vmem:[%s11896_s16 + $0x50] sm:$0xff] %vm631_vm2, %v7612_v28  ;;  %7649 = vst.msk [vmem:[%s11896_s16 + $0x58] sm:$0xff] %vm631_vm2, %v7613_v62  ;;  %v7630_v30 = vmax.f32 %v11885_v49, 0.0  ;;  %v7631_v16 = vmax.f32 %v11887_v57, 0.0  ;;  %v7632_v21 = vmax.f32 %v11889_v46, 0.0  ;;  %v7633_v1 = vmax.f32 %v11891_v29, 0.0 }
 0x911   : > { %7650 = vst.msk [vmem:[%s11896_s16 + $0x60] sm:$0xff] %vm631_vm2, %v7614_v52  ;;  %7651 = vst.msk [vmem:[%s11896_s16 + $0x68] sm:$0xff] %vm631_vm2, %v7615_v38  ;;  %v7634_v61 = vmax.f32 %v11898_v56, 0.0  ;;  %v7635_v20 = vmax.f32 %v11900_v58, 0.0  ;;  %v7636_v9 = vmax.f32 %v11902_v26, 0.0  ;;  %v7637_v32 = vmax.f32 %v11904_v53, 0.0 }
 0x912   : > { %7652 = vst.msk [vmem:[%s11896_s16 + $0x70] sm:$0xff] %vm631_vm2, %v7616_v8  ;;  %7653 = vst.msk [vmem:[%s11896_s16 + $0x78] sm:$0xff] %vm631_vm2, %v7617_v25 }
 0x913   : > { %7654 = vst.msk [vmem:[%s11896_s16 + $0x80] sm:$0xff] %vm631_vm2, %v7618_v3  ;;  %7655 = vst.msk [vmem:[%s11896_s16 + $0x88] sm:$0xff] %vm631_vm2, %v7619_v10 }
 0x914   : > { %7656 = vst.msk [vmem:[%s11896_s16 + $0x90] sm:$0xff] %vm631_vm2, %v7620_v44  ;;  %7657 = vst.msk [vmem:[%s11896_s16 + $0x98] sm:$0xff] %vm631_vm2, %v7621_v12 }
 0x915   : > { %7658 = vst.msk [vmem:[%s11896_s16 + $0xa0] sm:$0xff] %vm631_vm2, %v7622_v19  ;;  %7659 = vst.msk [vmem:[%s11896_s16 + $0xa8] sm:$0xff] %vm631_vm2, %v7623_v24 }
 0x916   : > { %7660 = vst.msk [vmem:[%s11896_s16 + $0xb0] sm:$0xff] %vm631_vm2, %v7624_v54  ;;  %7661 = vst.msk [vmem:[%s11896_s16 + $0xb8] sm:$0xff] %vm631_vm2, %v7625_v40 }
 0x917   : > { %7662 = vst.msk [vmem:[%s11896_s16 + $0xc0] sm:$0xff] %vm631_vm2, %v7626_v42  ;;  %7663 = vst.msk [vmem:[%s11896_s16 + $0xc8] sm:$0xff] %vm631_vm2, %v7627_v0 }
 0x918   : > { %7664 = vst.msk [vmem:[%s11896_s16 + $0xd0] sm:$0xff] %vm631_vm2, %v7628_v22  ;;  %7665 = vst.msk [vmem:[%s11896_s16 + $0xd8] sm:$0xff] %vm631_vm2, %v7629_v60 }
 0x919   : > { %7666 = vst.msk [vmem:[%s11896_s16 + $0xe0] sm:$0xff] %vm631_vm2, %v7630_v30  ;;  %7667 = vst.msk [vmem:[%s11896_s16 + $0xe8] sm:$0xff] %vm631_vm2, %v7631_v16 }
 0x91a   : > { %7668 = vst.msk [vmem:[%s11896_s16 + $0xf0] sm:$0xff] %vm631_vm2, %v7632_v21  ;;  %7669 = vst.msk [vmem:[%s11896_s16 + $0xf8] sm:$0xff] %vm631_vm2, %v7633_v1 }
 0x91b   : > { %7670 = vst.msk [vmem:[%s11896_s16 + $0x100] sm:$0xff] %vm631_vm2, %v7634_v61  ;;  %7671 = vst.msk [vmem:[%s11896_s16 + $0x108] sm:$0xff] %vm631_vm2, %v7635_v20 }
 0x91c   : > { %7672 = vst.msk [vmem:[%s11896_s16 + $0x110] sm:$0xff] %vm631_vm2, %v7636_v9  ;;  %7673 = vst.msk [vmem:[%s11896_s16 + $0x118] sm:$0xff] %vm631_vm2, %v7637_v32 }
 0x91d PF: > { %s22_s21 = sadd.s32 1, %s9801_s21  }
 0x91e   : > { %p19_p4 = scmp.ge.s32.totalorder %s22_s21, 4  }
 0x920   :  { %21 = sbr.rel (!%p19_p4) target bundleno = 1 (0x1), region = 114 }

</bundles_post_ra>
